<compile_context>
chip_gen: v5e
topology: v5e:2x2
jax: 0.10.0
libtpu: 0.0.40
codegen_flags: <defaults>
</compile_context>

<pallas_src>
import functools

import jax
import jax.numpy as jnp
from jax.experimental import pallas as pl
from jax.experimental.pallas import tpu as pltpu

# Set to jnp.bfloat16 on v6e/v7x for ~2x MXU throughput and half the HBM traffic
# (accumulation stays f32 via preferred_element_type).  f32 default preserves
# exact reference semantics.
MXU_INPUT_DTYPE = jnp.float32


def _round_up(x, m):
    return (x + m - 1) // m * m


# -------------- fused matmul + BN affine (+ residual) (+ ReLU) kernel --------------

def _matmul_bn_kernel(*refs, relu, has_residual):
    if has_residual:
        a_ref, b_ref, s_ref, t_ref, r_ref, o_ref = refs
    else:
        a_ref, b_ref, s_ref, t_ref, o_ref = refs
        r_ref = None
    acc = jnp.dot(a_ref[...], b_ref[...], preferred_element_type=jnp.float32)
    out = acc * s_ref[...] + t_ref[...]
    if r_ref is not None:
        out = out + r_ref[...]
    if relu:
        out = jnp.maximum(out, 0.0)
    o_ref[...] = out


def matmul_bn_act(a, b, scale, shift, residual=None, relu=False):
    """(M,K)@(K,N) * scale + shift [+ residual] [-> ReLU], tiled over M and N."""
    M, K = a.shape
    N = b.shape[1]
    Np = _round_up(N, 128)                       # lane-dense output columns
    TM = min(256, _round_up(M, 8))               # row tile (multiple of 8)
    Mp = _round_up(M, TM)
    TN = 256 if Np % 256 == 0 else 128
    TN = min(TN, Np)

    a_p = jnp.pad(a.astype(MXU_INPUT_DTYPE), ((0, Mp - M), (0, 0)))
    b_p = jnp.pad(b.astype(MXU_INPUT_DTYPE), ((0, 0), (0, Np - N)))
    s_p = jnp.pad(scale.reshape(1, N).astype(jnp.float32), ((0, 0), (0, Np - N)))
    t_p = jnp.pad(shift.reshape(1, N).astype(jnp.float32), ((0, 0), (0, Np - N)))

    ins = [a_p, b_p, s_p, t_p]
    in_specs = [
        pl.BlockSpec((TM, K), lambda i, j: (i, 0)),
        pl.BlockSpec((K, TN), lambda i, j: (0, j)),
        pl.BlockSpec((1, TN), lambda i, j: (0, j)),
        pl.BlockSpec((1, TN), lambda i, j: (0, j)),
    ]
    if residual is not None:
        ins.append(jnp.pad(residual.astype(jnp.float32),
                           ((0, Mp - M), (0, Np - N))))
        in_specs.append(pl.BlockSpec((TM, TN), lambda i, j: (i, j)))

    out = pl.pallas_call(
        functools.partial(_matmul_bn_kernel, relu=relu,
                          has_residual=residual is not None),
        grid=(Mp // TM, Np // TN),
        in_specs=in_specs,
        out_specs=pl.BlockSpec((TM, TN), lambda i, j: (i, j)),
        out_shape=jax.ShapeDtypeStruct((Mp, Np), jnp.float32),
        compiler_params=pltpu.CompilerParams(
            dimension_semantics=("parallel", "parallel")),
    )(*ins)
    return out[:M, :N]


# ------------- depthwise 3x3 (+BN affine, +ReLU) / 3x3 avg-pool kernel -------------

def _dw3x3_kernel(*refs, stride, relu, unit_taps):
    if stride == 1:
        x_refs = refs[:1]
        w_ref, s_ref, t_ref, o_ref = refs[1:]
    else:
        x_refs = refs[:4]
        w_ref, s_ref, t_ref, o_ref = refs[4:]
    Ho, Wo = o_ref.shape[1], o_ref.shape[2]
    acc = jnp.zeros(o_ref.shape, jnp.float32)
    for kh in range(3):
        for kw in range(3):
            if stride == 1:
                win = x_refs[0][:, kh:kh + Ho, kw:kw + Wo, :]
            else:  # 2x2 phase-decomposed input -> contiguous slices only
                win = x_refs[(kh % 2) * 2 + (kw % 2)][
                    :, kh // 2:kh // 2 + Ho, kw // 2:kw // 2 + Wo, :]
            acc = acc + (win if unit_taps else win * w_ref[kh * 3 + kw])
    out = acc * s_ref[...] + t_ref[...]
    if relu:
        out = jnp.maximum(out, 0.0)
    o_ref[...] = out


def depthwise3x3_bn(x, w9, scale, shift, stride, relu=False, unit_taps=False):
    """3x3 depthwise conv (pad=1, stride in {1,2}) + per-channel affine [+ ReLU].

    unit_taps=True skips the per-tap multiply (avg-pool: 1/9 folded into `scale`).
    For stride 2 the output is computed directly at the subsampled resolution.
    """
    assert stride in (1, 2)
    N, H, W, C = x.shape
    Ho = (H - 1) // stride + 1
    Wo = (W - 1) // stride + 1
    x = x.astype(jnp.float32)

    if stride == 1:
        xp = jnp.pad(x, ((0, 0), (1, 1), (1, 1), (0, 0)))
        ins = [xp]
        in_specs = [pl.BlockSpec((1, H + 2, W + 2, C), lambda b: (b, 0, 0, 0))]
    else:
        # zero-pad (pad=1, rounded up to even extent) and split into 2x2 spatial
        # phases so the kernel reads only contiguous slices while producing the
        # stride-2 output directly (no 4x wasted work, no strided loads).
        Hp, Wp = H + 2 + (H % 2), W + 2 + (W % 2)
        xp = jnp.pad(x, ((0, 0), (1, Hp - H - 1), (1, Wp - W - 1), (0, 0)))
        ins = [xp[:, a::2, b::2, :] for a in range(2) for b in range(2)]
        Hh, Wh = Hp // 2, Wp // 2
        in_specs = [pl.BlockSpec((1, Hh, Wh, C), lambda b: (b, 0, 0, 0))
                    for _ in range(4)]
    # TODO(synk): for large H*W*C (e.g. 224x224 inputs) tile over output-row blocks
    # with a 1-row halo instead of one full (H,W,C) block per batch element (VMEM).

    return pl.pallas_call(
        functools.partial(_dw3x3_kernel, stride=stride, relu=relu,
                          unit_taps=unit_taps),
        grid=(N,),
        in_specs=in_specs + [
            pl.BlockSpec((9, 1, 1, C), lambda b: (0, 0, 0, 0)),
            pl.BlockSpec((1, 1, 1, C), lambda b: (0, 0, 0, 0)),
            pl.BlockSpec((1, 1, 1, C), lambda b: (0, 0, 0, 0)),
        ],
        out_specs=pl.BlockSpec((1, Ho, Wo, C), lambda b: (b, 0, 0, 0)),
        out_shape=jax.ShapeDtypeStruct((N, Ho, Wo, C), jnp.float32),
        compiler_params=pltpu.CompilerParams(dimension_semantics=("parallel",)),
    )(*ins, w9.astype(jnp.float32),
      scale.reshape(1, 1, 1, C).astype(jnp.float32),
      shift.reshape(1, 1, 1, C).astype(jnp.float32))


# ------------------------------ ShuffleUnit forward ------------------------------

def shuffle_unit(x, p):
    """One ShuffleUnit on NHWC activations (ChannelShuffle folded into weights)."""
    N, H, W, Cin = x.shape
    stride = p["stride"]

    # bottleneck 1x1 (block-diagonal grouped weight) + BN + ReLU: one fused matmul
    y = matmul_bn_act(x.reshape(N * H * W, Cin), p["w_b"], p["s_b"], p["t_b"],
                      relu=True)
    y = y.reshape(N, H, W, -1)

    # depthwise 3x3 (stride) + folded double BN (shuffle already folded in)
    y = depthwise3x3_bn(y, p["dw_w9"], p["dw_s"], p["dw_t"], stride)
    Nn, Ho, Wo, Cmid = y.shape
    yf = y.reshape(Nn * Ho * Wo, Cmid)

    if p["cat"]:
        # shortcut: 3x3 avg-pool (stride) with the final ReLU fused in-kernel
        res = depthwise3x3_bn(x, p["pool_w9"], p["pool_s"], p["pool_t"], stride,
                              relu=True, unit_taps=True)
        # expand 1x1 + BN with the final ReLU fused in-kernel
        z = matmul_bn_act(yf, p["w_e"], p["s_e"], p["t_e"], relu=True)
        z = z.reshape(Nn, Ho, Wo, -1)
        # TODO(synk): write the two halves into channel offsets of one shared output
        # buffer (input_output_aliases) instead of an XLA channel concat.
        return jnp.concatenate([res, z], axis=-1)

    # expand 1x1 + BN + residual add + ReLU fused into one matmul epilogue
    resf = x.reshape(N * H * W, Cin)
    z = matmul_bn_act(yf, p["w_e"], p["s_e"], p["t_e"], residual=resf, relu=True)
    return z.reshape(N, Ho, Wo, -1)


def shuffle_units_forward(x_nchw, units):
    x = jnp.transpose(x_nchw, (0, 2, 3, 1)).astype(jnp.float32)   # NCHW -> NHWC
    for p in units:
        x = shuffle_unit(x, p)
    return jnp.transpose(x, (0, 3, 1, 2))                          # back to NCHW


# ------------------------------- parameter init -----------------------------------

def _fold_bn(key, c):
    k1, k2, k3, k4 = jax.random.split(key, 4)
    gamma = 1.0 + 0.1 * jax.random.normal(k1, (c,), jnp.float32)
    beta = 0.1 * jax.random.normal(k2, (c,), jnp.float32)
    mean = 0.1 * jax.random.normal(k3, (c,), jnp.float32)
    var = 1.0 + 0.1 * jax.random.uniform(k4, (c,), jnp.float32)
    s = gamma / jnp.sqrt(var + 1e-5)
    return s, beta - mean * s


def _pack_grouped_pointwise(w, groups, in_c, out_c):
    """PyTorch grouped 1x1 conv weight (out_c, in_c//groups) -> dense block-diagonal
    (in_c, out_c) matrix so the whole grouped conv is ONE lane-dense matmul."""
    cig, cog = in_c // groups, out_c // groups
    wp = jnp.zeros((in_c, out_c), jnp.float32)
    for g in range(groups):
        wp = wp.at[g * cig:(g + 1) * cig, g * cog:(g + 1) * cog].set(
            w[g * cog:(g + 1) * cog, :].T)
    return wp


def init_shuffle_unit(key, in_c, out_c, stride, stage, groups):
    """Random inference-mode ShuffleUnit params, pre-folded for the Pallas kernels."""
    mid = out_c // 4
    use_cat = (stride != 1) or (in_c != out_c)
    exp_out = out_c - in_c if use_cat else out_c
    b_groups = 1 if stage == 2 else groups   # spec: stage-2 bottleneck is ungrouped
    k = list(jax.random.split(key, 11))

    # bottleneck: grouped 1x1 conv (+bias) + BN  (ReLU applied in-kernel)
    wb = 0.1 * jax.random.normal(k[0], (mid, in_c // b_groups), jnp.float32)
    bb = 0.05 * jax.random.normal(k[1], (mid,), jnp.float32)
    s1, t1 = _fold_bn(k[2], mid)
    w_b = _pack_grouped_pointwise(wb, b_groups, in_c, mid)
    s_b, t_b = s1, t1 + bb * s1

    # depthwise 3x3 conv (+bias) + BN(inner) + BN(outer), folded
    wd = 0.1 * jax.random.normal(k[3], (mid, 1, 3, 3), jnp.float32)
    bd = 0.05 * jax.random.normal(k[4], (mid,), jnp.float32)
    ds1, dt1 = _fold_bn(k[5], mid)
    ds2, dt2 = _fold_bn(k[6], mid)
    dw_s = ds1 * ds2
    dw_t = dt1 * ds2 + dt2 + bd * dw_s
    dw_w9 = jnp.transpose(wd[:, 0], (1, 2, 0)).reshape(9, 1, 1, mid)

    # expand: grouped 1x1 conv (+bias) + BN(inner) + BN(outer), folded
    we = 0.1 * jax.random.normal(k[7], (exp_out, mid // groups), jnp.float32)
    be = 0.05 * jax.random.normal(k[8], (exp_out,), jnp.float32)
    es1, et1 = _fold_bn(k[9], exp_out)
    es2, et2 = _fold_bn(k[10], exp_out)
    w_e = _pack_grouped_pointwise(we, groups, mid, exp_out)
    s_e = es1 * es2
    t_e = et1 * es2 + et2 + be * s_e

    # Fold ChannelShuffle(groups) into the depthwise params and the expand weight's
    # input-channel rows:  shuffled[j] = x[perm[j]]  =>  gather all by inv_perm.
    idx = jnp.arange(mid)
    perm = (idx % groups) * (mid // groups) + idx // groups
    inv_perm = jnp.argsort(perm)
    dw_w9 = dw_w9[:, :, :, inv_perm]
    dw_s, dw_t = dw_s[inv_perm], dw_t[inv_perm]
    w_e = w_e[inv_perm, :]

    return dict(stride=stride, cat=use_cat,
                w_b=w_b, s_b=s_b, t_b=t_b,
                dw_w9=dw_w9, dw_s=dw_s, dw_t=dw_t,
                w_e=w_e, s_e=s_e, t_e=t_e,
                # shortcut avg-pool: unit taps, 1/9 folded into the affine scale
                pool_w9=jnp.ones((9, 1, 1, in_c), jnp.float32),
                pool_s=jnp.full((in_c,), 1.0 / 9.0, jnp.float32),
                pool_t=jnp.zeros((in_c,), jnp.float32))


# ------------------------------------- main ----------------------------------------

if __name__ == "__main__":
    key = jax.random.PRNGKey(0)
    kx, k1, k2 = jax.random.split(key, 3)
    x = jax.random.normal(kx, (2, 24, 16, 16), jnp.float32)        # NCHW input
    units = [
        # downsampling ShuffleUnit (stage-2 entry): avg-pool shortcut + channel cat
        init_shuffle_unit(k1, in_c=24, out_c=240, stride=2, stage=2, groups=3),
        # regular ShuffleUnit: identity shortcut + fused add + ReLU
        init_shuffle_unit(k2, in_c=240, out_c=240, stride=1, stage=3, groups=3),
    ]
    fwd = jax.jit(lambda inp: shuffle_units_forward(inp, units))
    out = jax.block_until_ready(fwd(x))
    assert out.shape == (2, 240, 8, 8), out.shape
    assert bool(jnp.all(jnp.isfinite(out)))
    print("KERNEL_OK")
</pallas_src>

<mosaic_0001>
module attributes {stable_mosaic.version = 11 : i64} {
  func.func @_matmul_bn_kernel(%arg0: i32, %arg1: i32, %arg2: memref<256x24xf32, #tpu.memory_space<vmem>>, %arg3: memref<24x128xf32, #tpu.memory_space<vmem>>, %arg4: memref<1x128xf32, #tpu.memory_space<vmem>>, %arg5: memref<1x128xf32, #tpu.memory_space<vmem>>, %arg6: memref<256x128xf32, #tpu.memory_space<vmem>>) attributes {dimension_semantics = [#tpu.dimension_semantics<parallel>, #tpu.dimension_semantics<parallel>], iteration_bounds = array<i64: 2, 1>, scalar_prefetch = 0 : i64, scratch_operands = 0 : i64, tpu.core_type = #tpu.core_type<tc>, window_params = [{transform_indices = @transform_0, window_bounds = array<i64: 256, 24>}, {transform_indices = @transform_1, window_bounds = array<i64: 24, 128>}, {transform_indices = @transform_2, window_bounds = array<i64: 1, 128>}, {transform_indices = @transform_3, window_bounds = array<i64: 1, 128>}, {transform_indices = @transform_4, window_bounds = array<i64: 256, 128>}]} {
    %c0 = arith.constant 0 : index
    %c0_0 = arith.constant 0 : index
    %0 = vector.load %arg2[%c0, %c0_0] : memref<256x24xf32, #tpu.memory_space<vmem>>, vector<256x24xf32>
    %c0_1 = arith.constant 0 : index
    %c0_2 = arith.constant 0 : index
    %1 = vector.load %arg3[%c0_1, %c0_2] : memref<24x128xf32, #tpu.memory_space<vmem>>, vector<24x128xf32>
    %cst = arith.constant dense<0.000000e+00> : vector<256x128xf32>
    %2 = tpu.matmul %0, %1, %cst {dimension_numbers = #tpu.dot_dimension_numbers<[1], [0], [0], [1], [0, 0, 1, 1], [], []>} : vector<256x24xf32>, vector<24x128xf32>, vector<256x128xf32> -> vector<256x128xf32>
    %c0_3 = arith.constant 0 : index
    %c0_4 = arith.constant 0 : index
    %3 = vector.load %arg4[%c0_3, %c0_4] : memref<1x128xf32, #tpu.memory_space<vmem>>, vector<1x128xf32>
    %4 = vector.broadcast %3 : vector<1x128xf32> to vector<256x128xf32>
    %5 = arith.mulf %2, %4 : vector<256x128xf32>
    %c0_5 = arith.constant 0 : index
    %c0_6 = arith.constant 0 : index
    %6 = vector.load %arg5[%c0_5, %c0_6] : memref<1x128xf32, #tpu.memory_space<vmem>>, vector<1x128xf32>
    %7 = vector.broadcast %6 : vector<1x128xf32> to vector<256x128xf32>
    %8 = arith.addf %5, %7 : vector<256x128xf32>
    %cst_7 = arith.constant 0.000000e+00 : f32
    %9 = vector.broadcast %cst_7 : f32 to vector<256x128xf32>
    %10 = arith.maximumf %8, %9 : vector<256x128xf32>
    %c0_8 = arith.constant 0 : index
    %c0_9 = arith.constant 0 : index
    %11 = vector.load %arg6[%c0_8, %c0_9] : memref<256x128xf32, #tpu.memory_space<vmem>>, vector<256x128xf32>
    tpu.vector_store %arg6[%c0_8, %c0_9], %10 {strides = array<i32>} : memref<256x128xf32, #tpu.memory_space<vmem>>, vector<256x128xf32>,
    return
  }
  func.func @transform_0(%arg0: i32, %arg1: i32) -> (i32, i32) {
    %c0_i32 = arith.constant 0 : i32
    %c0_i32_0 = arith.constant 0 : i32
    return %arg0, %c0_i32 : i32, i32
  }
  func.func @transform_1(%arg0: i32, %arg1: i32) -> (i32, i32) {
    %c0_i32 = arith.constant 0 : i32
    %c0_i32_0 = arith.constant 0 : i32
    return %c0_i32, %arg1 : i32, i32
  }
  func.func @transform_2(%arg0: i32, %arg1: i32) -> (i32, i32) {
    %c0_i32 = arith.constant 0 : i32
    %c0_i32_0 = arith.constant 0 : i32
    return %c0_i32, %arg1 : i32, i32
  }
  func.func @transform_3(%arg0: i32, %arg1: i32) -> (i32, i32) {
    %c0_i32 = arith.constant 0 : i32
    %c0_i32_0 = arith.constant 0 : i32
    return %c0_i32, %arg1 : i32, i32
  }
  func.func @transform_4(%arg0: i32, %arg1: i32) -> (i32, i32) {
    %c0_i32 = arith.constant 0 : i32
    return %arg0, %arg1 : i32, i32
  }
}

module attributes {stable_mosaic.version = 11 : i64} {
  func.func @_dw3x3_kernel(%arg0: i32, %arg1: memref<1x9x9x24xf32, #tpu.memory_space<vmem>>, %arg2: memref<1x9x9x24xf32, #tpu.memory_space<vmem>>, %arg3: memref<1x9x9x24xf32, #tpu.memory_space<vmem>>, %arg4: memref<1x9x9x24xf32, #tpu.memory_space<vmem>>, %arg5: memref<9x1x1x24xf32, #tpu.memory_space<vmem>>, %arg6: memref<1x1x1x24xf32, #tpu.memory_space<vmem>>, %arg7: memref<1x1x1x24xf32, #tpu.memory_space<vmem>>, %arg8: memref<1x8x8x24xf32, #tpu.memory_space<vmem>>) attributes {dimension_semantics = [#tpu.dimension_semantics<parallel>], iteration_bounds = array<i64: 2>, scalar_prefetch = 0 : i64, scratch_operands = 0 : i64, tpu.core_type = #tpu.core_type<tc>, window_params = [{transform_indices = @transform_0, window_bounds = array<i64: 1, 9, 9, 24>}, {transform_indices = @transform_1, window_bounds = array<i64: 1, 9, 9, 24>}, {transform_indices = @transform_2, window_bounds = array<i64: 1, 9, 9, 24>}, {transform_indices = @transform_3, window_bounds = array<i64: 1, 9, 9, 24>}, {pipeline_mode = #tpu.pipeline_mode<synchronous>, transform_indices = @transform_4, window_bounds = array<i64: 9, 1, 1, 24>}, {pipeline_mode = #tpu.pipeline_mode<synchronous>, transform_indices = @transform_5, window_bounds = array<i64: 1, 1, 1, 24>}, {pipeline_mode = #tpu.pipeline_mode<synchronous>, transform_indices = @transform_6, window_bounds = array<i64: 1, 1, 1, 24>}, {transform_indices = @transform_7, window_bounds = array<i64: 1, 8, 8, 24>}]} {
    %cst = arith.constant 0.000000e+00 : f32
    %0 = vector.broadcast %cst : f32 to vector<1x8x8x24xf32>
    %c0 = arith.constant 0 : index
    %c0_0 = arith.constant 0 : index
    %c0_1 = arith.constant 0 : index
    %c0_2 = arith.constant 0 : index
    %1 = vector.load %arg1[%c0, %c0_0, %c0_1, %c0_2] : memref<1x9x9x24xf32, #tpu.memory_space<vmem>>, vector<1x8x8x24xf32>
    %2 = arith.addf %0, %1 : vector<1x8x8x24xf32>
    %c0_3 = arith.constant 0 : index
    %c0_4 = arith.constant 0 : index
    %c0_5 = arith.constant 0 : index
    %c0_6 = arith.constant 0 : index
    %3 = vector.load %arg2[%c0_3, %c0_4, %c0_5, %c0_6] : memref<1x9x9x24xf32, #tpu.memory_space<vmem>>, vector<1x8x8x24xf32>
    %4 = arith.addf %2, %3 : vector<1x8x8x24xf32>
    %c0_7 = arith.constant 0 : index
    %c0_8 = arith.constant 0 : index
    %c1 = arith.constant 1 : index
    %c0_9 = arith.constant 0 : index
    %5 = vector.load %arg1[%c0_7, %c0_8, %c1, %c0_9] : memref<1x9x9x24xf32, #tpu.memory_space<vmem>>, vector<1x8x8x24xf32>
    %6 = arith.addf %4, %5 : vector<1x8x8x24xf32>
    %c0_10 = arith.constant 0 : index
    %c0_11 = arith.constant 0 : index
    %c0_12 = arith.constant 0 : index
    %c0_13 = arith.constant 0 : index
    %7 = vector.load %arg3[%c0_10, %c0_11, %c0_12, %c0_13] : memref<1x9x9x24xf32, #tpu.memory_space<vmem>>, vector<1x8x8x24xf32>
    %8 = arith.addf %6, %7 : vector<1x8x8x24xf32>
    %c0_14 = arith.constant 0 : index
    %c0_15 = arith.constant 0 : index
    %c0_16 = arith.constant 0 : index
    %c0_17 = arith.constant 0 : index
    %9 = vector.load %arg4[%c0_14, %c0_15, %c0_16, %c0_17] : memref<1x9x9x24xf32, #tpu.memory_space<vmem>>, vector<1x8x8x24xf32>
    %10 = arith.addf %8, %9 : vector<1x8x8x24xf32>
    %c0_18 = arith.constant 0 : index
    %c0_19 = arith.constant 0 : index
    %c1_20 = arith.constant 1 : index
    %c0_21 = arith.constant 0 : index
    %11 = vector.load %arg3[%c0_18, %c0_19, %c1_20, %c0_21] : memref<1x9x9x24xf32, #tpu.memory_space<vmem>>, vector<1x8x8x24xf32>
    %12 = arith.addf %10, %11 : vector<1x8x8x24xf32>
    %c0_22 = arith.constant 0 : index
    %c1_23 = arith.constant 1 : index
    %c0_24 = arith.constant 0 : index
    %c0_25 = arith.constant 0 : index
    %13 = vector.load %arg1[%c0_22, %c1_23, %c0_24, %c0_25] : memref<1x9x9x24xf32, #tpu.memory_space<vmem>>, vector<1x8x8x24xf32>
    %14 = arith.addf %12, %13 : vector<1x8x8x24xf32>
    %c0_26 = arith.constant 0 : index
    %c1_27 = arith.constant 1 : index
    %c0_28 = arith.constant 0 : index
    %c0_29 = arith.constant 0 : index
    %15 = vector.load %arg2[%c0_26, %c1_27, %c0_28, %c0_29] : memref<1x9x9x24xf32, #tpu.memory_space<vmem>>, vector<1x8x8x24xf32>
    %16 = arith.addf %14, %15 : vector<1x8x8x24xf32>
    %c0_30 = arith.constant 0 : index
    %c1_31 = arith.constant 1 : index
    %c1_32 = arith.constant 1 : index
    %c0_33 = arith.constant 0 : index
    %17 = vector.load %arg1[%c0_30, %c1_31, %c1_32, %c0_33] : memref<1x9x9x24xf32, #tpu.memory_space<vmem>>, vector<1x8x8x24xf32>
    %18 = arith.addf %16, %17 : vector<1x8x8x24xf32>
    %c0_34 = arith.constant 0 : index
    %c0_35 = arith.constant 0 : index
    %c0_36 = arith.constant 0 : index
    %c0_37 = arith.constant 0 : index
    %19 = vector.load %arg6[%c0_34, %c0_35, %c0_36, %c0_37] : memref<1x1x1x24xf32, #tpu.memory_space<vmem>>, vector<1x1x1x24xf32>
    %20 = vector.broadcast %19 : vector<1x1x1x24xf32> to vector<1x8x8x24xf32>
    %21 = arith.mulf %18, %20 : vector<1x8x8x24xf32>
    %c0_38 = arith.constant 0 : index
    %c0_39 = arith.constant 0 : index
    %c0_40 = arith.constant 0 : index
    %c0_41 = arith.constant 0 : index
    %22 = vector.load %arg7[%c0_38, %c0_39, %c0_40, %c0_41] : memref<1x1x1x24xf32, #tpu.memory_space<vmem>>, vector<1x1x1x24xf32>
    %23 = vector.broadcast %22 : vector<1x1x1x24xf32> to vector<1x8x8x24xf32>
    %24 = arith.addf %21, %23 : vector<1x8x8x24xf32>
    %cst_42 = arith.constant 0.000000e+00 : f32
    %25 = vector.broadcast %cst_42 : f32 to vector<1x8x8x24xf32>
    %26 = arith.maximumf %24, %25 : vector<1x8x8x24xf32>
    %c0_43 = arith.constant 0 : index
    %c0_44 = arith.constant 0 : index
    %c0_45 = arith.constant 0 : index
    %c0_46 = arith.constant 0 : index
    %27 = vector.load %arg8[%c0_43, %c0_44, %c0_45, %c0_46] : memref<1x8x8x24xf32, #tpu.memory_space<vmem>>, vector<1x8x8x24xf32>
    tpu.vector_store %arg8[%c0_43, %c0_44, %c0_45, %c0_46], %26 {strides = array<i32>} : memref<1x8x8x24xf32, #tpu.memory_space<vmem>>, vector<1x8x8x24xf32>,
    return
  }
  func.func @transform_0(%arg0: i32) -> (i32, i32, i32, i32) {
    %c0_i32 = arith.constant 0 : i32
    %c0_i32_0 = arith.constant 0 : i32
    %c0_i32_1 = arith.constant 0 : i32
    %c0_i32_2 = arith.constant 0 : i32
    return %arg0, %c0_i32, %c0_i32_0, %c0_i32_1 : i32, i32, i32, i32
  }
  func.func @transform_1(%arg0: i32) -> (i32, i32, i32, i32) {
    %c0_i32 = arith.constant 0 : i32
    %c0_i32_0 = arith.constant 0 : i32
    %c0_i32_1 = arith.constant 0 : i32
    %c0_i32_2 = arith.constant 0 : i32
    return %arg0, %c0_i32, %c0_i32_0, %c0_i32_1 : i32, i32, i32, i32
  }
  func.func @transform_2(%arg0: i32) -> (i32, i32, i32, i32) {
    %c0_i32 = arith.constant 0 : i32
    %c0_i32_0 = arith.constant 0 : i32
    %c0_i32_1 = arith.constant 0 : i32
    %c0_i32_2 = arith.constant 0 : i32
    return %arg0, %c0_i32, %c0_i32_0, %c0_i32_1 : i32, i32, i32, i32
  }
  func.func @transform_3(%arg0: i32) -> (i32, i32, i32, i32) {
    %c0_i32 = arith.constant 0 : i32
    %c0_i32_0 = arith.constant 0 : i32
    %c0_i32_1 = arith.constant 0 : i32
    %c0_i32_2 = arith.constant 0 : i32
    return %arg0, %c0_i32, %c0_i32_0, %c0_i32_1 : i32, i32, i32, i32
  }
  func.func @transform_4(%arg0: i32) -> (i32, i32, i32, i32) {
    %c0_i32 = arith.constant 0 : i32
    %c0_i32_0 = arith.constant 0 : i32
    %c0_i32_1 = arith.constant 0 : i32
    %c0_i32_2 = arith.constant 0 : i32
    %c0_i32_3 = arith.constant 0 : i32
    return %c0_i32, %c0_i32_0, %c0_i32_1, %c0_i32_2 : i32, i32, i32, i32
  }
  func.func @transform_5(%arg0: i32) -> (i32, i32, i32, i32) {
    %c0_i32 = arith.constant 0 : i32
    %c0_i32_0 = arith.constant 0 : i32
    %c0_i32_1 = arith.constant 0 : i32
    %c0_i32_2 = arith.constant 0 : i32
    %c0_i32_3 = arith.constant 0 : i32
    return %c0_i32, %c0_i32_0, %c0_i32_1, %c0_i32_2 : i32, i32, i32, i32
  }
  func.func @transform_6(%arg0: i32) -> (i32, i32, i32, i32) {
    %c0_i32 = arith.constant 0 : i32
    %c0_i32_0 = arith.constant 0 : i32
    %c0_i32_1 = arith.constant 0 : i32
    %c0_i32_2 = arith.constant 0 : i32
    %c0_i32_3 = arith.constant 0 : i32
    return %c0_i32, %c0_i32_0, %c0_i32_1, %c0_i32_2 : i32, i32, i32, i32
  }
  func.func @transform_7(%arg0: i32) -> (i32, i32, i32, i32) {
    %c0_i32 = arith.constant 0 : i32
    %c0_i32_0 = arith.constant 0 : i32
    %c0_i32_1 = arith.constant 0 : i32
    %c0_i32_2 = arith.constant 0 : i32
    return %arg0, %c0_i32, %c0_i32_0, %c0_i32_1 : i32, i32, i32, i32
  }
}

module attributes {stable_mosaic.version = 11 : i64} {
  func.func @_dw3x3_kernel(%arg0: i32, %arg1: memref<1x9x9x60xf32, #tpu.memory_space<vmem>>, %arg2: memref<1x9x9x60xf32, #tpu.memory_space<vmem>>, %arg3: memref<1x9x9x60xf32, #tpu.memory_space<vmem>>, %arg4: memref<1x9x9x60xf32, #tpu.memory_space<vmem>>, %arg5: memref<9x1x1x60xf32, #tpu.memory_space<vmem>>, %arg6: memref<1x1x1x60xf32, #tpu.memory_space<vmem>>, %arg7: memref<1x1x1x60xf32, #tpu.memory_space<vmem>>, %arg8: memref<1x8x8x60xf32, #tpu.memory_space<vmem>>) attributes {dimension_semantics = [#tpu.dimension_semantics<parallel>], iteration_bounds = array<i64: 2>, scalar_prefetch = 0 : i64, scratch_operands = 0 : i64, tpu.core_type = #tpu.core_type<tc>, window_params = [{transform_indices = @transform_0, window_bounds = array<i64: 1, 9, 9, 60>}, {transform_indices = @transform_1, window_bounds = array<i64: 1, 9, 9, 60>}, {transform_indices = @transform_2, window_bounds = array<i64: 1, 9, 9, 60>}, {transform_indices = @transform_3, window_bounds = array<i64: 1, 9, 9, 60>}, {pipeline_mode = #tpu.pipeline_mode<synchronous>, transform_indices = @transform_4, window_bounds = array<i64: 9, 1, 1, 60>}, {pipeline_mode = #tpu.pipeline_mode<synchronous>, transform_indices = @transform_5, window_bounds = array<i64: 1, 1, 1, 60>}, {pipeline_mode = #tpu.pipeline_mode<synchronous>, transform_indices = @transform_6, window_bounds = array<i64: 1, 1, 1, 60>}, {transform_indices = @transform_7, window_bounds = array<i64: 1, 8, 8, 60>}]} {
    %cst = arith.constant 0.000000e+00 : f32
    %0 = vector.broadcast %cst : f32 to vector<1x8x8x60xf32>
    %c0 = arith.constant 0 : index
    %c0_0 = arith.constant 0 : index
    %c0_1 = arith.constant 0 : index
    %c0_2 = arith.constant 0 : index
    %1 = vector.load %arg1[%c0, %c0_0, %c0_1, %c0_2] : memref<1x9x9x60xf32, #tpu.memory_space<vmem>>, vector<1x8x8x60xf32>
    %c0_3 = arith.constant 0 : index
    %c0_4 = arith.constant 0 : index
    %c0_5 = arith.constant 0 : index
    %c0_6 = arith.constant 0 : index
    %2 = vector.load %arg5[%c0_3, %c0_4, %c0_5, %c0_6] : memref<9x1x1x60xf32, #tpu.memory_space<vmem>>, vector<1x1x1x60xf32>
    %3 = vector.shape_cast %2 : vector<1x1x1x60xf32> to vector<1x1x60xf32>
    %4 = vector.shape_cast %3 : vector<1x1x60xf32> to vector<1x1x1x60xf32>
    %5 = vector.broadcast %4 : vector<1x1x1x60xf32> to vector<1x8x8x60xf32>
    %6 = arith.mulf %1, %5 : vector<1x8x8x60xf32>
    %7 = arith.addf %0, %6 : vector<1x8x8x60xf32>
    %c0_7 = arith.constant 0 : index
    %c0_8 = arith.constant 0 : index
    %c0_9 = arith.constant 0 : index
    %c0_10 = arith.constant 0 : index
    %8 = vector.load %arg2[%c0_7, %c0_8, %c0_9, %c0_10] : memref<1x9x9x60xf32, #tpu.memory_space<vmem>>, vector<1x8x8x60xf32>
    %c1 = arith.constant 1 : index
    %c0_11 = arith.constant 0 : index
    %c0_12 = arith.constant 0 : index
    %c0_13 = arith.constant 0 : index
    %9 = vector.load %arg5[%c1, %c0_11, %c0_12, %c0_13] : memref<9x1x1x60xf32, #tpu.memory_space<vmem>>, vector<1x1x1x60xf32>
    %10 = vector.shape_cast %9 : vector<1x1x1x60xf32> to vector<1x1x60xf32>
    %11 = vector.shape_cast %10 : vector<1x1x60xf32> to vector<1x1x1x60xf32>
    %12 = vector.broadcast %11 : vector<1x1x1x60xf32> to vector<1x8x8x60xf32>
    %13 = arith.mulf %8, %12 : vector<1x8x8x60xf32>
    %14 = arith.addf %7, %13 : vector<1x8x8x60xf32>
    %c0_14 = arith.constant 0 : index
    %c0_15 = arith.constant 0 : index
    %c1_16 = arith.constant 1 : index
    %c0_17 = arith.constant 0 : index
    %15 = vector.load %arg1[%c0_14, %c0_15, %c1_16, %c0_17] : memref<1x9x9x60xf32, #tpu.memory_space<vmem>>, vector<1x8x8x60xf32>
    %c2 = arith.constant 2 : index
    %c0_18 = arith.constant 0 : index
    %c0_19 = arith.constant 0 : index
    %c0_20 = arith.constant 0 : index
    %16 = vector.load %arg5[%c2, %c0_18, %c0_19, %c0_20] : memref<9x1x1x60xf32, #tpu.memory_space<vmem>>, vector<1x1x1x60xf32>
    %17 = vector.shape_cast %16 : vector<1x1x1x60xf32> to vector<1x1x60xf32>
    %18 = vector.shape_cast %17 : vector<1x1x60xf32> to vector<1x1x1x60xf32>
    %19 = vector.broadcast %18 : vector<1x1x1x60xf32> to vector<1x8x8x60xf32>
    %20 = arith.mulf %15, %19 : vector<1x8x8x60xf32>
    %21 = arith.addf %14, %20 : vector<1x8x8x60xf32>
    %c0_21 = arith.constant 0 : index
    %c0_22 = arith.constant 0 : index
    %c0_23 = arith.constant 0 : index
    %c0_24 = arith.constant 0 : index
    %22 = vector.load %arg3[%c0_21, %c0_22, %c0_23, %c0_24] : memref<1x9x9x60xf32, #tpu.memory_space<vmem>>, vector<1x8x8x60xf32>
    %c3 = arith.constant 3 : index
    %c0_25 = arith.constant 0 : index
    %c0_26 = arith.constant 0 : index
    %c0_27 = arith.constant 0 : index
    %23 = vector.load %arg5[%c3, %c0_25, %c0_26, %c0_27] : memref<9x1x1x60xf32, #tpu.memory_space<vmem>>, vector<1x1x1x60xf32>
    %24 = vector.shape_cast %23 : vector<1x1x1x60xf32> to vector<1x1x60xf32>
    %25 = vector.shape_cast %24 : vector<1x1x60xf32> to vector<1x1x1x60xf32>
    %26 = vector.broadcast %25 : vector<1x1x1x60xf32> to vector<1x8x8x60xf32>
    %27 = arith.mulf %22, %26 : vector<1x8x8x60xf32>
    %28 = arith.addf %21, %27 : vector<1x8x8x60xf32>
    %c0_28 = arith.constant 0 : index
    %c0_29 = arith.constant 0 : index
    %c0_30 = arith.constant 0 : index
    %c0_31 = arith.constant 0 : index
    %29 = vector.load %arg4[%c0_28, %c0_29, %c0_30, %c0_31] : memref<1x9x9x60xf32, #tpu.memory_space<vmem>>, vector<1x8x8x60xf32>
    %c4 = arith.constant 4 : index
    %c0_32 = arith.constant 0 : index
    %c0_33 = arith.constant 0 : index
    %c0_34 = arith.constant 0 : index
    %30 = vector.load %arg5[%c4, %c0_32, %c0_33, %c0_34] : memref<9x1x1x60xf32, #tpu.memory_space<vmem>>, vector<1x1x1x60xf32>
    %31 = vector.shape_cast %30 : vector<1x1x1x60xf32> to vector<1x1x60xf32>
    %32 = vector.shape_cast %31 : vector<1x1x60xf32> to vector<1x1x1x60xf32>
    %33 = vector.broadcast %32 : vector<1x1x1x60xf32> to vector<1x8x8x60xf32>
    %34 = arith.mulf %29, %33 : vector<1x8x8x60xf32>
    %35 = arith.addf %28, %34 : vector<1x8x8x60xf32>
    %c0_35 = arith.constant 0 : index
    %c0_36 = arith.constant 0 : index
    %c1_37 = arith.constant 1 : index
    %c0_38 = arith.constant 0 : index
    %36 = vector.load %arg3[%c0_35, %c0_36, %c1_37, %c0_38] : memref<1x9x9x60xf32, #tpu.memory_space<vmem>>, vector<1x8x8x60xf32>
    %c5 = arith.constant 5 : index
    %c0_39 = arith.constant 0 : index
    %c0_40 = arith.constant 0 : index
    %c0_41 = arith.constant 0 : index
    %37 = vector.load %arg5[%c5, %c0_39, %c0_40, %c0_41] : memref<9x1x1x60xf32, #tpu.memory_space<vmem>>, vector<1x1x1x60xf32>
    %38 = vector.shape_cast %37 : vector<1x1x1x60xf32> to vector<1x1x60xf32>
    %39 = vector.shape_cast %38 : vector<1x1x60xf32> to vector<1x1x1x60xf32>
    %40 = vector.broadcast %39 : vector<1x1x1x60xf32> to vector<1x8x8x60xf32>
    %41 = arith.mulf %36, %40 : vector<1x8x8x60xf32>
    %42 = arith.addf %35, %41 : vector<1x8x8x60xf32>
    %c0_42 = arith.constant 0 : index
    %c1_43 = arith.constant 1 : index
    %c0_44 = arith.constant 0 : index
    %c0_45 = arith.constant 0 : index
    %43 = vector.load %arg1[%c0_42, %c1_43, %c0_44, %c0_45] : memref<1x9x9x60xf32, #tpu.memory_space<vmem>>, vector<1x8x8x60xf32>
    %c6 = arith.constant 6 : index
    %c0_46 = arith.constant 0 : index
    %c0_47 = arith.constant 0 : index
    %c0_48 = arith.constant 0 : index
    %44 = vector.load %arg5[%c6, %c0_46, %c0_47, %c0_48] : memref<9x1x1x60xf32, #tpu.memory_space<vmem>>, vector<1x1x1x60xf32>
    %45 = vector.shape_cast %44 : vector<1x1x1x60xf32> to vector<1x1x60xf32>
    %46 = vector.shape_cast %45 : vector<1x1x60xf32> to vector<1x1x1x60xf32>
    %47 = vector.broadcast %46 : vector<1x1x1x60xf32> to vector<1x8x8x60xf32>
    %48 = arith.mulf %43, %47 : vector<1x8x8x60xf32>
    %49 = arith.addf %42, %48 : vector<1x8x8x60xf32>
    %c0_49 = arith.constant 0 : index
    %c1_50 = arith.constant 1 : index
    %c0_51 = arith.constant 0 : index
    %c0_52 = arith.constant 0 : index
    %50 = vector.load %arg2[%c0_49, %c1_50, %c0_51, %c0_52] : memref<1x9x9x60xf32, #tpu.memory_space<vmem>>, vector<1x8x8x60xf32>
    %c7 = arith.constant 7 : index
    %c0_53 = arith.constant 0 : index
    %c0_54 = arith.constant 0 : index
    %c0_55 = arith.constant 0 : index
    %51 = vector.load %arg5[%c7, %c0_53, %c0_54, %c0_55] : memref<9x1x1x60xf32, #tpu.memory_space<vmem>>, vector<1x1x1x60xf32>
    %52 = vector.shape_cast %51 : vector<1x1x1x60xf32> to vector<1x1x60xf32>
    %53 = vector.shape_cast %52 : vector<1x1x60xf32> to vector<1x1x1x60xf32>
    %54 = vector.broadcast %53 : vector<1x1x1x60xf32> to vector<1x8x8x60xf32>
    %55 = arith.mulf %50, %54 : vector<1x8x8x60xf32>
    %56 = arith.addf %49, %55 : vector<1x8x8x60xf32>
    %c0_56 = arith.constant 0 : index
    %c1_57 = arith.constant 1 : index
    %c1_58 = arith.constant 1 : index
    %c0_59 = arith.constant 0 : index
    %57 = vector.load %arg1[%c0_56, %c1_57, %c1_58, %c0_59] : memref<1x9x9x60xf32, #tpu.memory_space<vmem>>, vector<1x8x8x60xf32>
    %c8 = arith.constant 8 : index
    %c0_60 = arith.constant 0 : index
    %c0_61 = arith.constant 0 : index
    %c0_62 = arith.constant 0 : index
    %58 = vector.load %arg5[%c8, %c0_60, %c0_61, %c0_62] : memref<9x1x1x60xf32, #tpu.memory_space<vmem>>, vector<1x1x1x60xf32>
    %59 = vector.shape_cast %58 : vector<1x1x1x60xf32> to vector<1x1x60xf32>
    %60 = vector.shape_cast %59 : vector<1x1x60xf32> to vector<1x1x1x60xf32>
    %61 = vector.broadcast %60 : vector<1x1x1x60xf32> to vector<1x8x8x60xf32>
    %62 = arith.mulf %57, %61 : vector<1x8x8x60xf32>
    %63 = arith.addf %56, %62 : vector<1x8x8x60xf32>
    %c0_63 = arith.constant 0 : index
    %c0_64 = arith.constant 0 : index
    %c0_65 = arith.constant 0 : index
    %c0_66 = arith.constant 0 : index
    %64 = vector.load %arg6[%c0_63, %c0_64, %c0_65, %c0_66] : memref<1x1x1x60xf32, #tpu.memory_space<vmem>>, vector<1x1x1x60xf32>
    %65 = vector.broadcast %64 : vector<1x1x1x60xf32> to vector<1x8x8x60xf32>
    %66 = arith.mulf %63, %65 : vector<1x8x8x60xf32>
    %c0_67 = arith.constant 0 : index
    %c0_68 = arith.constant 0 : index
    %c0_69 = arith.constant 0 : index
    %c0_70 = arith.constant 0 : index
    %67 = vector.load %arg7[%c0_67, %c0_68, %c0_69, %c0_70] : memref<1x1x1x60xf32, #tpu.memory_space<vmem>>, vector<1x1x1x60xf32>
    %68 = vector.broadcast %67 : vector<1x1x1x60xf32> to vector<1x8x8x60xf32>
    %69 = arith.addf %66, %68 : vector<1x8x8x60xf32>
    %c0_71 = arith.constant 0 : index
    %c0_72 = arith.constant 0 : index
    %c0_73 = arith.constant 0 : index
    %c0_74 = arith.constant 0 : index
    %70 = vector.load %arg8[%c0_71, %c0_72, %c0_73, %c0_74] : memref<1x8x8x60xf32, #tpu.memory_space<vmem>>, vector<1x8x8x60xf32>
    tpu.vector_store %arg8[%c0_71, %c0_72, %c0_73, %c0_74], %69 {strides = array<i32>} : memref<1x8x8x60xf32, #tpu.memory_space<vmem>>, vector<1x8x8x60xf32>,
    return
  }
  func.func @transform_0(%arg0: i32) -> (i32, i32, i32, i32) {
    %c0_i32 = arith.constant 0 : i32
    %c0_i32_0 = arith.constant 0 : i32
    %c0_i32_1 = arith.constant 0 : i32
    %c0_i32_2 = arith.constant 0 : i32
    return %arg0, %c0_i32, %c0_i32_0, %c0_i32_1 : i32, i32, i32, i32
  }
  func.func @transform_1(%arg0: i32) -> (i32, i32, i32, i32) {
    %c0_i32 = arith.constant 0 : i32
    %c0_i32_0 = arith.constant 0 : i32
    %c0_i32_1 = arith.constant 0 : i32
    %c0_i32_2 = arith.constant 0 : i32
    return %arg0, %c0_i32, %c0_i32_0, %c0_i32_1 : i32, i32, i32, i32
  }
  func.func @transform_2(%arg0: i32) -> (i32, i32, i32, i32) {
    %c0_i32 = arith.constant 0 : i32
    %c0_i32_0 = arith.constant 0 : i32
    %c0_i32_1 = arith.constant 0 : i32
    %c0_i32_2 = arith.constant 0 : i32
    return %arg0, %c0_i32, %c0_i32_0, %c0_i32_1 : i32, i32, i32, i32
  }
  func.func @transform_3(%arg0: i32) -> (i32, i32, i32, i32) {
    %c0_i32 = arith.constant 0 : i32
    %c0_i32_0 = arith.constant 0 : i32
    %c0_i32_1 = arith.constant 0 : i32
    %c0_i32_2 = arith.constant 0 : i32
    return %arg0, %c0_i32, %c0_i32_0, %c0_i32_1 : i32, i32, i32, i32
  }
  func.func @transform_4(%arg0: i32) -> (i32, i32, i32, i32) {
    %c0_i32 = arith.constant 0 : i32
    %c0_i32_0 = arith.constant 0 : i32
    %c0_i32_1 = arith.constant 0 : i32
    %c0_i32_2 = arith.constant 0 : i32
    %c0_i32_3 = arith.constant 0 : i32
    return %c0_i32, %c0_i32_0, %c0_i32_1, %c0_i32_2 : i32, i32, i32, i32
  }
  func.func @transform_5(%arg0: i32) -> (i32, i32, i32, i32) {
    %c0_i32 = arith.constant 0 : i32
    %c0_i32_0 = arith.constant 0 : i32
    %c0_i32_1 = arith.constant 0 : i32
    %c0_i32_2 = arith.constant 0 : i32
    %c0_i32_3 = arith.constant 0 : i32
    return %c0_i32, %c0_i32_0, %c0_i32_1, %c0_i32_2 : i32, i32, i32, i32
  }
  func.func @transform_6(%arg0: i32) -> (i32, i32, i32, i32) {
    %c0_i32 = arith.constant 0 : i32
    %c0_i32_0 = arith.constant 0 : i32
    %c0_i32_1 = arith.constant 0 : i32
    %c0_i32_2 = arith.constant 0 : i32
    %c0_i32_3 = arith.constant 0 : i32
    return %c0_i32, %c0_i32_0, %c0_i32_1, %c0_i32_2 : i32, i32, i32, i32
  }
  func.func @transform_7(%arg0: i32) -> (i32, i32, i32, i32) {
    %c0_i32 = arith.constant 0 : i32
    %c0_i32_0 = arith.constant 0 : i32
    %c0_i32_1 = arith.constant 0 : i32
    %c0_i32_2 = arith.constant 0 : i32
    return %arg0, %c0_i32, %c0_i32_0, %c0_i32_1 : i32, i32, i32, i32
  }
}

module attributes {stable_mosaic.version = 11 : i64} {
  func.func @_matmul_bn_kernel(%arg0: i32, %arg1: i32, %arg2: memref<128x60xf32, #tpu.memory_space<vmem>>, %arg3: memref<60x256xf32, #tpu.memory_space<vmem>>, %arg4: memref<1x256xf32, #tpu.memory_space<vmem>>, %arg5: memref<1x256xf32, #tpu.memory_space<vmem>>, %arg6: memref<128x256xf32, #tpu.memory_space<vmem>>) attributes {dimension_semantics = [#tpu.dimension_semantics<parallel>, #tpu.dimension_semantics<parallel>], iteration_bounds = array<i64: 1, 1>, scalar_prefetch = 0 : i64, scratch_operands = 0 : i64, tpu.core_type = #tpu.core_type<tc>, window_params = [{transform_indices = @transform_0, window_bounds = array<i64: 128, 60>}, {transform_indices = @transform_1, window_bounds = array<i64: 60, 256>}, {transform_indices = @transform_2, window_bounds = array<i64: 1, 256>}, {transform_indices = @transform_3, window_bounds = array<i64: 1, 256>}, {transform_indices = @transform_4, window_bounds = array<i64: 128, 256>}]} {
    %c0 = arith.constant 0 : index
    %c0_0 = arith.constant 0 : index
    %0 = vector.load %arg2[%c0, %c0_0] : memref<128x60xf32, #tpu.memory_space<vmem>>, vector<128x60xf32>
    %c0_1 = arith.constant 0 : index
    %c0_2 = arith.constant 0 : index
    %1 = vector.load %arg3[%c0_1, %c0_2] : memref<60x256xf32, #tpu.memory_space<vmem>>, vector<60x256xf32>
    %cst = arith.constant dense<0.000000e+00> : vector<128x256xf32>
    %2 = tpu.matmul %0, %1, %cst {dimension_numbers = #tpu.dot_dimension_numbers<[1], [0], [0], [1], [0, 0, 1, 1], [], []>} : vector<128x60xf32>, vector<60x256xf32>, vector<128x256xf32> -> vector<128x256xf32>
    %c0_3 = arith.constant 0 : index
    %c0_4 = arith.constant 0 : index
    %3 = vector.load %arg4[%c0_3, %c0_4] : memref<1x256xf32, #tpu.memory_space<vmem>>, vector<1x256xf32>
    %4 = vector.broadcast %3 : vector<1x256xf32> to vector<128x256xf32>
    %5 = arith.mulf %2, %4 : vector<128x256xf32>
    %c0_5 = arith.constant 0 : index
    %c0_6 = arith.constant 0 : index
    %6 = vector.load %arg5[%c0_5, %c0_6] : memref<1x256xf32, #tpu.memory_space<vmem>>, vector<1x256xf32>
    %7 = vector.broadcast %6 : vector<1x256xf32> to vector<128x256xf32>
    %8 = arith.addf %5, %7 : vector<128x256xf32>
    %cst_7 = arith.constant 0.000000e+00 : f32
    %9 = vector.broadcast %cst_7 : f32 to vector<128x256xf32>
    %10 = arith.maximumf %8, %9 : vector<128x256xf32>
    %c0_8 = arith.constant 0 : index
    %c0_9 = arith.constant 0 : index
    %11 = vector.load %arg6[%c0_8, %c0_9] : memref<128x256xf32, #tpu.memory_space<vmem>>, vector<128x256xf32>
    tpu.vector_store %arg6[%c0_8, %c0_9], %10 {strides = array<i32>} : memref<128x256xf32, #tpu.memory_space<vmem>>, vector<128x256xf32>,
    return
  }
  func.func @transform_0(%arg0: i32, %arg1: i32) -> (i32, i32) {
    %c0_i32 = arith.constant 0 : i32
    %c0_i32_0 = arith.constant 0 : i32
    return %arg0, %c0_i32 : i32, i32
  }
  func.func @transform_1(%arg0: i32, %arg1: i32) -> (i32, i32) {
    %c0_i32 = arith.constant 0 : i32
    %c0_i32_0 = arith.constant 0 : i32
    return %c0_i32, %arg1 : i32, i32
  }
  func.func @transform_2(%arg0: i32, %arg1: i32) -> (i32, i32) {
    %c0_i32 = arith.constant 0 : i32
    %c0_i32_0 = arith.constant 0 : i32
    return %c0_i32, %arg1 : i32, i32
  }
  func.func @transform_3(%arg0: i32, %arg1: i32) -> (i32, i32) {
    %c0_i32 = arith.constant 0 : i32
    %c0_i32_0 = arith.constant 0 : i32
    return %c0_i32, %arg1 : i32, i32
  }
  func.func @transform_4(%arg0: i32, %arg1: i32) -> (i32, i32) {
    %c0_i32 = arith.constant 0 : i32
    return %arg0, %arg1 : i32, i32
  }
}

module attributes {stable_mosaic.version = 11 : i64} {
  func.func @_matmul_bn_kernel(%arg0: i32, %arg1: i32, %arg2: memref<128x240xf32, #tpu.memory_space<vmem>>, %arg3: memref<240x128xf32, #tpu.memory_space<vmem>>, %arg4: memref<1x128xf32, #tpu.memory_space<vmem>>, %arg5: memref<1x128xf32, #tpu.memory_space<vmem>>, %arg6: memref<128x128xf32, #tpu.memory_space<vmem>>) attributes {dimension_semantics = [#tpu.dimension_semantics<parallel>, #tpu.dimension_semantics<parallel>], iteration_bounds = array<i64: 1, 1>, scalar_prefetch = 0 : i64, scratch_operands = 0 : i64, tpu.core_type = #tpu.core_type<tc>, window_params = [{transform_indices = @transform_0, window_bounds = array<i64: 128, 240>}, {transform_indices = @transform_1, window_bounds = array<i64: 240, 128>}, {transform_indices = @transform_2, window_bounds = array<i64: 1, 128>}, {transform_indices = @transform_3, window_bounds = array<i64: 1, 128>}, {transform_indices = @transform_4, window_bounds = array<i64: 128, 128>}]} {
    %c0 = arith.constant 0 : index
    %c0_0 = arith.constant 0 : index
    %0 = vector.load %arg2[%c0, %c0_0] : memref<128x240xf32, #tpu.memory_space<vmem>>, vector<128x240xf32>
    %c0_1 = arith.constant 0 : index
    %c0_2 = arith.constant 0 : index
    %1 = vector.load %arg3[%c0_1, %c0_2] : memref<240x128xf32, #tpu.memory_space<vmem>>, vector<240x128xf32>
    %cst = arith.constant dense<0.000000e+00> : vector<128x128xf32>
    %2 = tpu.matmul %0, %1, %cst {dimension_numbers = #tpu.dot_dimension_numbers<[1], [0], [0], [1], [0, 0, 1, 1], [], []>} : vector<128x240xf32>, vector<240x128xf32>, vector<128x128xf32> -> vector<128x128xf32>
    %c0_3 = arith.constant 0 : index
    %c0_4 = arith.constant 0 : index
    %3 = vector.load %arg4[%c0_3, %c0_4] : memref<1x128xf32, #tpu.memory_space<vmem>>, vector<1x128xf32>
    %4 = vector.broadcast %3 : vector<1x128xf32> to vector<128x128xf32>
    %5 = arith.mulf %2, %4 : vector<128x128xf32>
    %c0_5 = arith.constant 0 : index
    %c0_6 = arith.constant 0 : index
    %6 = vector.load %arg5[%c0_5, %c0_6] : memref<1x128xf32, #tpu.memory_space<vmem>>, vector<1x128xf32>
    %7 = vector.broadcast %6 : vector<1x128xf32> to vector<128x128xf32>
    %8 = arith.addf %5, %7 : vector<128x128xf32>
    %cst_7 = arith.constant 0.000000e+00 : f32
    %9 = vector.broadcast %cst_7 : f32 to vector<128x128xf32>
    %10 = arith.maximumf %8, %9 : vector<128x128xf32>
    %c0_8 = arith.constant 0 : index
    %c0_9 = arith.constant 0 : index
    %11 = vector.load %arg6[%c0_8, %c0_9] : memref<128x128xf32, #tpu.memory_space<vmem>>, vector<128x128xf32>
    tpu.vector_store %arg6[%c0_8, %c0_9], %10 {strides = array<i32>} : memref<128x128xf32, #tpu.memory_space<vmem>>, vector<128x128xf32>,
    return
  }
  func.func @transform_0(%arg0: i32, %arg1: i32) -> (i32, i32) {
    %c0_i32 = arith.constant 0 : i32
    %c0_i32_0 = arith.constant 0 : i32
    return %arg0, %c0_i32 : i32, i32
  }
  func.func @transform_1(%arg0: i32, %arg1: i32) -> (i32, i32) {
    %c0_i32 = arith.constant 0 : i32
    %c0_i32_0 = arith.constant 0 : i32
    return %c0_i32, %arg1 : i32, i32
  }
  func.func @transform_2(%arg0: i32, %arg1: i32) -> (i32, i32) {
    %c0_i32 = arith.constant 0 : i32
    %c0_i32_0 = arith.constant 0 : i32
    return %c0_i32, %arg1 : i32, i32
  }
  func.func @transform_3(%arg0: i32, %arg1: i32) -> (i32, i32) {
    %c0_i32 = arith.constant 0 : i32
    %c0_i32_0 = arith.constant 0 : i32
    return %c0_i32, %arg1 : i32, i32
  }
  func.func @transform_4(%arg0: i32, %arg1: i32) -> (i32, i32) {
    %c0_i32 = arith.constant 0 : i32
    return %arg0, %arg1 : i32, i32
  }
}

module attributes {stable_mosaic.version = 11 : i64} {
  func.func @_dw3x3_kernel(%arg0: i32, %arg1: memref<1x10x10x60xf32, #tpu.memory_space<vmem>>, %arg2: memref<9x1x1x60xf32, #tpu.memory_space<vmem>>, %arg3: memref<1x1x1x60xf32, #tpu.memory_space<vmem>>, %arg4: memref<1x1x1x60xf32, #tpu.memory_space<vmem>>, %arg5: memref<1x8x8x60xf32, #tpu.memory_space<vmem>>) attributes {dimension_semantics = [#tpu.dimension_semantics<parallel>], iteration_bounds = array<i64: 2>, scalar_prefetch = 0 : i64, scratch_operands = 0 : i64, tpu.core_type = #tpu.core_type<tc>, window_params = [{transform_indices = @transform_0, window_bounds = array<i64: 1, 10, 10, 60>}, {pipeline_mode = #tpu.pipeline_mode<synchronous>, transform_indices = @transform_1, window_bounds = array<i64: 9, 1, 1, 60>}, {pipeline_mode = #tpu.pipeline_mode<synchronous>, transform_indices = @transform_2, window_bounds = array<i64: 1, 1, 1, 60>}, {pipeline_mode = #tpu.pipeline_mode<synchronous>, transform_indices = @transform_3, window_bounds = array<i64: 1, 1, 1, 60>}, {transform_indices = @transform_4, window_bounds = array<i64: 1, 8, 8, 60>}]} {
    %cst = arith.constant 0.000000e+00 : f32
    %0 = vector.broadcast %cst : f32 to vector<1x8x8x60xf32>
    %c0 = arith.constant 0 : index
    %c0_0 = arith.constant 0 : index
    %c0_1 = arith.constant 0 : index
    %c0_2 = arith.constant 0 : index
    %1 = vector.load %arg1[%c0, %c0_0, %c0_1, %c0_2] : memref<1x10x10x60xf32, #tpu.memory_space<vmem>>, vector<1x8x8x60xf32>
    %c0_3 = arith.constant 0 : index
    %c0_4 = arith.constant 0 : index
    %c0_5 = arith.constant 0 : index
    %c0_6 = arith.constant 0 : index
    %2 = vector.load %arg2[%c0_3, %c0_4, %c0_5, %c0_6] : memref<9x1x1x60xf32, #tpu.memory_space<vmem>>, vector<1x1x1x60xf32>
    %3 = vector.shape_cast %2 : vector<1x1x1x60xf32> to vector<1x1x60xf32>
    %4 = vector.shape_cast %3 : vector<1x1x60xf32> to vector<1x1x1x60xf32>
    %5 = vector.broadcast %4 : vector<1x1x1x60xf32> to vector<1x8x8x60xf32>
    %6 = arith.mulf %1, %5 : vector<1x8x8x60xf32>
    %7 = arith.addf %0, %6 : vector<1x8x8x60xf32>
    %c0_7 = arith.constant 0 : index
    %c0_8 = arith.constant 0 : index
    %c1 = arith.constant 1 : index
    %c0_9 = arith.constant 0 : index
    %8 = vector.load %arg1[%c0_7, %c0_8, %c1, %c0_9] : memref<1x10x10x60xf32, #tpu.memory_space<vmem>>, vector<1x8x8x60xf32>
    %c1_10 = arith.constant 1 : index
    %c0_11 = arith.constant 0 : index
    %c0_12 = arith.constant 0 : index
    %c0_13 = arith.constant 0 : index
    %9 = vector.load %arg2[%c1_10, %c0_11, %c0_12, %c0_13] : memref<9x1x1x60xf32, #tpu.memory_space<vmem>>, vector<1x1x1x60xf32>
    %10 = vector.shape_cast %9 : vector<1x1x1x60xf32> to vector<1x1x60xf32>
    %11 = vector.shape_cast %10 : vector<1x1x60xf32> to vector<1x1x1x60xf32>
    %12 = vector.broadcast %11 : vector<1x1x1x60xf32> to vector<1x8x8x60xf32>
    %13 = arith.mulf %8, %12 : vector<1x8x8x60xf32>
    %14 = arith.addf %7, %13 : vector<1x8x8x60xf32>
    %c0_14 = arith.constant 0 : index
    %c0_15 = arith.constant 0 : index
    %c2 = arith.constant 2 : index
    %c0_16 = arith.constant 0 : index
    %15 = vector.load %arg1[%c0_14, %c0_15, %c2, %c0_16] : memref<1x10x10x60xf32, #tpu.memory_space<vmem>>, vector<1x8x8x60xf32>
    %c2_17 = arith.constant 2 : index
    %c0_18 = arith.constant 0 : index
    %c0_19 = arith.constant 0 : index
    %c0_20 = arith.constant 0 : index
    %16 = vector.load %arg2[%c2_17, %c0_18, %c0_19, %c0_20] : memref<9x1x1x60xf32, #tpu.memory_space<vmem>>, vector<1x1x1x60xf32>
    %17 = vector.shape_cast %16 : vector<1x1x1x60xf32> to vector<1x1x60xf32>
    %18 = vector.shape_cast %17 : vector<1x1x60xf32> to vector<1x1x1x60xf32>
    %19 = vector.broadcast %18 : vector<1x1x1x60xf32> to vector<1x8x8x60xf32>
    %20 = arith.mulf %15, %19 : vector<1x8x8x60xf32>
    %21 = arith.addf %14, %20 : vector<1x8x8x60xf32>
    %c0_21 = arith.constant 0 : index
    %c1_22 = arith.constant 1 : index
    %c0_23 = arith.constant 0 : index
    %c0_24 = arith.constant 0 : index
    %22 = vector.load %arg1[%c0_21, %c1_22, %c0_23, %c0_24] : memref<1x10x10x60xf32, #tpu.memory_space<vmem>>, vector<1x8x8x60xf32>
    %c3 = arith.constant 3 : index
    %c0_25 = arith.constant 0 : index
    %c0_26 = arith.constant 0 : index
    %c0_27 = arith.constant 0 : index
    %23 = vector.load %arg2[%c3, %c0_25, %c0_26, %c0_27] : memref<9x1x1x60xf32, #tpu.memory_space<vmem>>, vector<1x1x1x60xf32>
    %24 = vector.shape_cast %23 : vector<1x1x1x60xf32> to vector<1x1x60xf32>
    %25 = vector.shape_cast %24 : vector<1x1x60xf32> to vector<1x1x1x60xf32>
    %26 = vector.broadcast %25 : vector<1x1x1x60xf32> to vector<1x8x8x60xf32>
    %27 = arith.mulf %22, %26 : vector<1x8x8x60xf32>
    %28 = arith.addf %21, %27 : vector<1x8x8x60xf32>
    %c0_28 = arith.constant 0 : index
    %c1_29 = arith.constant 1 : index
    %c1_30 = arith.constant 1 : index
    %c0_31 = arith.constant 0 : index
    %29 = vector.load %arg1[%c0_28, %c1_29, %c1_30, %c0_31] : memref<1x10x10x60xf32, #tpu.memory_space<vmem>>, vector<1x8x8x60xf32>
    %c4 = arith.constant 4 : index
    %c0_32 = arith.constant 0 : index
    %c0_33 = arith.constant 0 : index
    %c0_34 = arith.constant 0 : index
    %30 = vector.load %arg2[%c4, %c0_32, %c0_33, %c0_34] : memref<9x1x1x60xf32, #tpu.memory_space<vmem>>, vector<1x1x1x60xf32>
    %31 = vector.shape_cast %30 : vector<1x1x1x60xf32> to vector<1x1x60xf32>
    %32 = vector.shape_cast %31 : vector<1x1x60xf32> to vector<1x1x1x60xf32>
    %33 = vector.broadcast %32 : vector<1x1x1x60xf32> to vector<1x8x8x60xf32>
    %34 = arith.mulf %29, %33 : vector<1x8x8x60xf32>
    %35 = arith.addf %28, %34 : vector<1x8x8x60xf32>
    %c0_35 = arith.constant 0 : index
    %c1_36 = arith.constant 1 : index
    %c2_37 = arith.constant 2 : index
    %c0_38 = arith.constant 0 : index
    %36 = vector.load %arg1[%c0_35, %c1_36, %c2_37, %c0_38] : memref<1x10x10x60xf32, #tpu.memory_space<vmem>>, vector<1x8x8x60xf32>
    %c5 = arith.constant 5 : index
    %c0_39 = arith.constant 0 : index
    %c0_40 = arith.constant 0 : index
    %c0_41 = arith.constant 0 : index
    %37 = vector.load %arg2[%c5, %c0_39, %c0_40, %c0_41] : memref<9x1x1x60xf32, #tpu.memory_space<vmem>>, vector<1x1x1x60xf32>
    %38 = vector.shape_cast %37 : vector<1x1x1x60xf32> to vector<1x1x60xf32>
    %39 = vector.shape_cast %38 : vector<1x1x60xf32> to vector<1x1x1x60xf32>
    %40 = vector.broadcast %39 : vector<1x1x1x60xf32> to vector<1x8x8x60xf32>
    %41 = arith.mulf %36, %40 : vector<1x8x8x60xf32>
    %42 = arith.addf %35, %41 : vector<1x8x8x60xf32>
    %c0_42 = arith.constant 0 : index
    %c2_43 = arith.constant 2 : index
    %c0_44 = arith.constant 0 : index
    %c0_45 = arith.constant 0 : index
    %43 = vector.load %arg1[%c0_42, %c2_43, %c0_44, %c0_45] : memref<1x10x10x60xf32, #tpu.memory_space<vmem>>, vector<1x8x8x60xf32>
    %c6 = arith.constant 6 : index
    %c0_46 = arith.constant 0 : index
    %c0_47 = arith.constant 0 : index
    %c0_48 = arith.constant 0 : index
    %44 = vector.load %arg2[%c6, %c0_46, %c0_47, %c0_48] : memref<9x1x1x60xf32, #tpu.memory_space<vmem>>, vector<1x1x1x60xf32>
    %45 = vector.shape_cast %44 : vector<1x1x1x60xf32> to vector<1x1x60xf32>
    %46 = vector.shape_cast %45 : vector<1x1x60xf32> to vector<1x1x1x60xf32>
    %47 = vector.broadcast %46 : vector<1x1x1x60xf32> to vector<1x8x8x60xf32>
    %48 = arith.mulf %43, %47 : vector<1x8x8x60xf32>
    %49 = arith.addf %42, %48 : vector<1x8x8x60xf32>
    %c0_49 = arith.constant 0 : index
    %c2_50 = arith.constant 2 : index
    %c1_51 = arith.constant 1 : index
    %c0_52 = arith.constant 0 : index
    %50 = vector.load %arg1[%c0_49, %c2_50, %c1_51, %c0_52] : memref<1x10x10x60xf32, #tpu.memory_space<vmem>>, vector<1x8x8x60xf32>
    %c7 = arith.constant 7 : index
    %c0_53 = arith.constant 0 : index
    %c0_54 = arith.constant 0 : index
    %c0_55 = arith.constant 0 : index
    %51 = vector.load %arg2[%c7, %c0_53, %c0_54, %c0_55] : memref<9x1x1x60xf32, #tpu.memory_space<vmem>>, vector<1x1x1x60xf32>
    %52 = vector.shape_cast %51 : vector<1x1x1x60xf32> to vector<1x1x60xf32>
    %53 = vector.shape_cast %52 : vector<1x1x60xf32> to vector<1x1x1x60xf32>
    %54 = vector.broadcast %53 : vector<1x1x1x60xf32> to vector<1x8x8x60xf32>
    %55 = arith.mulf %50, %54 : vector<1x8x8x60xf32>
    %56 = arith.addf %49, %55 : vector<1x8x8x60xf32>
    %c0_56 = arith.constant 0 : index
    %c2_57 = arith.constant 2 : index
    %c2_58 = arith.constant 2 : index
    %c0_59 = arith.constant 0 : index
    %57 = vector.load %arg1[%c0_56, %c2_57, %c2_58, %c0_59] : memref<1x10x10x60xf32, #tpu.memory_space<vmem>>, vector<1x8x8x60xf32>
    %c8 = arith.constant 8 : index
    %c0_60 = arith.constant 0 : index
    %c0_61 = arith.constant 0 : index
    %c0_62 = arith.constant 0 : index
    %58 = vector.load %arg2[%c8, %c0_60, %c0_61, %c0_62] : memref<9x1x1x60xf32, #tpu.memory_space<vmem>>, vector<1x1x1x60xf32>
    %59 = vector.shape_cast %58 : vector<1x1x1x60xf32> to vector<1x1x60xf32>
    %60 = vector.shape_cast %59 : vector<1x1x60xf32> to vector<1x1x1x60xf32>
    %61 = vector.broadcast %60 : vector<1x1x1x60xf32> to vector<1x8x8x60xf32>
    %62 = arith.mulf %57, %61 : vector<1x8x8x60xf32>
    %63 = arith.addf %56, %62 : vector<1x8x8x60xf32>
    %c0_63 = arith.constant 0 : index
    %c0_64 = arith.constant 0 : index
    %c0_65 = arith.constant 0 : index
    %c0_66 = arith.constant 0 : index
    %64 = vector.load %arg3[%c0_63, %c0_64, %c0_65, %c0_66] : memref<1x1x1x60xf32, #tpu.memory_space<vmem>>, vector<1x1x1x60xf32>
    %65 = vector.broadcast %64 : vector<1x1x1x60xf32> to vector<1x8x8x60xf32>
    %66 = arith.mulf %63, %65 : vector<1x8x8x60xf32>
    %c0_67 = arith.constant 0 : index
    %c0_68 = arith.constant 0 : index
    %c0_69 = arith.constant 0 : index
    %c0_70 = arith.constant 0 : index
    %67 = vector.load %arg4[%c0_67, %c0_68, %c0_69, %c0_70] : memref<1x1x1x60xf32, #tpu.memory_space<vmem>>, vector<1x1x1x60xf32>
    %68 = vector.broadcast %67 : vector<1x1x1x60xf32> to vector<1x8x8x60xf32>
    %69 = arith.addf %66, %68 : vector<1x8x8x60xf32>
    %c0_71 = arith.constant 0 : index
    %c0_72 = arith.constant 0 : index
    %c0_73 = arith.constant 0 : index
    %c0_74 = arith.constant 0 : index
    %70 = vector.load %arg5[%c0_71, %c0_72, %c0_73, %c0_74] : memref<1x8x8x60xf32, #tpu.memory_space<vmem>>, vector<1x8x8x60xf32>
    tpu.vector_store %arg5[%c0_71, %c0_72, %c0_73, %c0_74], %69 {strides = array<i32>} : memref<1x8x8x60xf32, #tpu.memory_space<vmem>>, vector<1x8x8x60xf32>,
    return
  }
  func.func @transform_0(%arg0: i32) -> (i32, i32, i32, i32) {
    %c0_i32 = arith.constant 0 : i32
    %c0_i32_0 = arith.constant 0 : i32
    %c0_i32_1 = arith.constant 0 : i32
    %c0_i32_2 = arith.constant 0 : i32
    return %arg0, %c0_i32, %c0_i32_0, %c0_i32_1 : i32, i32, i32, i32
  }
  func.func @transform_1(%arg0: i32) -> (i32, i32, i32, i32) {
    %c0_i32 = arith.constant 0 : i32
    %c0_i32_0 = arith.constant 0 : i32
    %c0_i32_1 = arith.constant 0 : i32
    %c0_i32_2 = arith.constant 0 : i32
    %c0_i32_3 = arith.constant 0 : i32
    return %c0_i32, %c0_i32_0, %c0_i32_1, %c0_i32_2 : i32, i32, i32, i32
  }
  func.func @transform_2(%arg0: i32) -> (i32, i32, i32, i32) {
    %c0_i32 = arith.constant 0 : i32
    %c0_i32_0 = arith.constant 0 : i32
    %c0_i32_1 = arith.constant 0 : i32
    %c0_i32_2 = arith.constant 0 : i32
    %c0_i32_3 = arith.constant 0 : i32
    return %c0_i32, %c0_i32_0, %c0_i32_1, %c0_i32_2 : i32, i32, i32, i32
  }
  func.func @transform_3(%arg0: i32) -> (i32, i32, i32, i32) {
    %c0_i32 = arith.constant 0 : i32
    %c0_i32_0 = arith.constant 0 : i32
    %c0_i32_1 = arith.constant 0 : i32
    %c0_i32_2 = arith.constant 0 : i32
    %c0_i32_3 = arith.constant 0 : i32
    return %c0_i32, %c0_i32_0, %c0_i32_1, %c0_i32_2 : i32, i32, i32, i32
  }
  func.func @transform_4(%arg0: i32) -> (i32, i32, i32, i32) {
    %c0_i32 = arith.constant 0 : i32
    %c0_i32_0 = arith.constant 0 : i32
    %c0_i32_1 = arith.constant 0 : i32
    %c0_i32_2 = arith.constant 0 : i32
    return %arg0, %c0_i32, %c0_i32_0, %c0_i32_1 : i32, i32, i32, i32
  }
}

module attributes {stable_mosaic.version = 11 : i64} {
  func.func @_matmul_bn_kernel(%arg0: i32, %arg1: i32, %arg2: memref<128x60xf32, #tpu.memory_space<vmem>>, %arg3: memref<60x256xf32, #tpu.memory_space<vmem>>, %arg4: memref<1x256xf32, #tpu.memory_space<vmem>>, %arg5: memref<1x256xf32, #tpu.memory_space<vmem>>, %arg6: memref<128x256xf32, #tpu.memory_space<vmem>>, %arg7: memref<128x256xf32, #tpu.memory_space<vmem>>) attributes {dimension_semantics = [#tpu.dimension_semantics<parallel>, #tpu.dimension_semantics<parallel>], iteration_bounds = array<i64: 1, 1>, scalar_prefetch = 0 : i64, scratch_operands = 0 : i64, tpu.core_type = #tpu.core_type<tc>, window_params = [{transform_indices = @transform_0, window_bounds = array<i64: 128, 60>}, {transform_indices = @transform_1, window_bounds = array<i64: 60, 256>}, {transform_indices = @transform_2, window_bounds = array<i64: 1, 256>}, {transform_indices = @transform_3, window_bounds = array<i64: 1, 256>}, {transform_indices = @transform_4, window_bounds = array<i64: 128, 256>}, {transform_indices = @transform_5, window_bounds = array<i64: 128, 256>}]} {
    %c0 = arith.constant 0 : index
    %c0_0 = arith.constant 0 : index
    %0 = vector.load %arg2[%c0, %c0_0] : memref<128x60xf32, #tpu.memory_space<vmem>>, vector<128x60xf32>
    %c0_1 = arith.constant 0 : index
    %c0_2 = arith.constant 0 : index
    %1 = vector.load %arg3[%c0_1, %c0_2] : memref<60x256xf32, #tpu.memory_space<vmem>>, vector<60x256xf32>
    %cst = arith.constant dense<0.000000e+00> : vector<128x256xf32>
    %2 = tpu.matmul %0, %1, %cst {dimension_numbers = #tpu.dot_dimension_numbers<[1], [0], [0], [1], [0, 0, 1, 1], [], []>} : vector<128x60xf32>, vector<60x256xf32>, vector<128x256xf32> -> vector<128x256xf32>
    %c0_3 = arith.constant 0 : index
    %c0_4 = arith.constant 0 : index
    %3 = vector.load %arg4[%c0_3, %c0_4] : memref<1x256xf32, #tpu.memory_space<vmem>>, vector<1x256xf32>
    %4 = vector.broadcast %3 : vector<1x256xf32> to vector<128x256xf32>
    %5 = arith.mulf %2, %4 : vector<128x256xf32>
    %c0_5 = arith.constant 0 : index
    %c0_6 = arith.constant 0 : index
    %6 = vector.load %arg5[%c0_5, %c0_6] : memref<1x256xf32, #tpu.memory_space<vmem>>, vector<1x256xf32>
    %7 = vector.broadcast %6 : vector<1x256xf32> to vector<128x256xf32>
    %8 = arith.addf %5, %7 : vector<128x256xf32>
    %c0_7 = arith.constant 0 : index
    %c0_8 = arith.constant 0 : index
    %9 = vector.load %arg6[%c0_7, %c0_8] : memref<128x256xf32, #tpu.memory_space<vmem>>, vector<128x256xf32>
    %10 = arith.addf %8, %9 : vector<128x256xf32>
    %cst_9 = arith.constant 0.000000e+00 : f32
    %11 = vector.broadcast %cst_9 : f32 to vector<128x256xf32>
    %12 = arith.maximumf %10, %11 : vector<128x256xf32>
    %c0_10 = arith.constant 0 : index
    %c0_11 = arith.constant 0 : index
    %13 = vector.load %arg7[%c0_10, %c0_11] : memref<128x256xf32, #tpu.memory_space<vmem>>, vector<128x256xf32>
    tpu.vector_store %arg7[%c0_10, %c0_11], %12 {strides = array<i32>} : memref<128x256xf32, #tpu.memory_space<vmem>>, vector<128x256xf32>,
    return
  }
  func.func @transform_0(%arg0: i32, %arg1: i32) -> (i32, i32) {
    %c0_i32 = arith.constant 0 : i32
    %c0_i32_0 = arith.constant 0 : i32
    return %arg0, %c0_i32 : i32, i32
  }
  func.func @transform_1(%arg0: i32, %arg1: i32) -> (i32, i32) {
    %c0_i32 = arith.constant 0 : i32
    %c0_i32_0 = arith.constant 0 : i32
    return %c0_i32, %arg1 : i32, i32
  }
  func.func @transform_2(%arg0: i32, %arg1: i32) -> (i32, i32) {
    %c0_i32 = arith.constant 0 : i32
    %c0_i32_0 = arith.constant 0 : i32
    return %c0_i32, %arg1 : i32, i32
  }
  func.func @transform_3(%arg0: i32, %arg1: i32) -> (i32, i32) {
    %c0_i32 = arith.constant 0 : i32
    %c0_i32_0 = arith.constant 0 : i32
    return %c0_i32, %arg1 : i32, i32
  }
  func.func @transform_4(%arg0: i32, %arg1: i32) -> (i32, i32) {
    %c0_i32 = arith.constant 0 : i32
    return %arg0, %arg1 : i32, i32
  }
  func.func @transform_5(%arg0: i32, %arg1: i32) -> (i32, i32) {
    %c0_i32 = arith.constant 0 : i32
    return %arg0, %arg1 : i32, i32
  }
}

</mosaic_0001>

<bundles_post_ra>
// kernel: _lambda_.9
= control target key start
LH: loop header
LB: loop body
LE: loop exit
PB: predicated region body
PF: predicated region fallthrough
CT: control target
= control target key end

     0   :  { %s714_s24 = smov 0   ;;  %s883_s0 = inlined_call_operand.vmem [shape: f32[2,9,9,24], index: 0, kind: input, shape index: {}]   ;;  %s884_s1 = inlined_call_operand.vmem [shape: f32[2,9,9,24], index: 1, kind: input, shape index: {}]   ;;  %s885_s2 = inlined_call_operand.vmem [shape: f32[2,9,9,24], index: 2, kind: input, shape index: {}]   ;;  %s886_s3 = inlined_call_operand.vmem [shape: f32[2,9,9,24], index: 3, kind: input, shape index: {}]   ;;  %s887_s4 = inlined_call_operand.vmem [shape: f32[9,1,1,24], index: 4, kind: input, shape index: {}]   ;;  %s888_s5 = inlined_call_operand.vmem [shape: f32[1,1,1,24], index: 5, kind: input, shape index: {}]   ;;  %s889_s6 = inlined_call_operand.vmem [shape: f32[1,1,1,24], index: 6, kind: input, shape index: {}]   ;;  %s890_s7 = inlined_call_operand.vmem [shape: f32[2,8,8,24], index: 7, kind: output, shape index: {}]  }
   0x1 LB: > { %s617_s4 = sadd.s32 4294967295, %s672_s24   ;;  %p621_p0 = scmp.ge.s32.totalorder %s672_s24, 1  ;;  %s672_s24 = sphi %s714_s24, %s17_s24  }
   0x2   : > { %p267_p1 = scmp.lt.s32.totalorder %s672_s24, 3 }
   0x4   : > { %p268_p2 = pnand %p621_p0, %p267_p1 }
   0x5   : > { %p314_p3 = scmp.lt.s32.totalorder (!%p268_p2), %s617_s4, 1 }
   0x6   : > { %271 = sbr.rel (%p268_p2) target bundleno = 57 (0x39), region = 48 }
   0xb   : > { %s892_s4 = smov (!%p314_p3, %s617_s4), 1  ;;  %v792_v44 = vld [vmem:[%s888_s5] ss:$0 sm:$0xff]  ;;  %vm517_vm0 = vcmask 195584  }
   0xc   : > { %s655_s25 = smul.u32 144, %s892_s4  ;;  %v808_v56 = vld [vmem:[%s889_s6] ss:$0 sm:$0xff]  ;;  %s654_s19 = sshll.u32 %s892_s4, 6 }
   0xd   : > { %s840_s22 = scalar_lea.vmem %s890_s7, %s654_s19 }
   0xe   : > { %s728_s28 = scalar_lea.vmem %s883_s0, %s655_s25  ;;  %s733_s8 = scalar_lea.vmem %s884_s1, %s655_s25 }
   0xf   : > { %s738_s11 = scalar_lea.vmem %s885_s2, %s655_s25  ;;  %s743_s14 = scalar_lea.vmem %s886_s3, %s655_s25  ;;  %v339_v0 = vld [vmem:[%s728_s28] sm:$0xff]  ;;  %v628_v5 = vld [vmem:[%s728_s28 + $0x10] sm:$0xff] }
  0x10   : > { %v355_v1 = vld [vmem:[%s733_s8] sm:$0xff]  ;;  %v636_v6 = vld [vmem:[%s733_s8 + $0x10] sm:$0xff] }
  0x11   : > { %v371_v2 = vld [vmem:[%s728_s28 + $0x1] sm:$0xff]  ;;  %v363_v3 = vadd.f32 %v355_v1, %v339_v0  ;;  %v752_v7 = vld [vmem:[%s728_s28 + $0x11] sm:$0xff]  ;;  %v364_v10 = vadd.f32 %v636_v6, %v628_v5 }
  0x12   : > { %v387_v4 = vld [vmem:[%s738_s11] sm:$0xff]  ;;  %v388_v11 = vld [vmem:[%s738_s11 + $0x10] sm:$0xff] }
  0x13   : > { %v379_v8 = vadd.f32 %v371_v2, %v363_v3  ;;  %v403_v9 = vld [vmem:[%s743_s14] sm:$0xff]  ;;  %v380_v17 = vadd.f32 %v752_v7, %v364_v10  ;;  %v404_v18 = vld [vmem:[%s743_s14 + $0x10] sm:$0xff] }
  0x14   : > { %v629_v12 = vld [vmem:[%s728_s28 + $0x20] sm:$0xff]  ;;  %v630_v21 = vld [vmem:[%s728_s28 + $0x30] sm:$0xff] }
  0x15   : > { %v637_v13 = vld [vmem:[%s733_s8 + $0x20] sm:$0xff]  ;;  %v395_v15 = vadd.f32 %v387_v4, %v379_v8  ;;  %v638_v22 = vld [vmem:[%s733_s8 + $0x30] sm:$0xff]  ;;  %v396_v25 = vadd.f32 %v388_v11, %v380_v17 }
  0x16   : > { %v759_v14 = vld [vmem:[%s728_s28 + $0x21] sm:$0xff]  ;;  %v365_v19 = vadd.f32 %v637_v13, %v629_v12  ;;  %v768_v23 = vld [vmem:[%s728_s28 + $0x31] sm:$0xff]  ;;  %v366_v29 = vadd.f32 %v638_v22, %v630_v21 }
  0x17   : > { %v419_v16 = vld [vmem:[%s738_s11 + $0x1] sm:$0xff]  ;;  %v411_v24 = vadd.f32 %v403_v9, %v395_v15  ;;  %v420_v26 = vld [vmem:[%s738_s11 + $0x11] sm:$0xff]  ;;  %v412_v34 = vadd.f32 %v404_v18, %v396_v25 }
  0x18   : > { %v389_v20 = vld [vmem:[%s738_s11 + $0x20] sm:$0xff]  ;;  %v381_v27 = vadd.f32 %v759_v14, %v365_v19  ;;  %v390_v30 = vld [vmem:[%s738_s11 + $0x30] sm:$0xff]  ;;  %v382_v37 = vadd.f32 %v768_v23, %v366_v29 }
  0x19   : > { %v405_v28 = vld [vmem:[%s743_s14 + $0x20] sm:$0xff]  ;;  %v427_v33 = vadd.f32 %v419_v16, %v411_v24  ;;  %v406_v39 = vld [vmem:[%s743_s14 + $0x30] sm:$0xff]  ;;  %v428_v45 = vadd.f32 %v420_v26, %v412_v34 }
  0x1a   : > { %v631_v31 = vld [vmem:[%s728_s28 + $0x40] sm:$0xff]  ;;  %v397_v35 = vadd.f32 %v389_v20, %v381_v27  ;;  %v632_v41 = vld [vmem:[%s728_s28 + $0x50] sm:$0xff]  ;;  %v398_v47 = vadd.f32 %v390_v30, %v382_v37 }
  0x1b   : > { %v776_v32 = vld [vmem:[%s733_s8 + $0x40] sm:$0xff]  ;;  %v787_v42 = vld [vmem:[%s733_s8 + $0x50] sm:$0xff]  ;;  %v444_v43 = vadd.f32 %v628_v5, %v427_v33  ;;  %v445_v57 = vadd.f32 %v629_v12, %v428_v45 }
  0x1c   : > { %v421_v36 = vld [vmem:[%s738_s11 + $0x21] sm:$0xff]  ;;  %v367_v40 = vadd.f32 %v776_v32, %v631_v31  ;;  %v413_v46 = vadd.f32 %v405_v28, %v397_v35  ;;  %v796_v49 = vld [vmem:[%s728_s28 + $0x51] sm:$0xff]  ;;  %v368_v52 = vadd.f32 %v787_v42, %v632_v41  ;;  %v414_v59 = vadd.f32 %v406_v39, %v398_v47 }
  0x1d   : > { %v781_v38 = vld [vmem:[%s728_s28 + $0x41] sm:$0xff]  ;;  %v422_v50 = vld [vmem:[%s738_s11 + $0x31] sm:$0xff]  ;;  %v461_v55 = vadd.f32 %v636_v6, %v444_v43  ;;  %v462_v6 = vadd.f32 %v637_v13, %v445_v57 }
  0x1e   : > { %v391_v48 = vld [vmem:[%s738_s11 + $0x40] sm:$0xff]  ;;  %v383_v51 = vadd.f32 %v781_v38, %v367_v40  ;;  %v429_v58 = vadd.f32 %v421_v36, %v413_v46  ;;  %v392_v61 = vld [vmem:[%s738_s11 + $0x50] sm:$0xff]  ;;  %v384_v1 = vadd.f32 %v796_v49, %v368_v52  ;;  %v430_v9 = vadd.f32 %v422_v50, %v414_v59 }
  0x1f   : > { %v633_v53 = vld [vmem:[%s728_s28 + $0x60] sm:$0xff]  ;;  %v634_v3 = vld [vmem:[%s728_s28 + $0x70] sm:$0xff]  ;;  %v477_v5 = vadd.f32 %v752_v7, %v461_v55  ;;  %v478_v7 = vadd.f32 %v759_v14, %v462_v6 }
  0x20   : > { %v803_v54 = vld [vmem:[%s733_s8 + $0x60] sm:$0xff]  ;;  %v399_v63 = vadd.f32 %v391_v48, %v383_v51  ;;  %v642_v4 = vld [vmem:[%s733_s8 + $0x70] sm:$0xff]  ;;  %v446_v8 = vadd.f32 %v630_v21, %v429_v58  ;;  %v400_v16 = vadd.f32 %v392_v61, %v384_v1  ;;  %v447_v20 = vadd.f32 %v631_v31, %v430_v9 }
  0x21   : > { %v407_v60 = vld [vmem:[%s743_s14 + $0x40] sm:$0xff]  ;;  %v369_v2 = vadd.f32 %v803_v54, %v633_v53  ;;  %v408_v10 = vld [vmem:[%s743_s14 + $0x50] sm:$0xff]  ;;  %v370_v18 = vadd.f32 %v642_v4, %v634_v3  ;;  %v489_v19 = vmul.f32 %v792_v44, %v477_v5  ;;  %v490_v33 = vmul.f32 %v792_v44, %v478_v7 }
  0x22   : > { %v813_v62 = vld [vmem:[%s728_s28 + $0x61] sm:$0xff]  ;;  %v650_v12 = vld [vmem:[%s728_s28 + $0x71] sm:$0xff]  ;;  %v415_v15 = vadd.f32 %v407_v60, %v399_v63  ;;  %v463_v13 = vadd.f32 %v638_v22, %v446_v8  ;;  %v416_v27 = vadd.f32 %v408_v10, %v400_v16  ;;  %v464_v35 = vadd.f32 %v776_v32, %v447_v20 }
  0x23   : > { %v423_v0 = vld [vmem:[%s738_s11 + $0x41] sm:$0xff]  ;;  %v385_v17 = vadd.f32 %v813_v62, %v369_v2  ;;  %v424_v21 = vld [vmem:[%s738_s11 + $0x51] sm:$0xff]  ;;  %v386_v29 = vadd.f32 %v650_v12, %v370_v18  ;;  %v501_v30 = vadd.f32 %v808_v56, %v489_v19  ;;  %v502_v43 = vadd.f32 %v808_v56, %v490_v33 }
  0x24   : > { %v393_v11 = vld [vmem:[%s738_s11 + $0x60] sm:$0xff]  ;;  %v394_v25 = vld [vmem:[%s738_s11 + $0x70] sm:$0xff]  ;;  %v431_v26 = vadd.f32 %v423_v0, %v415_v15  ;;  %v479_v34 = vadd.f32 %v768_v23, %v463_v13  ;;  %v432_v31 = vadd.f32 %v424_v21, %v416_v27  ;;  %v480_v32 = vadd.f32 %v781_v38, %v464_v35 }
  0x25   : > { %v409_v24 = vld [vmem:[%s743_s14 + $0x60] sm:$0xff]  ;;  %v401_v28 = vadd.f32 %v393_v11, %v385_v17  ;;  %v410_v14 = vld [vmem:[%s743_s14 + $0x70] sm:$0xff]  ;;  %v402_v39 = vadd.f32 %v394_v25, %v386_v29  ;;  %v509_v40 = vmax.f32 %v501_v30, 0.0 }
  0x26   : > { %v425_v36 = vld [vmem:[%s738_s11 + $0x61] sm:$0xff]  ;;  %v448_v22 = vadd.f32 %v632_v41, %v431_v26  ;;  %v491_v23 = vmul.f32 %v792_v44, %v479_v34  ;;  %v426_v45 = vld [vmem:[%s738_s11 + $0x71] sm:$0xff]  ;;  %v449_v47 = vadd.f32 %v633_v53, %v432_v31  ;;  %v510_v41 = vmax.f32 %v502_v43, 0.0 }
  0x27   : > { %v417_v37 = vadd.f32 %v409_v24, %v401_v28  ;;  %v418_v50 = vadd.f32 %v410_v14, %v402_v39  ;;  %518 = vst.msk [vmem:[%s840_s22] sm:$0xff] %vm517_vm0, %v509_v40  ;;  %v492_v52 = vmul.f32 %v792_v44, %v480_v32  ;;  %v635_v55 = vld [vmem:[%s728_s28 + $0x80] sm:$0xff] }
  0x28   : > { %v465_v46 = vadd.f32 %v787_v42, %v448_v22  ;;  %v503_v51 = vadd.f32 %v808_v56, %v491_v23  ;;  %v466_v38 = vadd.f32 %v803_v54, %v449_v47  ;;  %519 = vst.msk [vmem:[%s840_s22 + $0x8] sm:$0xff] %vm517_vm0, %v510_v41  ;;  %v643_v60 = vld [vmem:[%s733_s8 + $0x80] sm:$0xff] }
  0x29   : > { %v433_v48 = vadd.f32 %v425_v36, %v417_v37  ;;  %v434_v42 = vadd.f32 %v426_v45, %v418_v50  ;;  %v504_v59 = vadd.f32 %v808_v56, %v492_v52  ;;  %v651_v54 = vld [vmem:[%s728_s28 + $0x81] sm:$0xff] }
  0x2a   : > { %v481_v57 = vadd.f32 %v796_v49, %v465_v46  ;;  %v511_v53 = vmax.f32 %v503_v51, 0.0  ;;  %v482_v63 = vadd.f32 %v813_v62, %v466_v38 }
  0x2b   : > { %v450_v58 = vadd.f32 %v634_v3, %v433_v48  ;;  %v451_v1 = vadd.f32 %v635_v55, %v434_v42  ;;  %v512_v49 = vmax.f32 %v504_v59, 0.0 }
  0x2c   : > { %v493_v61 = vmul.f32 %v792_v44, %v481_v57  ;;  %520 = vst.msk [vmem:[%s840_s22 + $0x10] sm:$0xff] %vm517_vm0, %v511_v53  ;;  %v494_v3 = vmul.f32 %v792_v44, %v482_v63 }
  0x2d   : > { %v467_v0 = vadd.f32 %v642_v4, %v450_v58  ;;  %v468_v6 = vadd.f32 %v643_v60, %v451_v1  ;;  %521 = vst.msk [vmem:[%s840_s22 + $0x18] sm:$0xff] %vm517_vm0, %v512_v49 }
  0x2e   : > { %v505_v2 = vadd.f32 %v808_v56, %v493_v61  ;;  %v506_v62 = vadd.f32 %v808_v56, %v494_v3 }
  0x2f   : > { %v483_v5 = vadd.f32 %v650_v12, %v467_v0  ;;  %v484_v9 = vadd.f32 %v651_v54, %v468_v6 }
  0x30   : > { %v513_v8 = vmax.f32 %v505_v2, 0.0  ;;  %v514_v10 = vmax.f32 %v506_v62, 0.0 }
  0x31   : > { %v495_v4 = vmul.f32 %v792_v44, %v483_v5  ;;  %v496_v15 = vmul.f32 %v792_v44, %v484_v9 }
  0x32   : > { %522 = vst.msk [vmem:[%s840_s22 + $0x20] sm:$0xff] %vm517_vm0, %v513_v8 }
  0x33   : > { %v507_v11 = vadd.f32 %v808_v56, %v495_v4  ;;  %523 = vst.msk [vmem:[%s840_s22 + $0x28] sm:$0xff] %vm517_vm0, %v514_v10  ;;  %v508_v16 = vadd.f32 %v808_v56, %v496_v15 }
  0x35   : > { %v515_v12 = vmax.f32 %v507_v11, 0.0  ;;  %v516_v17 = vmax.f32 %v508_v16, 0.0 }
  0x37   : > { %524 = vst.msk [vmem:[%s840_s22 + $0x30] sm:$0xff] %vm517_vm0, %v515_v12 }
  0x38   : > { %525 = vst.msk [vmem:[%s840_s22 + $0x38] sm:$0xff] %vm517_vm0, %v516_v17 }
  0x39 PF: > { %s17_s24 = sadd.s32 1, %s672_s24  }
  0x3a   : > { %p14_p4 = scmp.ge.s32.totalorder %s17_s24, 4  }
  0x3c   :  { %16 = sbr.rel (!%p14_p4) target bundleno = 1 (0x1), region = 89 }

// kernel: _lambda_.7
= control target key start
LH: loop header
LB: loop body
LE: loop exit
PB: predicated region body
PF: predicated region fallthrough
CT: control target
= control target key end

     0   :  { %s891_s15 = smov 0   ;;  %s893_s16 = smov 0   ;;  %s1114_s0 = inlined_call_operand.vmem [shape: f32[512,24], index: 0, kind: input, shape index: {}]   ;;  %s1115_s1 = inlined_call_operand.vmem [shape: f32[24,128], index: 1, kind: input, shape index: {}]   ;;  %s1116_s2 = inlined_call_operand.vmem [shape: f32[1,128], index: 2, kind: input, shape index: {}]   ;;  %s1117_s3 = inlined_call_operand.vmem [shape: f32[1,128], index: 3, kind: input, shape index: {}]   ;;  %s1118_s4 = inlined_call_operand.vmem [shape: f32[512,128], index: 4, kind: output, shape index: {}]  }
   0x1   :  { %s895_s17 = smov 0  }
   0x2 LB: > { %s26_s18 = sadd.s32 1, %s860_s16  ;;  %p768_p0 = scmp.ge.s32.totalorder %s864_s17, 1  ;;  %s864_s17 = sphi %s895_s17, %s14_s17   ;;  %s860_s16 = sphi %s893_s16, %s1120_s16   ;;  %s856_s15 = sphi %s891_s15, %s1119_s15  }
   0x3   : > { %p28_p1 = scmp.ge.s32.totalorder %s26_s18, 2  ;;  %p202_p2 = scmp.lt.s32.totalorder %s864_s17, 3 }
   0x5   : > { %s1122_s18 = smov (%p28_p1, %s26_s18), 0  ;;  %p203_p3 = pnand %p768_p0, %p202_p2 }
   0x6   : > { %s769_s23 = sshll.u32 (!%p203_p3), %s856_s15, 5 }
   0x7   : > { %206 = sbr.rel (%p203_p3) target bundleno = 215 (0xd7), region = 36  ;;  %p242_p4 = scmp.lt.s32.totalorder (!%p203_p3), %s769_s23, 63 }
   0xc   : > { %v300_v0 = vld [vmem:[%s1115_s1 + $0x10] sm:$0xff]  ;;  %v299_v1 = vld [vmem:[%s1115_s1 + $0x8] sm:$0xff]  ;;  %v298_v2 = vld [vmem:[%s1115_s1] sm:$0xff]  ;;  %s1124_s23 = smov (!%p242_p4, %s769_s23), 63  ;;  %vm301_vm0 = vcmask 195584  }
   0xd   : > { %808 = vmatpush.msra.mxu2 %v300_v0  ;;  %809 = vmatpush.msra.mxu3 %v300_v0  ;;  %s770_s26 = sshll.u32 %s1124_s23, 3  ;;  %v995_v35 = vld [vmem:[%s1116_s2] ss:$0 sm:$0xff] }
   0xe   : > { %411 = vmatpush.msra.mxu0 %v300_v0  ;;  %807 = vmatpush.msra.mxu1 %v300_v0  ;;  %s926_s29 = scalar_lea.vmem %s1114_s0, %s770_s26  ;;  %v1000_v36 = vld [vmem:[%s1117_s3] ss:$0 sm:$0xff]  ;;  %s1011_s10 = scalar_lea.vmem %s1118_s4, %s770_s26 }
   0xf   : > { %811 = vmatpush.msra.mxu2 %v299_v1  ;;  %812 = vmatpush.msra.mxu3 %v299_v1  ;;  %v282_v3 = vld [vmem:[%s926_s29 + $0x80] sm:$0xff]  ;;  %v283_v7 = vld [vmem:[%s926_s29 + $0x88] sm:$0xff]  ;;  %v284_v11 = vld [vmem:[%s926_s29 + $0x90] sm:$0xff] }
  0x10   : > { %412 = vmatpush.msra.mxu0 %v299_v1  ;;  %810 = vmatpush.msra.mxu1 %v299_v1  ;;  %v290_v4 = vld [vmem:[%s926_s29 + $0xc0] sm:$0xff]  ;;  %v291_v8 = vld [vmem:[%s926_s29 + $0xc8] sm:$0xff]  ;;  %v292_v12 = vld [vmem:[%s926_s29 + $0xd0] sm:$0xff] }
  0x11   : > { %814 = vmatpush.msra.mxu2 %v298_v2  ;;  %815 = vmatpush.msra.mxu3 %v298_v2  ;;  %v266_v5 = vld [vmem:[%s926_s29] sm:$0xff]  ;;  %v267_v9 = vld [vmem:[%s926_s29 + $0x8] sm:$0xff]  ;;  %v268_v13 = vld [vmem:[%s926_s29 + $0x10] sm:$0xff] }
  0x12   : > { %413 = vmatpush.msra.mxu0 %v298_v2  ;;  %813 = vmatpush.msra.mxu1 %v298_v2  ;;  %v274_v6 = vld [vmem:[%s926_s29 + $0x40] sm:$0xff]  ;;  %v275_v10 = vld [vmem:[%s926_s29 + $0x48] sm:$0xff]  ;;  %v276_v14 = vld [vmem:[%s926_s29 + $0x50] sm:$0xff] }
  0x13   : > { %789 = vmatmul.msk.f32.vlgmr.msra.gmra.mxu2 %vm301_vm0, %v282_v3  ;;  %797 = vmatmul.msk.f32.vlgmr.msra.gmra.mxu3 %vm301_vm0, %v290_v4  ;;  %v285_v15 = vld [vmem:[%s926_s29 + $0x98] sm:$0xff]  ;;  %v286_v19 = vld [vmem:[%s926_s29 + $0xa0] sm:$0xff]  ;;  %v287_v23 = vld [vmem:[%s926_s29 + $0xa8] sm:$0xff] }
  0x14   : > { %773 = vmatmul.msk.f32.vlgmr.msra.gmra.mxu0 %vm301_vm0, %v266_v5  ;;  %781 = vmatmul.msk.f32.vlgmr.msra.gmra.mxu1 %vm301_vm0, %v274_v6  ;;  %v293_v16 = vld [vmem:[%s926_s29 + $0xd8] sm:$0xff]  ;;  %v294_v20 = vld [vmem:[%s926_s29 + $0xe0] sm:$0xff]  ;;  %v295_v24 = vld [vmem:[%s926_s29 + $0xe8] sm:$0xff] }
  0x15   : > { %v269_v17 = vld [vmem:[%s926_s29 + $0x18] sm:$0xff]  ;;  %v270_v21 = vld [vmem:[%s926_s29 + $0x20] sm:$0xff]  ;;  %v271_v25 = vld [vmem:[%s926_s29 + $0x28] sm:$0xff] }
  0x16   : > { %v277_v18 = vld [vmem:[%s926_s29 + $0x58] sm:$0xff]  ;;  %v278_v22 = vld [vmem:[%s926_s29 + $0x60] sm:$0xff]  ;;  %v279_v26 = vld [vmem:[%s926_s29 + $0x68] sm:$0xff] }
  0x17   : > { %v288_v27 = vld [vmem:[%s926_s29 + $0xb0] sm:$0xff]  ;;  %v289_v31 = vld [vmem:[%s926_s29 + $0xb8] sm:$0xff] }
  0x18   : > { %v296_v28 = vld [vmem:[%s926_s29 + $0xf0] sm:$0xff]  ;;  %v297_v32 = vld [vmem:[%s926_s29 + $0xf8] sm:$0xff] }
  0x19   : > { %v272_v29 = vld [vmem:[%s926_s29 + $0x30] sm:$0xff]  ;;  %v273_v33 = vld [vmem:[%s926_s29 + $0x38] sm:$0xff] }
  0x1a   : > { %v280_v30 = vld [vmem:[%s926_s29 + $0x70] sm:$0xff]  ;;  %v281_v34 = vld [vmem:[%s926_s29 + $0x78] sm:$0xff] }
  0x1b   : > { %790 = vmatmul.msk.f32.gmra.mxu2 %vm301_vm0, %v283_v7  ;;  %798 = vmatmul.msk.f32.gmra.mxu3 %vm301_vm0, %v291_v8 }
  0x1c   : > { %774 = vmatmul.msk.f32.gmra.mxu0 %vm301_vm0, %v267_v9  ;;  %782 = vmatmul.msk.f32.gmra.mxu1 %vm301_vm0, %v275_v10 }
  0x23   : > { %791 = vmatmul.msk.f32.gmra.mxu2 %vm301_vm0, %v284_v11  ;;  %799 = vmatmul.msk.f32.gmra.mxu3 %vm301_vm0, %v292_v12 }
  0x24   : > { %775 = vmatmul.msk.f32.gmra.mxu0 %vm301_vm0, %v268_v13  ;;  %783 = vmatmul.msk.f32.gmra.mxu1 %vm301_vm0, %v276_v14 }
  0x2b   : > { %792 = vmatmul.msk.f32.gmra.mxu2 %vm301_vm0, %v285_v15  ;;  %800 = vmatmul.msk.f32.gmra.mxu3 %vm301_vm0, %v293_v16 }
  0x2c   : > { %776 = vmatmul.msk.f32.gmra.mxu0 %vm301_vm0, %v269_v17  ;;  %784 = vmatmul.msk.f32.gmra.mxu1 %vm301_vm0, %v277_v18 }
  0x33   : > { %793 = vmatmul.msk.f32.gmra.mxu2 %vm301_vm0, %v286_v19  ;;  %801 = vmatmul.msk.f32.gmra.mxu3 %vm301_vm0, %v294_v20 }
  0x34   : > { %777 = vmatmul.msk.f32.gmra.mxu0 %vm301_vm0, %v270_v21  ;;  %785 = vmatmul.msk.f32.gmra.mxu1 %vm301_vm0, %v278_v22 }
  0x3b   : > { %794 = vmatmul.msk.f32.gmra.mxu2 %vm301_vm0, %v287_v23  ;;  %802 = vmatmul.msk.f32.gmra.mxu3 %vm301_vm0, %v295_v24 }
  0x3c   : > { %778 = vmatmul.msk.f32.gmra.mxu0 %vm301_vm0, %v271_v25  ;;  %786 = vmatmul.msk.f32.gmra.mxu1 %vm301_vm0, %v279_v26 }
  0x43   : > { %795 = vmatmul.msk.f32.gmra.mxu2 %vm301_vm0, %v288_v27  ;;  %803 = vmatmul.msk.f32.gmra.mxu3 %vm301_vm0, %v296_v28 }
  0x44   : > { %779 = vmatmul.msk.f32.gmra.mxu0 %vm301_vm0, %v272_v29  ;;  %787 = vmatmul.msk.f32.gmra.mxu1 %vm301_vm0, %v280_v30 }
  0x4b   : > { %796 = vmatmul.msk.f32.gmra.mxu2 %vm301_vm0, %v289_v31  ;;  %804 = vmatmul.msk.f32.gmra.mxu3 %vm301_vm0, %v297_v32 }
  0x4c   : > { %780 = vmatmul.msk.f32.gmra.mxu0 %vm301_vm0, %v273_v33  ;;  %788 = vmatmul.msk.f32.gmra.mxu1 %vm301_vm0, %v281_v34 }
  0x91   : > { %v415_v37 = vpop.f32.mrf.mxu0  ;;  %v439_v38 = vpop.f32.mrf.mxu1 }
  0x92   : > { %v515_v39 = vmul.f32 %v995_v35, %v415_v37  ;;  %v523_v40 = vmul.f32 %v995_v35, %v439_v38 }
  0x94   : > { %v551_v41 = vadd.f32 %v1000_v36, %v515_v39  ;;  %v559_v42 = vadd.f32 %v1000_v36, %v523_v40 }
  0x96   : > { %v583_v43 = vmax.f32 %v551_v41, 0.0  ;;  %v591_v44 = vmax.f32 %v559_v42, 0.0  ;;  %v463_v45 = vpop.f32.mrf.mxu2  ;;  %v487_v46 = vpop.f32.mrf.mxu3 }
  0x97   : > { %v531_v47 = vmul.f32 %v995_v35, %v463_v45  ;;  %v539_v48 = vmul.f32 %v995_v35, %v487_v46 }
  0x98   : > { %615 = vst [vmem:[%s1011_s10] sm:$0xff] %v583_v43 }
  0x99   : > { %623 = vst [vmem:[%s1011_s10 + $0x40] sm:$0xff] %v591_v44  ;;  %v567_v49 = vadd.f32 %v1000_v36, %v531_v47  ;;  %v575_v50 = vadd.f32 %v1000_v36, %v539_v48  ;;  %v418_v51 = vpop.f32.mrf.mxu0  ;;  %v442_v52 = vpop.f32.mrf.mxu1 }
  0x9a   : > { %v516_v53 = vmul.f32 %v995_v35, %v418_v51  ;;  %v524_v54 = vmul.f32 %v995_v35, %v442_v52 }
  0x9b   : > { %v599_v55 = vmax.f32 %v567_v49, 0.0  ;;  %v607_v56 = vmax.f32 %v575_v50, 0.0 }
  0x9c   : > { %v552_v57 = vadd.f32 %v1000_v36, %v516_v53  ;;  %v560_v58 = vadd.f32 %v1000_v36, %v524_v54 }
  0x9d   : > { %631 = vst [vmem:[%s1011_s10 + $0x80] sm:$0xff] %v599_v55 }
  0x9e   : > { %639 = vst [vmem:[%s1011_s10 + $0xc0] sm:$0xff] %v607_v56  ;;  %v584_v59 = vmax.f32 %v552_v57, 0.0  ;;  %v592_v60 = vmax.f32 %v560_v58, 0.0  ;;  %v466_v61 = vpop.f32.mrf.mxu2  ;;  %v490_v62 = vpop.f32.mrf.mxu3 }
  0x9f   : > { %v532_v63 = vmul.f32 %v995_v35, %v466_v61  ;;  %v540_v0 = vmul.f32 %v995_v35, %v490_v62 }
  0xa0   : > { %616 = vst [vmem:[%s1011_s10 + $0x8] sm:$0xff] %v584_v59 }
  0xa1   : > { %624 = vst [vmem:[%s1011_s10 + $0x48] sm:$0xff] %v592_v60  ;;  %v568_v1 = vadd.f32 %v1000_v36, %v532_v63  ;;  %v576_v2 = vadd.f32 %v1000_v36, %v540_v0  ;;  %v421_v3 = vpop.f32.mrf.mxu0  ;;  %v445_v4 = vpop.f32.mrf.mxu1 }
  0xa2   : > { %v517_v5 = vmul.f32 %v995_v35, %v421_v3  ;;  %v525_v6 = vmul.f32 %v995_v35, %v445_v4 }
  0xa3   : > { %v600_v7 = vmax.f32 %v568_v1, 0.0  ;;  %v608_v8 = vmax.f32 %v576_v2, 0.0 }
  0xa4   : > { %v553_v9 = vadd.f32 %v1000_v36, %v517_v5  ;;  %v561_v10 = vadd.f32 %v1000_v36, %v525_v6 }
  0xa5   : > { %632 = vst [vmem:[%s1011_s10 + $0x88] sm:$0xff] %v600_v7 }
  0xa6   : > { %640 = vst [vmem:[%s1011_s10 + $0xc8] sm:$0xff] %v608_v8  ;;  %v585_v11 = vmax.f32 %v553_v9, 0.0  ;;  %v593_v12 = vmax.f32 %v561_v10, 0.0  ;;  %v469_v13 = vpop.f32.mrf.mxu2  ;;  %v493_v14 = vpop.f32.mrf.mxu3 }
  0xa7   : > { %v533_v15 = vmul.f32 %v995_v35, %v469_v13  ;;  %v541_v16 = vmul.f32 %v995_v35, %v493_v14 }
  0xa8   : > { %617 = vst [vmem:[%s1011_s10 + $0x10] sm:$0xff] %v585_v11 }
  0xa9   : > { %625 = vst [vmem:[%s1011_s10 + $0x50] sm:$0xff] %v593_v12  ;;  %v569_v17 = vadd.f32 %v1000_v36, %v533_v15  ;;  %v577_v18 = vadd.f32 %v1000_v36, %v541_v16  ;;  %v424_v19 = vpop.f32.mrf.mxu0  ;;  %v448_v20 = vpop.f32.mrf.mxu1 }
  0xaa   : > { %v518_v21 = vmul.f32 %v995_v35, %v424_v19  ;;  %v526_v22 = vmul.f32 %v995_v35, %v448_v20 }
  0xab   : > { %v601_v23 = vmax.f32 %v569_v17, 0.0  ;;  %v609_v24 = vmax.f32 %v577_v18, 0.0 }
  0xac   : > { %v554_v25 = vadd.f32 %v1000_v36, %v518_v21  ;;  %v562_v26 = vadd.f32 %v1000_v36, %v526_v22 }
  0xad   : > { %633 = vst [vmem:[%s1011_s10 + $0x90] sm:$0xff] %v601_v23 }
  0xae   : > { %641 = vst [vmem:[%s1011_s10 + $0xd0] sm:$0xff] %v609_v24  ;;  %v586_v27 = vmax.f32 %v554_v25, 0.0  ;;  %v594_v28 = vmax.f32 %v562_v26, 0.0  ;;  %v472_v29 = vpop.f32.mrf.mxu2  ;;  %v496_v30 = vpop.f32.mrf.mxu3 }
  0xaf   : > { %v534_v31 = vmul.f32 %v995_v35, %v472_v29  ;;  %v542_v32 = vmul.f32 %v995_v35, %v496_v30 }
  0xb0   : > { %618 = vst [vmem:[%s1011_s10 + $0x18] sm:$0xff] %v586_v27 }
  0xb1   : > { %626 = vst [vmem:[%s1011_s10 + $0x58] sm:$0xff] %v594_v28  ;;  %v570_v33 = vadd.f32 %v1000_v36, %v534_v31  ;;  %v578_v34 = vadd.f32 %v1000_v36, %v542_v32  ;;  %v427_v37 = vpop.f32.mrf.mxu0  ;;  %v451_v38 = vpop.f32.mrf.mxu1 }
  0xb2   : > { %v519_v39 = vmul.f32 %v995_v35, %v427_v37  ;;  %v527_v40 = vmul.f32 %v995_v35, %v451_v38 }
  0xb3   : > { %v602_v41 = vmax.f32 %v570_v33, 0.0  ;;  %v610_v42 = vmax.f32 %v578_v34, 0.0 }
  0xb4   : > { %v555_v43 = vadd.f32 %v1000_v36, %v519_v39  ;;  %v563_v44 = vadd.f32 %v1000_v36, %v527_v40 }
  0xb5   : > { %634 = vst [vmem:[%s1011_s10 + $0x98] sm:$0xff] %v602_v41 }
  0xb6   : > { %642 = vst [vmem:[%s1011_s10 + $0xd8] sm:$0xff] %v610_v42  ;;  %v587_v45 = vmax.f32 %v555_v43, 0.0  ;;  %v595_v46 = vmax.f32 %v563_v44, 0.0  ;;  %v475_v47 = vpop.f32.mrf.mxu2  ;;  %v499_v48 = vpop.f32.mrf.mxu3 }
  0xb7   : > { %v535_v49 = vmul.f32 %v995_v35, %v475_v47  ;;  %v543_v50 = vmul.f32 %v995_v35, %v499_v48 }
  0xb8   : > { %619 = vst [vmem:[%s1011_s10 + $0x20] sm:$0xff] %v587_v45 }
  0xb9   : > { %627 = vst [vmem:[%s1011_s10 + $0x60] sm:$0xff] %v595_v46  ;;  %v571_v51 = vadd.f32 %v1000_v36, %v535_v49  ;;  %v579_v52 = vadd.f32 %v1000_v36, %v543_v50  ;;  %v430_v53 = vpop.f32.mrf.mxu0  ;;  %v454_v54 = vpop.f32.mrf.mxu1 }
  0xba   : > { %v520_v55 = vmul.f32 %v995_v35, %v430_v53  ;;  %v528_v56 = vmul.f32 %v995_v35, %v454_v54 }
  0xbb   : > { %v603_v57 = vmax.f32 %v571_v51, 0.0  ;;  %v611_v58 = vmax.f32 %v579_v52, 0.0 }
  0xbc   : > { %v556_v59 = vadd.f32 %v1000_v36, %v520_v55  ;;  %v564_v60 = vadd.f32 %v1000_v36, %v528_v56 }
  0xbd   : > { %635 = vst [vmem:[%s1011_s10 + $0xa0] sm:$0xff] %v603_v57 }
  0xbe   : > { %643 = vst [vmem:[%s1011_s10 + $0xe0] sm:$0xff] %v611_v58  ;;  %v588_v61 = vmax.f32 %v556_v59, 0.0  ;;  %v596_v62 = vmax.f32 %v564_v60, 0.0  ;;  %v478_v63 = vpop.f32.mrf.mxu2  ;;  %v502_v0 = vpop.f32.mrf.mxu3 }
  0xbf   : > { %v536_v1 = vmul.f32 %v995_v35, %v478_v63  ;;  %v544_v2 = vmul.f32 %v995_v35, %v502_v0 }
  0xc0   : > { %620 = vst [vmem:[%s1011_s10 + $0x28] sm:$0xff] %v588_v61 }
  0xc1   : > { %628 = vst [vmem:[%s1011_s10 + $0x68] sm:$0xff] %v596_v62  ;;  %v572_v3 = vadd.f32 %v1000_v36, %v536_v1  ;;  %v580_v4 = vadd.f32 %v1000_v36, %v544_v2  ;;  %v433_v5 = vpop.f32.mrf.mxu0  ;;  %v457_v6 = vpop.f32.mrf.mxu1 }
  0xc2   : > { %v521_v7 = vmul.f32 %v995_v35, %v433_v5  ;;  %v529_v8 = vmul.f32 %v995_v35, %v457_v6 }
  0xc3   : > { %v604_v9 = vmax.f32 %v572_v3, 0.0  ;;  %v612_v10 = vmax.f32 %v580_v4, 0.0 }
  0xc4   : > { %v557_v11 = vadd.f32 %v1000_v36, %v521_v7  ;;  %v565_v12 = vadd.f32 %v1000_v36, %v529_v8 }
  0xc5   : > { %636 = vst [vmem:[%s1011_s10 + $0xa8] sm:$0xff] %v604_v9 }
  0xc6   : > { %644 = vst [vmem:[%s1011_s10 + $0xe8] sm:$0xff] %v612_v10  ;;  %v589_v13 = vmax.f32 %v557_v11, 0.0  ;;  %v597_v14 = vmax.f32 %v565_v12, 0.0  ;;  %v481_v15 = vpop.f32.mrf.mxu2  ;;  %v505_v16 = vpop.f32.mrf.mxu3 }
  0xc7   : > { %v537_v17 = vmul.f32 %v995_v35, %v481_v15  ;;  %v545_v18 = vmul.f32 %v995_v35, %v505_v16 }
  0xc8   : > { %621 = vst [vmem:[%s1011_s10 + $0x30] sm:$0xff] %v589_v13 }
  0xc9   : > { %629 = vst [vmem:[%s1011_s10 + $0x70] sm:$0xff] %v597_v14  ;;  %v573_v19 = vadd.f32 %v1000_v36, %v537_v17  ;;  %v581_v20 = vadd.f32 %v1000_v36, %v545_v18  ;;  %v436_v21 = vpop.f32.mrf.mxu0  ;;  %v460_v22 = vpop.f32.mrf.mxu1 }
  0xca   : > { %v522_v23 = vmul.f32 %v995_v35, %v436_v21  ;;  %v530_v24 = vmul.f32 %v995_v35, %v460_v22 }
  0xcb   : > { %v605_v25 = vmax.f32 %v573_v19, 0.0  ;;  %v613_v26 = vmax.f32 %v581_v20, 0.0 }
  0xcc   : > { %v558_v27 = vadd.f32 %v1000_v36, %v522_v23  ;;  %v566_v28 = vadd.f32 %v1000_v36, %v530_v24 }
  0xcd   : > { %637 = vst [vmem:[%s1011_s10 + $0xb0] sm:$0xff] %v605_v25 }
  0xce   : > { %645 = vst [vmem:[%s1011_s10 + $0xf0] sm:$0xff] %v613_v26  ;;  %v590_v29 = vmax.f32 %v558_v27, 0.0  ;;  %v598_v30 = vmax.f32 %v566_v28, 0.0  ;;  %v484_v31 = vpop.f32.mrf.mxu2  ;;  %v508_v32 = vpop.f32.mrf.mxu3 }
  0xcf   : > { %v538_v33 = vmul.f32 %v995_v35, %v484_v31  ;;  %v546_v34 = vmul.f32 %v995_v35, %v508_v32 }
  0xd0   : > { %622 = vst [vmem:[%s1011_s10 + $0x38] sm:$0xff] %v590_v29 }
  0xd1   : > { %630 = vst [vmem:[%s1011_s10 + $0x78] sm:$0xff] %v598_v30  ;;  %v574_v37 = vadd.f32 %v1000_v36, %v538_v33  ;;  %v582_v38 = vadd.f32 %v1000_v36, %v546_v34 }
  0xd3   : > { %v606_v39 = vmax.f32 %v574_v37, 0.0  ;;  %v614_v40 = vmax.f32 %v582_v38, 0.0 }
  0xd5   : > { %638 = vst [vmem:[%s1011_s10 + $0xb8] sm:$0xff] %v606_v39 }
  0xd6   : > { %646 = vst [vmem:[%s1011_s10 + $0xf8] sm:$0xff] %v614_v40 }
  0xd7 PF: > { %s14_s17 = sadd.s32 1, %s864_s17   ;;  %s1119_s15 = smov %s860_s16 }
  0xd8   : > { %p11_p5 = scmp.ge.s32.totalorder %s14_s17, 4   ;;  %s1120_s16 = smov %s1122_s18 }
  0xda   :  { %13 = sbr.rel (!%p11_p5) target bundleno = 2 (0x2), region = 75 }

// kernel: _lambda_.10
= control target key start
LH: loop header
LB: loop body
LE: loop exit
PB: predicated region body
PF: predicated region fallthrough
CT: control target
= control target key end

     0   :  { %vm98_vm0 = vcmask 1043456   ;;  %vm49_vm1 = vcmask 490496   ;;  %s756_s1 = inlined_call_operand.vmem [shape: f32[60,256], index: 1, kind: input, shape index: {}]   ;;  %s757_s0 = inlined_call_operand.vmem [shape: f32[128,60], index: 0, kind: input, shape index: {}]   ;;  %s758_s2 = inlined_call_operand.vmem [shape: f32[1,256], index: 2, kind: input, shape index: {}]   ;;  %s759_s3 = inlined_call_operand.vmem [shape: f32[1,256], index: 3, kind: input, shape index: {}]   ;;  %s760_s4 = inlined_call_operand.vmem [shape: f32[128,256], index: 4, kind: output, shape index: {}]  }
   0x1   :  { %v47_v0 = vld [vmem:[%s756_s1 + $0x70] sm:$0xf]  ;;  %v48_v1 = vld [vmem:[%s756_s1 + $0x78] sm:$0xf]  ;;  %v45_v2 = vld [vmem:[%s756_s1 + $0x60] sm:$0xff] }
   0x2   :  { %413 = vmatpush.msk.msra.mxu2 %vm98_vm0, %v47_v0  ;;  %421 = vmatpush.msk.msra.mxu3 %vm98_vm0, %v48_v1  ;;  %v46_v3 = vld [vmem:[%s756_s1 + $0x68] sm:$0xff]  ;;  %v43_v4 = vld [vmem:[%s756_s1 + $0x50] sm:$0xff]  ;;  %v44_v5 = vld [vmem:[%s756_s1 + $0x58] sm:$0xff] }
   0x3   :  { %379 = vmatpush.msk.msra.mxu0 %vm98_vm0, %v47_v0  ;;  %396 = vmatpush.msk.msra.mxu1 %vm98_vm0, %v48_v1  ;;  %v41_v6 = vld [vmem:[%s756_s1 + $0x40] sm:$0xff]  ;;  %v42_v7 = vld [vmem:[%s756_s1 + $0x48] sm:$0xff]  ;;  %v39_v8 = vld [vmem:[%s756_s1 + $0x30] sm:$0xff] }
   0x4   :  { %414 = vmatpush.msra.mxu2 %v45_v2  ;;  %422 = vmatpush.msra.mxu3 %v46_v3  ;;  %v40_v9 = vld [vmem:[%s756_s1 + $0x38] sm:$0xff]  ;;  %v37_v10 = vld [vmem:[%s756_s1 + $0x20] sm:$0xff]  ;;  %v38_v11 = vld [vmem:[%s756_s1 + $0x28] sm:$0xff] }
   0x5   :  { %114 = vmatpush.msra.mxu0 %v45_v2  ;;  %179 = vmatpush.msra.mxu1 %v46_v3  ;;  %v35_v12 = vld [vmem:[%s756_s1 + $0x10] sm:$0xff]  ;;  %v36_v13 = vld [vmem:[%s756_s1 + $0x18] sm:$0xff]  ;;  %v33_v14 = vld [vmem:[%s756_s1] sm:$0xff] }
   0x6   :  { %415 = vmatpush.msra.mxu2 %v43_v4  ;;  %423 = vmatpush.msra.mxu3 %v44_v5  ;;  %v34_v15 = vld [vmem:[%s756_s1 + $0x8] sm:$0xff]  ;;  %v25_v16 = vld [vmem:[%s757_s0 + $0x40] sm:$0xff]  ;;  %v27_v20 = vld [vmem:[%s757_s0 + $0x50] sm:$0xff] }
   0x7   :  { %115 = vmatpush.msra.mxu0 %v43_v4  ;;  %180 = vmatpush.msra.mxu1 %v44_v5  ;;  %v17_v17 = vld [vmem:[%s757_s0] sm:$0xff]  ;;  %v26_v18 = vld [vmem:[%s757_s0 + $0x48] sm:$0xff]  ;;  %v19_v21 = vld [vmem:[%s757_s0 + $0x10] sm:$0xff] }
   0x8   :  { %416 = vmatpush.msra.mxu2 %v41_v6  ;;  %424 = vmatpush.msra.mxu3 %v42_v7  ;;  %v18_v19 = vld [vmem:[%s757_s0 + $0x8] sm:$0xff]  ;;  %v28_v22 = vld [vmem:[%s757_s0 + $0x58] sm:$0xff]  ;;  %v29_v24 = vld [vmem:[%s757_s0 + $0x60] sm:$0xff] }
   0x9   :  { %116 = vmatpush.msra.mxu0 %v41_v6  ;;  %181 = vmatpush.msra.mxu1 %v42_v7  ;;  %v20_v23 = vld [vmem:[%s757_s0 + $0x18] sm:$0xff]  ;;  %v21_v25 = vld [vmem:[%s757_s0 + $0x20] sm:$0xff]  ;;  %v30_v26 = vld [vmem:[%s757_s0 + $0x68] sm:$0xff] }
   0xa   :  { %417 = vmatpush.msra.mxu2 %v39_v8  ;;  %425 = vmatpush.msra.mxu3 %v40_v9  ;;  %v22_v27 = vld [vmem:[%s757_s0 + $0x28] sm:$0xff]  ;;  %v31_v28 = vld [vmem:[%s757_s0 + $0x70] sm:$0xff]  ;;  %v32_v30 = vld [vmem:[%s757_s0 + $0x78] sm:$0xff] }
   0xb   :  { %117 = vmatpush.msra.mxu0 %v39_v8  ;;  %182 = vmatpush.msra.mxu1 %v40_v9  ;;  %v23_v29 = vld [vmem:[%s757_s0 + $0x30] sm:$0xff]  ;;  %v24_v31 = vld [vmem:[%s757_s0 + $0x38] sm:$0xff]  ;;  %v235_v32 = vld [vmem:[%s758_s2] sm:$0x3] }
   0xc   :  { %418 = vmatpush.msra.mxu2 %v37_v10  ;;  %426 = vmatpush.msra.mxu3 %v38_v11  ;;  %v273_v33 = vld [vmem:[%s759_s3] sm:$0x3]  ;;  %v588_v34 = vperm.slane %v235_v32, 0  ;;  %v590_v35 = vperm.slane %v235_v32, 1 }
   0xd   :  { %118 = vmatpush.msra.mxu0 %v37_v10  ;;  %183 = vmatpush.msra.mxu1 %v38_v11  ;;  %v592_v36 = vperm.slane %v273_v33, 0  ;;  %v594_v37 = vperm.slane %v273_v33, 1 }
   0xe   :  { %419 = vmatpush.msra.mxu2 %v35_v12  ;;  %427 = vmatpush.msra.mxu3 %v36_v13 }
   0xf   :  { %119 = vmatpush.msra.mxu0 %v35_v12  ;;  %184 = vmatpush.msra.mxu1 %v36_v13 }
  0x10   :  { %420 = vmatpush.msra.mxu2 %v33_v14  ;;  %428 = vmatpush.msra.mxu3 %v34_v15 }
  0x11   :  { %388 = vmatmul.msk.f32.vlgmr.msra.gmra.mxu2 %vm49_vm1, %v25_v16  ;;  %405 = vmatmul.msk.f32.vlgmr.msra.gmra.mxu3 %vm49_vm1, %v25_v16 }
  0x12   :  { %120 = vmatpush.msra.mxu0 %v33_v14  ;;  %185 = vmatpush.msra.mxu1 %v34_v15 }
  0x13   :  { %380 = vmatmul.msk.f32.vlgmr.msra.gmra.mxu0 %vm49_vm1, %v17_v17  ;;  %397 = vmatmul.msk.f32.vlgmr.msra.gmra.mxu1 %vm49_vm1, %v17_v17 }
  0x19   :  { %389 = vmatmul.msk.f32.gmra.mxu2 %vm49_vm1, %v26_v18  ;;  %406 = vmatmul.msk.f32.gmra.mxu3 %vm49_vm1, %v26_v18 }
  0x1b   :  { %381 = vmatmul.msk.f32.gmra.mxu0 %vm49_vm1, %v18_v19  ;;  %398 = vmatmul.msk.f32.gmra.mxu1 %vm49_vm1, %v18_v19 }
  0x21   :  { %390 = vmatmul.msk.f32.gmra.mxu2 %vm49_vm1, %v27_v20  ;;  %407 = vmatmul.msk.f32.gmra.mxu3 %vm49_vm1, %v27_v20 }
  0x23   :  { %382 = vmatmul.msk.f32.gmra.mxu0 %vm49_vm1, %v19_v21  ;;  %399 = vmatmul.msk.f32.gmra.mxu1 %vm49_vm1, %v19_v21 }
  0x29   :  { %391 = vmatmul.msk.f32.gmra.mxu2 %vm49_vm1, %v28_v22  ;;  %408 = vmatmul.msk.f32.gmra.mxu3 %vm49_vm1, %v28_v22 }
  0x2b   :  { %383 = vmatmul.msk.f32.gmra.mxu0 %vm49_vm1, %v20_v23  ;;  %400 = vmatmul.msk.f32.gmra.mxu1 %vm49_vm1, %v20_v23 }
  0x31   :  { %392 = vmatmul.msk.f32.gmra.mxu2 %vm49_vm1, %v29_v24  ;;  %409 = vmatmul.msk.f32.gmra.mxu3 %vm49_vm1, %v29_v24 }
  0x33   :  { %384 = vmatmul.msk.f32.gmra.mxu0 %vm49_vm1, %v21_v25  ;;  %401 = vmatmul.msk.f32.gmra.mxu1 %vm49_vm1, %v21_v25 }
  0x39   :  { %393 = vmatmul.msk.f32.gmra.mxu2 %vm49_vm1, %v30_v26  ;;  %410 = vmatmul.msk.f32.gmra.mxu3 %vm49_vm1, %v30_v26 }
  0x3b   :  { %385 = vmatmul.msk.f32.gmra.mxu0 %vm49_vm1, %v22_v27  ;;  %402 = vmatmul.msk.f32.gmra.mxu1 %vm49_vm1, %v22_v27 }
  0x41   :  { %394 = vmatmul.msk.f32.gmra.mxu2 %vm49_vm1, %v31_v28  ;;  %411 = vmatmul.msk.f32.gmra.mxu3 %vm49_vm1, %v31_v28 }
  0x43   :  { %386 = vmatmul.msk.f32.gmra.mxu0 %vm49_vm1, %v23_v29  ;;  %403 = vmatmul.msk.f32.gmra.mxu1 %vm49_vm1, %v23_v29 }
  0x49   :  { %395 = vmatmul.msk.f32.gmra.mxu2 %vm49_vm1, %v32_v30  ;;  %412 = vmatmul.msk.f32.gmra.mxu3 %vm49_vm1, %v32_v30 }
  0x4b   :  { %387 = vmatmul.msk.f32.gmra.mxu0 %vm49_vm1, %v24_v31  ;;  %404 = vmatmul.msk.f32.gmra.mxu1 %vm49_vm1, %v24_v31 }
  0x90   :  { %v122_v38 = vpop.f32.mrf.mxu0  ;;  %v187_v39 = vpop.f32.mrf.mxu1 }
  0x91   :  { %v241_v40 = vmul.f32 %v588_v34, %v122_v38  ;;  %v242_v41 = vmul.f32 %v590_v35, %v187_v39 }
  0x93   :  { %v279_v42 = vadd.f32 %v592_v36, %v241_v40  ;;  %v280_v43 = vadd.f32 %v594_v37, %v242_v41 }
  0x94   :  { %v146_v44 = vpop.f32.mrf.mxu2  ;;  %v211_v45 = vpop.f32.mrf.mxu3 }
  0x95   :  { %v311_v46 = vmax.f32 %v279_v42, 0.0  ;;  %v257_v47 = vmul.f32 %v588_v34, %v146_v44  ;;  %v312_v48 = vmax.f32 %v280_v43, 0.0  ;;  %v258_v49 = vmul.f32 %v590_v35, %v211_v45 }
  0x97   :  { %343 = vst [vmem:[%s760_s4] sm:$0xff] %v311_v46  ;;  %v295_v50 = vadd.f32 %v592_v36, %v257_v47  ;;  %v296_v51 = vadd.f32 %v594_v37, %v258_v49 }
  0x98   :  { %344 = vst [vmem:[%s760_s4 + $0x8] sm:$0xff] %v312_v48  ;;  %v125_v52 = vpop.f32.mrf.mxu0  ;;  %v190_v53 = vpop.f32.mrf.mxu1 }
  0x99   :  { %v327_v54 = vmax.f32 %v295_v50, 0.0  ;;  %v328_v55 = vmax.f32 %v296_v51, 0.0  ;;  %v243_v56 = vmul.f32 %v588_v34, %v125_v52  ;;  %v244_v57 = vmul.f32 %v590_v35, %v190_v53 }
  0x9b   :  { %359 = vst [vmem:[%s760_s4 + $0x80] sm:$0xff] %v327_v54  ;;  %v281_v58 = vadd.f32 %v592_v36, %v243_v56  ;;  %v282_v59 = vadd.f32 %v594_v37, %v244_v57 }
  0x9c   :  { %360 = vst [vmem:[%s760_s4 + $0x88] sm:$0xff] %v328_v55  ;;  %v149_v60 = vpop.f32.mrf.mxu2  ;;  %v214_v61 = vpop.f32.mrf.mxu3 }
  0x9d   :  { %v313_v62 = vmax.f32 %v281_v58, 0.0  ;;  %v259_v63 = vmul.f32 %v588_v34, %v149_v60  ;;  %v314_v0 = vmax.f32 %v282_v59, 0.0  ;;  %v260_v1 = vmul.f32 %v590_v35, %v214_v61 }
  0x9f   :  { %345 = vst [vmem:[%s760_s4 + $0x10] sm:$0xff] %v313_v62  ;;  %v297_v2 = vadd.f32 %v592_v36, %v259_v63  ;;  %v298_v3 = vadd.f32 %v594_v37, %v260_v1 }
  0xa0   :  { %346 = vst [vmem:[%s760_s4 + $0x18] sm:$0xff] %v314_v0  ;;  %v128_v4 = vpop.f32.mrf.mxu0  ;;  %v193_v5 = vpop.f32.mrf.mxu1 }
  0xa1   :  { %v329_v6 = vmax.f32 %v297_v2, 0.0  ;;  %v330_v7 = vmax.f32 %v298_v3, 0.0  ;;  %v245_v8 = vmul.f32 %v588_v34, %v128_v4  ;;  %v246_v9 = vmul.f32 %v590_v35, %v193_v5 }
  0xa3   :  { %361 = vst [vmem:[%s760_s4 + $0x90] sm:$0xff] %v329_v6  ;;  %v283_v10 = vadd.f32 %v592_v36, %v245_v8  ;;  %v284_v11 = vadd.f32 %v594_v37, %v246_v9 }
  0xa4   :  { %362 = vst [vmem:[%s760_s4 + $0x98] sm:$0xff] %v330_v7  ;;  %v152_v12 = vpop.f32.mrf.mxu2  ;;  %v217_v13 = vpop.f32.mrf.mxu3 }
  0xa5   :  { %v315_v14 = vmax.f32 %v283_v10, 0.0  ;;  %v261_v15 = vmul.f32 %v588_v34, %v152_v12  ;;  %v316_v16 = vmax.f32 %v284_v11, 0.0  ;;  %v262_v17 = vmul.f32 %v590_v35, %v217_v13 }
  0xa7   :  { %347 = vst [vmem:[%s760_s4 + $0x20] sm:$0xff] %v315_v14  ;;  %v299_v18 = vadd.f32 %v592_v36, %v261_v15  ;;  %v300_v19 = vadd.f32 %v594_v37, %v262_v17 }
  0xa8   :  { %348 = vst [vmem:[%s760_s4 + $0x28] sm:$0xff] %v316_v16  ;;  %v131_v20 = vpop.f32.mrf.mxu0  ;;  %v196_v21 = vpop.f32.mrf.mxu1 }
  0xa9   :  { %v331_v22 = vmax.f32 %v299_v18, 0.0  ;;  %v332_v23 = vmax.f32 %v300_v19, 0.0  ;;  %v247_v24 = vmul.f32 %v588_v34, %v131_v20  ;;  %v248_v25 = vmul.f32 %v590_v35, %v196_v21 }
  0xab   :  { %363 = vst [vmem:[%s760_s4 + $0xa0] sm:$0xff] %v331_v22  ;;  %v285_v26 = vadd.f32 %v592_v36, %v247_v24  ;;  %v286_v27 = vadd.f32 %v594_v37, %v248_v25 }
  0xac   :  { %364 = vst [vmem:[%s760_s4 + $0xa8] sm:$0xff] %v332_v23  ;;  %v155_v28 = vpop.f32.mrf.mxu2  ;;  %v220_v29 = vpop.f32.mrf.mxu3 }
  0xad   :  { %v317_v30 = vmax.f32 %v285_v26, 0.0  ;;  %v263_v31 = vmul.f32 %v588_v34, %v155_v28  ;;  %v318_v32 = vmax.f32 %v286_v27, 0.0  ;;  %v264_v33 = vmul.f32 %v590_v35, %v220_v29 }
  0xaf   :  { %349 = vst [vmem:[%s760_s4 + $0x30] sm:$0xff] %v317_v30  ;;  %v301_v38 = vadd.f32 %v592_v36, %v263_v31  ;;  %v302_v39 = vadd.f32 %v594_v37, %v264_v33 }
  0xb0   :  { %350 = vst [vmem:[%s760_s4 + $0x38] sm:$0xff] %v318_v32  ;;  %v134_v40 = vpop.f32.mrf.mxu0  ;;  %v199_v41 = vpop.f32.mrf.mxu1 }
  0xb1   :  { %v333_v42 = vmax.f32 %v301_v38, 0.0  ;;  %v334_v43 = vmax.f32 %v302_v39, 0.0  ;;  %v249_v44 = vmul.f32 %v588_v34, %v134_v40  ;;  %v250_v45 = vmul.f32 %v590_v35, %v199_v41 }
  0xb3   :  { %365 = vst [vmem:[%s760_s4 + $0xb0] sm:$0xff] %v333_v42  ;;  %v287_v46 = vadd.f32 %v592_v36, %v249_v44  ;;  %v288_v47 = vadd.f32 %v594_v37, %v250_v45 }
  0xb4   :  { %366 = vst [vmem:[%s760_s4 + $0xb8] sm:$0xff] %v334_v43  ;;  %v158_v48 = vpop.f32.mrf.mxu2  ;;  %v223_v49 = vpop.f32.mrf.mxu3 }
  0xb5   :  { %v319_v50 = vmax.f32 %v287_v46, 0.0  ;;  %v265_v51 = vmul.f32 %v588_v34, %v158_v48  ;;  %v320_v52 = vmax.f32 %v288_v47, 0.0  ;;  %v266_v53 = vmul.f32 %v590_v35, %v223_v49 }
  0xb7   :  { %351 = vst [vmem:[%s760_s4 + $0x40] sm:$0xff] %v319_v50  ;;  %v303_v54 = vadd.f32 %v592_v36, %v265_v51  ;;  %v304_v55 = vadd.f32 %v594_v37, %v266_v53 }
  0xb8   :  { %352 = vst [vmem:[%s760_s4 + $0x48] sm:$0xff] %v320_v52  ;;  %v137_v56 = vpop.f32.mrf.mxu0  ;;  %v202_v57 = vpop.f32.mrf.mxu1 }
  0xb9   :  { %v335_v58 = vmax.f32 %v303_v54, 0.0  ;;  %v336_v59 = vmax.f32 %v304_v55, 0.0  ;;  %v251_v60 = vmul.f32 %v588_v34, %v137_v56  ;;  %v252_v61 = vmul.f32 %v590_v35, %v202_v57 }
  0xbb   :  { %367 = vst [vmem:[%s760_s4 + $0xc0] sm:$0xff] %v335_v58  ;;  %v289_v62 = vadd.f32 %v592_v36, %v251_v60  ;;  %v290_v63 = vadd.f32 %v594_v37, %v252_v61 }
  0xbc   :  { %368 = vst [vmem:[%s760_s4 + $0xc8] sm:$0xff] %v336_v59  ;;  %v161_v0 = vpop.f32.mrf.mxu2  ;;  %v226_v1 = vpop.f32.mrf.mxu3 }
  0xbd   :  { %v321_v2 = vmax.f32 %v289_v62, 0.0  ;;  %v267_v3 = vmul.f32 %v588_v34, %v161_v0  ;;  %v322_v4 = vmax.f32 %v290_v63, 0.0  ;;  %v268_v5 = vmul.f32 %v590_v35, %v226_v1 }
  0xbf   :  { %353 = vst [vmem:[%s760_s4 + $0x50] sm:$0xff] %v321_v2  ;;  %v305_v6 = vadd.f32 %v592_v36, %v267_v3  ;;  %v306_v7 = vadd.f32 %v594_v37, %v268_v5 }
  0xc0   :  { %354 = vst [vmem:[%s760_s4 + $0x58] sm:$0xff] %v322_v4  ;;  %v140_v8 = vpop.f32.mrf.mxu0  ;;  %v205_v9 = vpop.f32.mrf.mxu1 }
  0xc1   :  { %v337_v10 = vmax.f32 %v305_v6, 0.0  ;;  %v338_v11 = vmax.f32 %v306_v7, 0.0  ;;  %v253_v12 = vmul.f32 %v588_v34, %v140_v8  ;;  %v254_v13 = vmul.f32 %v590_v35, %v205_v9 }
  0xc3   :  { %369 = vst [vmem:[%s760_s4 + $0xd0] sm:$0xff] %v337_v10  ;;  %v291_v14 = vadd.f32 %v592_v36, %v253_v12  ;;  %v292_v15 = vadd.f32 %v594_v37, %v254_v13 }
  0xc4   :  { %370 = vst [vmem:[%s760_s4 + $0xd8] sm:$0xff] %v338_v11  ;;  %v164_v16 = vpop.f32.mrf.mxu2  ;;  %v229_v17 = vpop.f32.mrf.mxu3 }
  0xc5   :  { %v323_v18 = vmax.f32 %v291_v14, 0.0  ;;  %v269_v19 = vmul.f32 %v588_v34, %v164_v16  ;;  %v324_v20 = vmax.f32 %v292_v15, 0.0  ;;  %v270_v21 = vmul.f32 %v590_v35, %v229_v17 }
  0xc7   :  { %355 = vst [vmem:[%s760_s4 + $0x60] sm:$0xff] %v323_v18  ;;  %v307_v22 = vadd.f32 %v592_v36, %v269_v19  ;;  %v308_v23 = vadd.f32 %v594_v37, %v270_v21 }
  0xc8   :  { %356 = vst [vmem:[%s760_s4 + $0x68] sm:$0xff] %v324_v20  ;;  %v143_v24 = vpop.f32.mrf.mxu0  ;;  %v208_v25 = vpop.f32.mrf.mxu1 }
  0xc9   :  { %v339_v26 = vmax.f32 %v307_v22, 0.0  ;;  %v340_v27 = vmax.f32 %v308_v23, 0.0  ;;  %v255_v28 = vmul.f32 %v588_v34, %v143_v24  ;;  %v256_v29 = vmul.f32 %v590_v35, %v208_v25 }
  0xcb   :  { %371 = vst [vmem:[%s760_s4 + $0xe0] sm:$0xff] %v339_v26  ;;  %v293_v30 = vadd.f32 %v592_v36, %v255_v28  ;;  %v294_v31 = vadd.f32 %v594_v37, %v256_v29 }
  0xcc   :  { %372 = vst [vmem:[%s760_s4 + $0xe8] sm:$0xff] %v340_v27  ;;  %v167_v32 = vpop.f32.mrf.mxu2  ;;  %v232_v33 = vpop.f32.mrf.mxu3 }
  0xcd   :  { %v325_v38 = vmax.f32 %v293_v30, 0.0  ;;  %v271_v39 = vmul.f32 %v588_v34, %v167_v32  ;;  %v326_v40 = vmax.f32 %v294_v31, 0.0  ;;  %v272_v41 = vmul.f32 %v590_v35, %v232_v33 }
  0xcf   :  { %357 = vst [vmem:[%s760_s4 + $0x70] sm:$0xff] %v325_v38  ;;  %v309_v42 = vadd.f32 %v592_v36, %v271_v39  ;;  %v310_v43 = vadd.f32 %v594_v37, %v272_v41 }
  0xd0   :  { %358 = vst [vmem:[%s760_s4 + $0x78] sm:$0xff] %v326_v40 }
  0xd1   :  { %v341_v44 = vmax.f32 %v309_v42, 0.0  ;;  %v342_v45 = vmax.f32 %v310_v43, 0.0 }
  0xd3   :  { %373 = vst [vmem:[%s760_s4 + $0xf0] sm:$0xff] %v341_v44 }
  0xd4   :  { %374 = vst [vmem:[%s760_s4 + $0xf8] sm:$0xff] %v342_v45 }

// kernel: _lambda_.8
= control target key start
LH: loop header
LB: loop body
LE: loop exit
PB: predicated region body
PF: predicated region fallthrough
CT: control target
= control target key end

     0   :  { %s839_s24 = smov 0   ;;  %s1092_s0 = inlined_call_operand.vmem [shape: f32[2,9,9,60], index: 0, kind: input, shape index: {}]   ;;  %s1093_s1 = inlined_call_operand.vmem [shape: f32[2,9,9,60], index: 1, kind: input, shape index: {}]   ;;  %s1094_s2 = inlined_call_operand.vmem [shape: f32[2,9,9,60], index: 2, kind: input, shape index: {}]   ;;  %s1095_s3 = inlined_call_operand.vmem [shape: f32[2,9,9,60], index: 3, kind: input, shape index: {}]   ;;  %s1096_s4 = inlined_call_operand.vmem [shape: f32[9,1,1,60], index: 4, kind: input, shape index: {}]   ;;  %s1097_s5 = inlined_call_operand.vmem [shape: f32[1,1,1,60], index: 5, kind: input, shape index: {}]   ;;  %s1098_s6 = inlined_call_operand.vmem [shape: f32[1,1,1,60], index: 6, kind: input, shape index: {}]   ;;  %s1099_s7 = inlined_call_operand.vmem [shape: f32[2,8,8,60], index: 7, kind: output, shape index: {}]  }
   0x1 LB: > { %s725_s25 = sadd.s32 4294967295, %s797_s24   ;;  %p729_p0 = scmp.ge.s32.totalorder %s797_s24, 1  ;;  %s797_s24 = sphi %s839_s24, %s17_s24  }
   0x2   : > { %p267_p1 = scmp.lt.s32.totalorder %s797_s24, 3 }
   0x4   : > { %p268_p2 = pnand %p729_p0, %p267_p1 }
   0x5   : > { %p314_p3 = scmp.lt.s32.totalorder (!%p268_p2), %s725_s25, 1 }
   0x6   : > { %271 = sbr.rel (%p268_p2) target bundleno = 68 (0x44), region = 48 }
   0xb   : > { %s1101_s25 = smov (!%p314_p3, %s725_s25), 1  ;;  %v852_v0 = vld [vmem:[%s1096_s4] ss:$0 sm:$0xff]  ;;  %v857_v1 = vld [vmem:[%s1096_s4 + $0x1] ss:$0 sm:$0xff]  ;;  %vm625_vm0 = vcmask 490496  }
   0xc   : > { %v862_v2 = vld [vmem:[%s1096_s4 + $0x2] ss:$0 sm:$0xff]  ;;  %s771_s9 = smul.u32 144, %s1101_s25  ;;  %v868_v3 = vld [vmem:[%s1096_s4 + $0x3] ss:$0 sm:$0xff]  ;;  %s770_s18 = sshll.u32 %s1101_s25, 6 }
   0xd   : > { %v873_v4 = vld [vmem:[%s1096_s4 + $0x4] ss:$0 sm:$0xff]  ;;  %v888_v5 = vld [vmem:[%s1096_s4 + $0x5] ss:$0 sm:$0xff]  ;;  %v893_v6 = vld [vmem:[%s1096_s4 + $0x6] ss:$0 sm:$0xff]  ;;  %s1008_s21 = scalar_lea.vmem %s1099_s7, %s770_s18 }
   0xe   : > { %s878_s16 = scalar_lea.vmem %s1092_s0, %s771_s9  ;;  %s883_s19 = scalar_lea.vmem %s1093_s1, %s771_s9  ;;  %v898_v7 = vld [vmem:[%s1096_s4 + $0x7] ss:$0 sm:$0xff]  ;;  %v916_v11 = vld [vmem:[%s1096_s4 + $0x8] ss:$0 sm:$0xff] }
   0xf   : > { %s903_s30 = scalar_lea.vmem %s1094_s2, %s771_s9  ;;  %s908_s11 = scalar_lea.vmem %s1095_s3, %s771_s9  ;;  %v339_v8 = vld [vmem:[%s878_s16] sm:$0xff]  ;;  %v741_v18 = vld [vmem:[%s878_s16 + $0x10] sm:$0xff] }
  0x10   : > { %v367_v9 = vld [vmem:[%s883_s19] sm:$0xff]  ;;  %v351_v12 = vmul.f32 %v852_v0, %v339_v8  ;;  %v750_v19 = vld [vmem:[%s883_s19 + $0x10] sm:$0xff]  ;;  %v352_v24 = vmul.f32 %v852_v0, %v741_v18  ;;  %v526_v31 = vmul.f32 %v893_v6, %v741_v18 }
  0x11   : > { %v396_v10 = vld [vmem:[%s878_s16 + $0x1] sm:$0xff]  ;;  %v380_v13 = vmul.f32 %v857_v1, %v367_v9  ;;  %v759_v20 = vld [vmem:[%s878_s16 + $0x11] sm:$0xff]  ;;  %v381_v25 = vmul.f32 %v857_v1, %v750_v19  ;;  %v556_v32 = vmul.f32 %v898_v7, %v750_v19 }
  0x12   : > { %v409_v14 = vmul.f32 %v862_v2, %v396_v10  ;;  %v425_v15 = vld [vmem:[%s903_s30] sm:$0xff]  ;;  %v410_v26 = vmul.f32 %v862_v2, %v759_v20  ;;  %v426_v27 = vld [vmem:[%s903_s30 + $0x10] sm:$0xff]  ;;  %v941_v36 = vmul.f32 %v916_v11, %v759_v20 }
  0x13   : > { %v454_v16 = vld [vmem:[%s908_s11] sm:$0xff]  ;;  %v388_v21 = vadd.f32 %v380_v13, %v351_v12  ;;  %v438_v22 = vmul.f32 %v868_v3, %v425_v15  ;;  %v455_v28 = vld [vmem:[%s908_s11 + $0x10] sm:$0xff]  ;;  %v389_v37 = vadd.f32 %v381_v25, %v352_v24  ;;  %v439_v38 = vmul.f32 %v868_v3, %v426_v27 }
  0x14   : > { %v483_v17 = vld [vmem:[%s903_s30 + $0x1] sm:$0xff]  ;;  %v467_v23 = vmul.f32 %v873_v4, %v454_v16  ;;  %v484_v33 = vld [vmem:[%s903_s30 + $0x11] sm:$0xff]  ;;  %v468_v39 = vmul.f32 %v873_v4, %v455_v28 }
  0x15   : > { %v417_v29 = vadd.f32 %v409_v14, %v388_v21  ;;  %v496_v30 = vmul.f32 %v888_v5, %v483_v17  ;;  %v742_v34 = vld [vmem:[%s878_s16 + $0x20] sm:$0xff]  ;;  %v497_v43 = vmul.f32 %v888_v5, %v484_v33  ;;  %v743_v48 = vld [vmem:[%s878_s16 + $0x30] sm:$0xff]  ;;  %v418_v49 = vadd.f32 %v410_v26, %v389_v37 }
  0x16   : > { %v751_v35 = vld [vmem:[%s883_s19 + $0x20] sm:$0xff]  ;;  %v353_v44 = vmul.f32 %v852_v0, %v742_v34  ;;  %v527_v50 = vmul.f32 %v893_v6, %v742_v34  ;;  %v752_v53 = vld [vmem:[%s883_s19 + $0x30] sm:$0xff]  ;;  %v354_v62 = vmul.f32 %v852_v0, %v743_v48  ;;  %v528_v17 = vmul.f32 %v893_v6, %v743_v48 }
  0x17   : > { %v760_v40 = vld [vmem:[%s878_s16 + $0x21] sm:$0xff]  ;;  %v446_v42 = vadd.f32 %v438_v22, %v417_v29  ;;  %v382_v45 = vmul.f32 %v857_v1, %v751_v35  ;;  %v557_v51 = vmul.f32 %v898_v7, %v751_v35  ;;  %v761_v54 = vld [vmem:[%s878_s16 + $0x31] sm:$0xff]  ;;  %v447_v59 = vadd.f32 %v439_v38, %v418_v49 }
  0x18   : > { %v427_v41 = vld [vmem:[%s903_s30 + $0x20] sm:$0xff]  ;;  %v411_v52 = vmul.f32 %v862_v2, %v760_v40  ;;  %v586_v56 = vmul.f32 %v916_v11, %v760_v40  ;;  %v428_v63 = vld [vmem:[%s903_s30 + $0x30] sm:$0xff]  ;;  %v383_v10 = vmul.f32 %v857_v1, %v752_v53  ;;  %v412_v12 = vmul.f32 %v862_v2, %v761_v54 }
  0x19   : > { %v456_v46 = vld [vmem:[%s908_s11 + $0x20] sm:$0xff]  ;;  %v475_v55 = vadd.f32 %v467_v23, %v446_v42  ;;  %v390_v57 = vadd.f32 %v382_v45, %v353_v44  ;;  %v440_v58 = vmul.f32 %v868_v3, %v427_v41  ;;  %v457_v13 = vld [vmem:[%s908_s11 + $0x30] sm:$0xff]  ;;  %v476_v16 = vadd.f32 %v468_v39, %v447_v59 }
  0x1a   : > { %v485_v47 = vld [vmem:[%s903_s30 + $0x21] sm:$0xff]  ;;  %v469_v60 = vmul.f32 %v873_v4, %v456_v46  ;;  %v486_v14 = vld [vmem:[%s903_s30 + $0x31] sm:$0xff]  ;;  %v558_v18 = vmul.f32 %v898_v7, %v752_v53  ;;  %v587_v19 = vmul.f32 %v916_v11, %v761_v54  ;;  %v391_v23 = vadd.f32 %v383_v10, %v354_v62  ;;  %v989_v39 = vld [vmem:[%s1098_s6] ss:$0 sm:$0xff] }
  0x1b   : > { %v498_v61 = vmul.f32 %v888_v5, %v485_v47  ;;  %v504_v8 = vadd.f32 %v496_v30, %v475_v55  ;;  %v419_v9 = vadd.f32 %v411_v52, %v390_v57  ;;  %v744_v15 = vld [vmem:[%s878_s16 + $0x40] sm:$0xff]  ;;  %v441_v24 = vmul.f32 %v868_v3, %v428_v63  ;;  %v745_v48 = vld [vmem:[%s878_s16 + $0x50] sm:$0xff] }
  0x1c   : > { %v753_v20 = vld [vmem:[%s883_s19 + $0x40] sm:$0xff]  ;;  %v505_v27 = vadd.f32 %v497_v43, %v476_v16  ;;  %v470_v28 = vmul.f32 %v873_v4, %v457_v13  ;;  %v499_v29 = vmul.f32 %v888_v5, %v486_v14  ;;  %v355_v30 = vmul.f32 %v852_v0, %v744_v15  ;;  %v754_v49 = vld [vmem:[%s883_s19 + $0x50] sm:$0xff] }
  0x1d   : > { %v534_v21 = vadd.f32 %v526_v31, %v504_v8  ;;  %v448_v22 = vadd.f32 %v440_v58, %v419_v9  ;;  %v762_v25 = vld [vmem:[%s878_s16 + $0x41] sm:$0xff]  ;;  %v982_v31 = vld [vmem:[%s1097_s5] ss:$0 sm:$0xff]  ;;  %v420_v35 = vadd.f32 %v412_v12, %v391_v23  ;;  %v384_v37 = vmul.f32 %v857_v1, %v753_v20  ;;  %v763_v59 = vld [vmem:[%s878_s16 + $0x51] sm:$0xff] }
  0x1e   : > { %v429_v26 = vld [vmem:[%s903_s30 + $0x40] sm:$0xff]  ;;  %v535_v40 = vadd.f32 %v527_v50, %v505_v27  ;;  %v413_v41 = vmul.f32 %v862_v2, %v762_v25  ;;  %v559_v50 = vmul.f32 %v898_v7, %v753_v20  ;;  %v588_v53 = vmul.f32 %v916_v11, %v762_v25  ;;  %v459_v13 = vld [vmem:[%s908_s11 + $0x50] sm:$0xff] }
  0x1f   : > { %v564_v33 = vadd.f32 %v556_v32, %v534_v21  ;;  %v477_v34 = vadd.f32 %v469_v60, %v448_v22  ;;  %v458_v38 = vld [vmem:[%s908_s11 + $0x40] sm:$0xff]  ;;  %v529_v32 = vmul.f32 %v893_v6, %v744_v15  ;;  %v442_v42 = vmul.f32 %v868_v3, %v429_v26  ;;  %v430_v60 = vld [vmem:[%s903_s30 + $0x50] sm:$0xff] }
  0x20   : > { %v449_v45 = vadd.f32 %v441_v24, %v420_v35  ;;  %v392_v46 = vadd.f32 %v384_v37, %v355_v30  ;;  %v487_v47 = vld [vmem:[%s903_s30 + $0x41] sm:$0xff]  ;;  %v565_v52 = vadd.f32 %v557_v51, %v535_v40  ;;  %v471_v54 = vmul.f32 %v873_v4, %v458_v38  ;;  %v488_v22 = vld [vmem:[%s903_s30 + $0x51] sm:$0xff] }
  0x21   : > { %v593_v43 = vadd.f32 %v941_v36, %v564_v33  ;;  %v506_v44 = vadd.f32 %v498_v61, %v477_v34  ;;  %v500_v61 = vmul.f32 %v888_v5, %v487_v47  ;;  %v356_v62 = vmul.f32 %v852_v0, %v745_v48  ;;  %v746_v23 = vld [vmem:[%s878_s16 + $0x60] sm:$0xff] }
  0x22   : > { %v478_v58 = vadd.f32 %v470_v28, %v449_v45  ;;  %v421_v36 = vadd.f32 %v413_v41, %v392_v46  ;;  %v594_v51 = vadd.f32 %v586_v56, %v565_v52  ;;  %v385_v63 = vmul.f32 %v857_v1, %v754_v49  ;;  %v755_v24 = vld [vmem:[%s883_s19 + $0x60] sm:$0xff]  ;;  %v747_v52 = vld [vmem:[%s878_s16 + $0x70] sm:$0xff] }
  0x23   : > { %v605_v55 = vmul.f32 %v982_v31, %v593_v43  ;;  %v536_v57 = vadd.f32 %v528_v17, %v506_v44  ;;  %v414_v56 = vmul.f32 %v862_v2, %v763_v59  ;;  %v443_v16 = vmul.f32 %v868_v3, %v430_v60  ;;  %v431_v35 = vld [vmem:[%s903_s30 + $0x60] sm:$0xff] }
  0x24   : > { %v507_v10 = vadd.f32 %v499_v29, %v478_v58  ;;  %v450_v12 = vadd.f32 %v442_v42, %v421_v36  ;;  %v606_v14 = vmul.f32 %v982_v31, %v594_v51  ;;  %v393_v15 = vadd.f32 %v385_v63, %v356_v62  ;;  %v764_v29 = vld [vmem:[%s878_s16 + $0x61] sm:$0xff]  ;;  %v765_v58 = vld [vmem:[%s878_s16 + $0x71] sm:$0xff] }
  0x25   : > { %v617_v8 = vadd.f32 %v989_v39, %v605_v55  ;;  %v566_v9 = vadd.f32 %v558_v18, %v536_v57  ;;  %v530_v18 = vmul.f32 %v893_v6, %v745_v48  ;;  %v560_v26 = vmul.f32 %v898_v7, %v754_v49  ;;  %v460_v45 = vld [vmem:[%s908_s11 + $0x60] sm:$0xff] }
  0x26   : > { %v537_v20 = vadd.f32 %v529_v32, %v507_v10  ;;  %v479_v21 = vadd.f32 %v471_v54, %v450_v12  ;;  %v618_v25 = vadd.f32 %v989_v39, %v606_v14  ;;  %v422_v27 = vadd.f32 %v414_v56, %v393_v15  ;;  %v489_v57 = vld [vmem:[%s903_s30 + $0x61] sm:$0xff]  ;;  %v461_v15 = vld [vmem:[%s908_s11 + $0x70] sm:$0xff] }
  0x27   : > { %626 = vst.msk [vmem:[%s1008_s21] sm:$0xff] %vm625_vm0, %v617_v8  ;;  %v595_v17 = vadd.f32 %v587_v19, %v566_v9  ;;  %v472_v28 = vmul.f32 %v873_v4, %v459_v13  ;;  %v589_v34 = vmul.f32 %v916_v11, %v763_v59  ;;  %v501_v38 = vmul.f32 %v888_v5, %v488_v22 }
  0x28   : > { %v567_v30 = vadd.f32 %v559_v50, %v537_v20  ;;  %v508_v33 = vadd.f32 %v500_v61, %v479_v21  ;;  %627 = vst.msk [vmem:[%s1008_s21 + $0x8] sm:$0xff] %vm625_vm0, %v618_v25  ;;  %v451_v37 = vadd.f32 %v443_v16, %v422_v27  ;;  %v357_v40 = vmul.f32 %v852_v0, %v746_v23  ;;  %v756_v50 = vld [vmem:[%s883_s19 + $0x70] sm:$0xff] }
  0x29   : > { %v607_v19 = vmul.f32 %v982_v31, %v595_v17  ;;  %v386_v32 = vmul.f32 %v857_v1, %v755_v24  ;;  %v415_v44 = vmul.f32 %v862_v2, %v764_v29  ;;  %v531_v47 = vmul.f32 %v893_v6, %v746_v23  ;;  %v432_v61 = vld [vmem:[%s903_s30 + $0x70] sm:$0xff] }
  0x2a   : > { %v596_v42 = vadd.f32 %v588_v53, %v567_v30  ;;  %v538_v43 = vadd.f32 %v530_v18, %v508_v33  ;;  %v480_v46 = vadd.f32 %v472_v28, %v451_v37  ;;  %v444_v49 = vmul.f32 %v868_v3, %v431_v35  ;;  %v490_v21 = vld [vmem:[%s903_s30 + $0x71] sm:$0xff]  ;;  %v757_v30 = vld [vmem:[%s883_s19 + $0x80] sm:$0xff] }
  0x2b   : > { %v619_v41 = vadd.f32 %v989_v39, %v607_v19  ;;  %v394_v48 = vadd.f32 %v386_v32, %v357_v40  ;;  %v561_v53 = vmul.f32 %v898_v7, %v755_v24  ;;  %v590_v59 = vmul.f32 %v916_v11, %v764_v29  ;;  %v766_v37 = vld [vmem:[%s878_s16 + $0x81] sm:$0xff] }
  0x2c   : > { %v608_v54 = vmul.f32 %v982_v31, %v596_v42  ;;  %v568_v55 = vadd.f32 %v560_v26, %v538_v43  ;;  %v509_v36 = vadd.f32 %v501_v38, %v480_v46  ;;  %v473_v51 = vmul.f32 %v873_v4, %v460_v45  ;;  %v748_v26 = vld [vmem:[%s878_s16 + $0x80] sm:$0xff] }
  0x2d   : > { %628 = vst.msk [vmem:[%s1008_s21 + $0x10] sm:$0xff] %vm625_vm0, %v619_v41  ;;  %v423_v60 = vadd.f32 %v415_v44, %v394_v48  ;;  %v358_v8 = vmul.f32 %v852_v0, %v747_v52  ;;  %v387_v9 = vmul.f32 %v857_v1, %v756_v50  ;;  %v502_v13 = vmul.f32 %v888_v5, %v489_v57 }
  0x2e   : > { %v620_v62 = vadd.f32 %v989_v39, %v608_v54  ;;  %v597_v63 = vadd.f32 %v589_v34, %v568_v55  ;;  %v539_v10 = vadd.f32 %v531_v47, %v509_v36  ;;  %v416_v14 = vmul.f32 %v862_v2, %v765_v58 }
  0x2f   : > { %v452_v12 = vadd.f32 %v444_v49, %v423_v60  ;;  %v395_v16 = vadd.f32 %v387_v9, %v358_v8  ;;  %v445_v17 = vmul.f32 %v868_v3, %v432_v61  ;;  %v532_v1 = vmul.f32 %v893_v6, %v747_v52 }
  0x30   : > { %629 = vst.msk [vmem:[%s1008_s21 + $0x18] sm:$0xff] %vm625_vm0, %v620_v62  ;;  %v609_v56 = vmul.f32 %v982_v31, %v597_v63  ;;  %v569_v20 = vadd.f32 %v561_v53, %v539_v10  ;;  %v474_v2 = vmul.f32 %v873_v4, %v461_v15  ;;  %v562_v25 = vmul.f32 %v898_v7, %v756_v50 }
  0x31   : > { %v481_v0 = vadd.f32 %v473_v51, %v452_v12  ;;  %v424_v22 = vadd.f32 %v416_v14, %v395_v16  ;;  %v503_v27 = vmul.f32 %v888_v5, %v490_v21  ;;  %v591_v19 = vmul.f32 %v916_v11, %v765_v58 }
  0x32   : > { %v621_v18 = vadd.f32 %v989_v39, %v609_v56  ;;  %v598_v23 = vadd.f32 %v590_v59, %v569_v20  ;;  %v533_v33 = vmul.f32 %v893_v6, %v748_v26  ;;  %v563_v40 = vmul.f32 %v898_v7, %v757_v30 }
  0x33   : > { %v510_v24 = vadd.f32 %v502_v13, %v481_v0  ;;  %v453_v3 = vadd.f32 %v445_v17, %v424_v22  ;;  %v592_v41 = vmul.f32 %v916_v11, %v766_v37 }
  0x34   : > { %630 = vst.msk [vmem:[%s1008_s21 + $0x20] sm:$0xff] %vm625_vm0, %v621_v18  ;;  %v610_v28 = vmul.f32 %v982_v31, %v598_v23 }
  0x35   : > { %v540_v29 = vadd.f32 %v532_v1, %v510_v24  ;;  %v482_v4 = vadd.f32 %v474_v2, %v453_v3 }
  0x36   : > { %v622_v34 = vadd.f32 %v989_v39, %v610_v28 }
  0x37   : > { %v570_v35 = vadd.f32 %v562_v25, %v540_v29  ;;  %v511_v38 = vadd.f32 %v503_v27, %v482_v4 }
  0x38   : > { %631 = vst.msk [vmem:[%s1008_s21 + $0x28] sm:$0xff] %vm625_vm0, %v622_v34 }
  0x39   : > { %v599_v5 = vadd.f32 %v591_v19, %v570_v35  ;;  %v541_v32 = vadd.f32 %v533_v33, %v511_v38 }
  0x3b   : > { %v611_v42 = vmul.f32 %v982_v31, %v599_v5  ;;  %v571_v43 = vadd.f32 %v563_v40, %v541_v32 }
  0x3d   : > { %v623_v44 = vadd.f32 %v989_v39, %v611_v42  ;;  %v600_v6 = vadd.f32 %v592_v41, %v571_v43 }
  0x3f   : > { %632 = vst.msk [vmem:[%s1008_s21 + $0x30] sm:$0xff] %vm625_vm0, %v623_v44  ;;  %v612_v45 = vmul.f32 %v982_v31, %v600_v6 }
  0x41   : > { %v624_v46 = vadd.f32 %v989_v39, %v612_v45 }
  0x43   : > { %633 = vst.msk [vmem:[%s1008_s21 + $0x38] sm:$0xff] %vm625_vm0, %v624_v46 }
  0x44 PF: > { %s17_s24 = sadd.s32 1, %s797_s24  }
  0x45   : > { %p14_p4 = scmp.ge.s32.totalorder %s17_s24, 4  }
  0x47   :  { %16 = sbr.rel (!%p14_p4) target bundleno = 1 (0x1), region = 97 }

// kernel: _lambda_.11
= control target key start
LH: loop header
LB: loop body
LE: loop exit
PB: predicated region body
PF: predicated region fallthrough
CT: control target
= control target key end

     0   :  { %vm79_vm0 = vcmask 916480   ;;  %s705_s1 = inlined_call_operand.vmem [shape: f32[240,128], index: 1, kind: input, shape index: {}]   ;;  %s706_s0 = inlined_call_operand.vmem [shape: f32[128,240], index: 0, kind: input, shape index: {}]   ;;  %s707_s2 = inlined_call_operand.vmem [shape: f32[1,128], index: 2, kind: input, shape index: {}]   ;;  %s708_s3 = inlined_call_operand.vmem [shape: f32[1,128], index: 3, kind: input, shape index: {}]   ;;  %s709_s4 = inlined_call_operand.vmem [shape: f32[128,128], index: 4, kind: output, shape index: {}]  }
   0x1   :  { %v64_v0 = vld [vmem:[%s705_s1 + $0x78] sm:$0xff]  ;;  %v78_v1 = vld [vmem:[%s705_s1 + $0xe8] sm:$0xff]  ;;  %v63_v2 = vld [vmem:[%s705_s1 + $0x70] sm:$0xff] }
   0x2   :  { %350 = vmatpush.msra.mxu2 %v64_v0  ;;  %195 = vmatpush.msra.mxu1 %v78_v1  ;;  %v77_v3 = vld [vmem:[%s705_s1 + $0xe0] sm:$0xff]  ;;  %v62_v4 = vld [vmem:[%s705_s1 + $0x68] sm:$0xff]  ;;  %v76_v5 = vld [vmem:[%s705_s1 + $0xd8] sm:$0xff] }
   0x3   :  { %128 = vmatpush.msra.mxu0 %v64_v0  ;;  %366 = vmatpush.msra.mxu3 %v78_v1  ;;  %v61_v6 = vld [vmem:[%s705_s1 + $0x60] sm:$0xff]  ;;  %v75_v7 = vld [vmem:[%s705_s1 + $0xd0] sm:$0xff]  ;;  %v60_v8 = vld [vmem:[%s705_s1 + $0x58] sm:$0xff] }
   0x4   :  { %351 = vmatpush.msra.mxu2 %v63_v2  ;;  %196 = vmatpush.msra.mxu1 %v77_v3  ;;  %v74_v9 = vld [vmem:[%s705_s1 + $0xc8] sm:$0xff]  ;;  %v59_v10 = vld [vmem:[%s705_s1 + $0x50] sm:$0xff]  ;;  %v73_v11 = vld [vmem:[%s705_s1 + $0xc0] sm:$0xff] }
   0x5   :  { %129 = vmatpush.msra.mxu0 %v63_v2  ;;  %367 = vmatpush.msra.mxu3 %v77_v3  ;;  %v58_v12 = vld [vmem:[%s705_s1 + $0x48] sm:$0xff]  ;;  %v72_v13 = vld [vmem:[%s705_s1 + $0xb8] sm:$0xff]  ;;  %v57_v14 = vld [vmem:[%s705_s1 + $0x40] sm:$0xff] }
   0x6   :  { %352 = vmatpush.msra.mxu2 %v62_v4  ;;  %197 = vmatpush.msra.mxu1 %v76_v5  ;;  %v71_v15 = vld [vmem:[%s705_s1 + $0xb0] sm:$0xff]  ;;  %v56_v16 = vld [vmem:[%s705_s1 + $0x38] sm:$0xff]  ;;  %v70_v17 = vld [vmem:[%s705_s1 + $0xa8] sm:$0xff] }
   0x7   :  { %130 = vmatpush.msra.mxu0 %v62_v4  ;;  %368 = vmatpush.msra.mxu3 %v76_v5  ;;  %v55_v18 = vld [vmem:[%s705_s1 + $0x30] sm:$0xff]  ;;  %v69_v19 = vld [vmem:[%s705_s1 + $0xa0] sm:$0xff]  ;;  %v54_v20 = vld [vmem:[%s705_s1 + $0x28] sm:$0xff] }
   0x8   :  { %353 = vmatpush.msra.mxu2 %v61_v6  ;;  %198 = vmatpush.msra.mxu1 %v75_v7  ;;  %v68_v21 = vld [vmem:[%s705_s1 + $0x98] sm:$0xff]  ;;  %v53_v22 = vld [vmem:[%s705_s1 + $0x20] sm:$0xff]  ;;  %v67_v23 = vld [vmem:[%s705_s1 + $0x90] sm:$0xff] }
   0x9   :  { %131 = vmatpush.msra.mxu0 %v61_v6  ;;  %369 = vmatpush.msra.mxu3 %v75_v7  ;;  %v52_v24 = vld [vmem:[%s705_s1 + $0x18] sm:$0xff]  ;;  %v66_v25 = vld [vmem:[%s705_s1 + $0x88] sm:$0xff]  ;;  %v51_v26 = vld [vmem:[%s705_s1 + $0x10] sm:$0xff] }
   0xa   :  { %354 = vmatpush.msra.mxu2 %v60_v8  ;;  %199 = vmatpush.msra.mxu1 %v74_v9  ;;  %v65_v27 = vld [vmem:[%s705_s1 + $0x80] sm:$0xff]  ;;  %v18_v28 = vld [vmem:[%s706_s0 + $0x8] sm:$0xff]  ;;  %v36_v30 = vld [vmem:[%s706_s0 + $0x98] sm:$0xff] }
   0xb   :  { %132 = vmatpush.msra.mxu0 %v60_v8  ;;  %370 = vmatpush.msra.mxu3 %v74_v9  ;;  %v50_v29 = vld [vmem:[%s705_s1 + $0x8] sm:$0xff]  ;;  %v49_v31 = vld [vmem:[%s705_s1] sm:$0xff]  ;;  %v31_v32 = vld [vmem:[%s706_s0 + $0x70] sm:$0xff] }
   0xc   :  { %355 = vmatpush.msra.mxu2 %v59_v10  ;;  %200 = vmatpush.msra.mxu1 %v73_v11  ;;  %v17_v33 = vld [vmem:[%s706_s0] sm:$0xff]  ;;  %v20_v34 = vld [vmem:[%s706_s0 + $0x18] sm:$0xff]  ;;  %v38_v35 = vld [vmem:[%s706_s0 + $0xa8] sm:$0xff] }
   0xd   :  { %133 = vmatpush.msra.mxu0 %v59_v10  ;;  %371 = vmatpush.msra.mxu3 %v73_v11  ;;  %v33_v36 = vld [vmem:[%s706_s0 + $0x80] sm:$0xff]  ;;  %v19_v37 = vld [vmem:[%s706_s0 + $0x10] sm:$0xff]  ;;  %v22_v38 = vld [vmem:[%s706_s0 + $0x28] sm:$0xff] }
   0xe   :  { %356 = vmatpush.msra.mxu2 %v58_v12  ;;  %201 = vmatpush.msra.mxu1 %v72_v13  ;;  %v40_v39 = vld [vmem:[%s706_s0 + $0xb8] sm:$0xff]  ;;  %v35_v40 = vld [vmem:[%s706_s0 + $0x90] sm:$0xff]  ;;  %v21_v41 = vld [vmem:[%s706_s0 + $0x20] sm:$0xff] }
   0xf   :  { %134 = vmatpush.msra.mxu0 %v58_v12  ;;  %372 = vmatpush.msra.mxu3 %v72_v13  ;;  %v24_v42 = vld [vmem:[%s706_s0 + $0x38] sm:$0xff]  ;;  %v42_v43 = vld [vmem:[%s706_s0 + $0xc8] sm:$0xff]  ;;  %v37_v44 = vld [vmem:[%s706_s0 + $0xa0] sm:$0xff] }
  0x10   :  { %357 = vmatpush.msra.mxu2 %v57_v14  ;;  %202 = vmatpush.msra.mxu1 %v71_v15  ;;  %v23_v45 = vld [vmem:[%s706_s0 + $0x30] sm:$0xff]  ;;  %v26_v46 = vld [vmem:[%s706_s0 + $0x48] sm:$0xff]  ;;  %v44_v47 = vld [vmem:[%s706_s0 + $0xd8] sm:$0xff] }
  0x11   :  { %135 = vmatpush.msra.mxu0 %v57_v14  ;;  %373 = vmatpush.msra.mxu3 %v71_v15  ;;  %v39_v48 = vld [vmem:[%s706_s0 + $0xb0] sm:$0xff]  ;;  %v25_v49 = vld [vmem:[%s706_s0 + $0x40] sm:$0xff]  ;;  %v28_v50 = vld [vmem:[%s706_s0 + $0x58] sm:$0xff] }
  0x12   :  { %358 = vmatpush.msra.mxu2 %v56_v16  ;;  %203 = vmatpush.msra.mxu1 %v70_v17  ;;  %v46_v51 = vld [vmem:[%s706_s0 + $0xe8] sm:$0xff]  ;;  %v41_v52 = vld [vmem:[%s706_s0 + $0xc0] sm:$0xff]  ;;  %v27_v53 = vld [vmem:[%s706_s0 + $0x50] sm:$0xff] }
  0x13   :  { %136 = vmatpush.msra.mxu0 %v56_v16  ;;  %374 = vmatpush.msra.mxu3 %v70_v17  ;;  %v30_v54 = vld [vmem:[%s706_s0 + $0x68] sm:$0xff]  ;;  %v48_v55 = vld [vmem:[%s706_s0 + $0xf8] sm:$0xff]  ;;  %v43_v56 = vld [vmem:[%s706_s0 + $0xd0] sm:$0xff] }
  0x14   :  { %359 = vmatpush.msra.mxu2 %v55_v18  ;;  %204 = vmatpush.msra.mxu1 %v69_v19  ;;  %v29_v57 = vld [vmem:[%s706_s0 + $0x60] sm:$0xff]  ;;  %v32_v58 = vld [vmem:[%s706_s0 + $0x78] sm:$0xff]  ;;  %v34_v60 = vld [vmem:[%s706_s0 + $0x88] sm:$0xff] }
  0x15   :  { %137 = vmatpush.msra.mxu0 %v55_v18  ;;  %375 = vmatpush.msra.mxu3 %v69_v19  ;;  %v45_v59 = vld [vmem:[%s706_s0 + $0xe0] sm:$0xff]  ;;  %v47_v61 = vld [vmem:[%s706_s0 + $0xf0] sm:$0xff] }
  0x16   :  { %360 = vmatpush.msra.mxu2 %v54_v20  ;;  %205 = vmatpush.msra.mxu1 %v68_v21  ;;  %v612_v63 = vld [vmem:[%s707_s2] ss:$0 sm:$0xff] }
  0x17   :  { %138 = vmatpush.msra.mxu0 %v54_v20  ;;  %376 = vmatpush.msra.mxu3 %v68_v21  ;;  %v617_v2 = vld [vmem:[%s708_s3] ss:$0 sm:$0xff] }
  0x18   :  { %361 = vmatpush.msra.mxu2 %v53_v22  ;;  %206 = vmatpush.msra.mxu1 %v67_v23 }
  0x19   :  { %139 = vmatpush.msra.mxu0 %v53_v22  ;;  %377 = vmatpush.msra.mxu3 %v67_v23 }
  0x1a   :  { %362 = vmatpush.msra.mxu2 %v52_v24  ;;  %207 = vmatpush.msra.mxu1 %v66_v25 }
  0x1b   :  { %140 = vmatpush.msra.mxu0 %v52_v24  ;;  %378 = vmatpush.msra.mxu3 %v66_v25 }
  0x1c   :  { %363 = vmatpush.msra.mxu2 %v51_v26  ;;  %208 = vmatpush.msra.mxu1 %v65_v27 }
  0x1d   :  { %334 = vmatmul.msk.f32.vlgmr.msra.gmra.mxu1 %vm79_vm0, %v18_v28  ;;  %141 = vmatpush.msra.mxu0 %v51_v26 }
  0x1e   :  { %364 = vmatpush.msra.mxu2 %v50_v29  ;;  %379 = vmatpush.msra.mxu3 %v65_v27 }
  0x1f   :  { %142 = vmatpush.msra.mxu0 %v50_v29  ;;  %343 = vmatmul.msk.f32.vlgmr.msra.gmra.mxu3 %vm79_vm0, %v36_v30 }
  0x20   :  { %365 = vmatpush.msra.mxu2 %v49_v31 }
  0x21   :  { %165 = vmatmul.f32.vlgmr.msra.gmra.mxu2 %v31_v32  ;;  %143 = vmatpush.msra.mxu0 %v49_v31 }
  0x22   :  { %144 = vmatmul.f32.vlgmr.msra.gmra.mxu0 %v17_v33 }
  0x25   :  { %335 = vmatmul.msk.f32.gmra.mxu1 %vm79_vm0, %v20_v34 }
  0x27   :  { %344 = vmatmul.msk.f32.gmra.mxu3 %vm79_vm0, %v38_v35 }
  0x29   :  { %168 = vmatmul.f32.gmra.mxu2 %v33_v36 }
  0x2a   :  { %147 = vmatmul.f32.gmra.mxu0 %v19_v37 }
  0x2d   :  { %336 = vmatmul.msk.f32.gmra.mxu1 %vm79_vm0, %v22_v38 }
  0x2f   :  { %345 = vmatmul.msk.f32.gmra.mxu3 %vm79_vm0, %v40_v39 }
  0x31   :  { %171 = vmatmul.f32.gmra.mxu2 %v35_v40 }
  0x32   :  { %150 = vmatmul.f32.gmra.mxu0 %v21_v41 }
  0x35   :  { %337 = vmatmul.msk.f32.gmra.mxu1 %vm79_vm0, %v24_v42 }
  0x37   :  { %346 = vmatmul.msk.f32.gmra.mxu3 %vm79_vm0, %v42_v43 }
  0x39   :  { %174 = vmatmul.f32.gmra.mxu2 %v37_v44 }
  0x3a   :  { %153 = vmatmul.f32.gmra.mxu0 %v23_v45 }
  0x3d   :  { %338 = vmatmul.msk.f32.gmra.mxu1 %vm79_vm0, %v26_v46 }
  0x3f   :  { %347 = vmatmul.msk.f32.gmra.mxu3 %vm79_vm0, %v44_v47 }
  0x41   :  { %177 = vmatmul.f32.gmra.mxu2 %v39_v48 }
  0x42   :  { %156 = vmatmul.f32.gmra.mxu0 %v25_v49 }
  0x45   :  { %339 = vmatmul.msk.f32.gmra.mxu1 %vm79_vm0, %v28_v50 }
  0x47   :  { %348 = vmatmul.msk.f32.gmra.mxu3 %vm79_vm0, %v46_v51 }
  0x49   :  { %180 = vmatmul.f32.gmra.mxu2 %v41_v52 }
  0x4a   :  { %159 = vmatmul.f32.gmra.mxu0 %v27_v53 }
  0x4d   :  { %340 = vmatmul.msk.f32.gmra.mxu1 %vm79_vm0, %v30_v54 }
  0x4f   :  { %349 = vmatmul.msk.f32.gmra.mxu3 %vm79_vm0, %v48_v55 }
  0x51   :  { %183 = vmatmul.f32.gmra.mxu2 %v43_v56 }
  0x52   :  { %162 = vmatmul.f32.gmra.mxu0 %v29_v57 }
  0x55   :  { %341 = vmatmul.msk.f32.gmra.mxu1 %vm79_vm0, %v32_v58 }
  0x59   :  { %186 = vmatmul.f32.gmra.mxu2 %v45_v59 }
  0x5d   :  { %342 = vmatmul.msk.f32.gmra.mxu1 %vm79_vm0, %v34_v60 }
  0x61   :  { %189 = vmatmul.f32.gmra.mxu2 %v47_v61 }
  0x9a   :  { %v210_v62 = vpop.f32.mrf.mxu1 }
  0x9f   :  { %v145_v0 = vpop.f32.mrf.mxu0 }
  0xa0   :  { %v211_v1 = vadd.f32 %v210_v62, %v145_v0 }
  0xa2   :  { %v213_v3 = vpop.f32.mrf.mxu1  ;;  %v262_v4 = vmul.f32 %v612_v63, %v211_v1  ;;  %v237_v8 = vpop.f32.mrf.mxu3 }
  0xa4   :  { %v282_v5 = vadd.f32 %v617_v2, %v262_v4  ;;  %v621_v6 = vpop.f32.mrf.mxu2 }
  0xa6   :  { %v298_v7 = vmax.f32 %v282_v5, 0.0 }
  0xa7   :  { %v148_v9 = vpop.f32.mrf.mxu0 }
  0xa8   :  { %314 = vst [vmem:[%s709_s4] sm:$0xff] %v298_v7  ;;  %v214_v10 = vadd.f32 %v213_v3, %v148_v9 }
  0xaa   :  { %v216_v11 = vpop.f32.mrf.mxu1  ;;  %v263_v12 = vmul.f32 %v612_v63, %v214_v10  ;;  %v240_v18 = vpop.f32.mrf.mxu3 }
  0xac   :  { %v283_v13 = vadd.f32 %v617_v2, %v263_v12  ;;  %v628_v14 = vpop.f32.mrf.mxu2 }
  0xae   :  { %v299_v15 = vmax.f32 %v283_v13, 0.0 }
  0xaf   :  { %v151_v16 = vpop.f32.mrf.mxu0 }
  0xb0   :  { %315 = vst [vmem:[%s709_s4 + $0x8] sm:$0xff] %v299_v15  ;;  %v217_v17 = vadd.f32 %v216_v11, %v151_v16 }
  0xb2   :  { %v219_v19 = vpop.f32.mrf.mxu1  ;;  %v264_v20 = vmul.f32 %v612_v63, %v217_v17  ;;  %v243_v31 = vpop.f32.mrf.mxu3 }
  0xb4   :  { %v284_v21 = vadd.f32 %v617_v2, %v264_v20  ;;  %v172_v22 = vpop.f32.mrf.mxu2 }
  0xb5   :  { %v238_v23 = vadd.f32 %v237_v8, %v172_v22 }
  0xb6   :  { %v300_v24 = vmax.f32 %v284_v21, 0.0 }
  0xb7   :  { %v271_v25 = vmul.f32 %v612_v63, %v238_v23  ;;  %v154_v26 = vpop.f32.mrf.mxu0 }
  0xb8   :  { %316 = vst [vmem:[%s709_s4 + $0x10] sm:$0xff] %v300_v24  ;;  %v220_v27 = vadd.f32 %v219_v19, %v154_v26 }
  0xb9   :  { %v291_v28 = vadd.f32 %v617_v2, %v271_v25 }
  0xba   :  { %v222_v29 = vpop.f32.mrf.mxu1  ;;  %v265_v30 = vmul.f32 %v612_v63, %v220_v27  ;;  %v246_v46 = vpop.f32.mrf.mxu3 }
  0xbb   :  { %v307_v32 = vmax.f32 %v291_v28, 0.0 }
  0xbc   :  { %v285_v33 = vadd.f32 %v617_v2, %v265_v30  ;;  %v175_v34 = vpop.f32.mrf.mxu2 }
  0xbd   :  { %323 = vst [vmem:[%s709_s4 + $0x48] sm:$0xff] %v307_v32  ;;  %v241_v35 = vadd.f32 %v240_v18, %v175_v34 }
  0xbe   :  { %v301_v36 = vmax.f32 %v285_v33, 0.0 }
  0xbf   :  { %v272_v37 = vmul.f32 %v612_v63, %v241_v35  ;;  %v157_v38 = vpop.f32.mrf.mxu0 }
  0xc0   :  { %317 = vst [vmem:[%s709_s4 + $0x18] sm:$0xff] %v301_v36  ;;  %v223_v39 = vadd.f32 %v222_v29, %v157_v38 }
  0xc1   :  { %v292_v40 = vadd.f32 %v617_v2, %v272_v37 }
  0xc2   :  { %v225_v41 = vpop.f32.mrf.mxu1  ;;  %v266_v42 = vmul.f32 %v612_v63, %v223_v39  ;;  %v249_v60 = vpop.f32.mrf.mxu3 }
  0xc3   :  { %v308_v43 = vmax.f32 %v292_v40, 0.0 }
  0xc4   :  { %v286_v44 = vadd.f32 %v617_v2, %v266_v42  ;;  %v178_v45 = vpop.f32.mrf.mxu2 }
  0xc5   :  { %324 = vst [vmem:[%s709_s4 + $0x50] sm:$0xff] %v308_v43  ;;  %v244_v47 = vadd.f32 %v243_v31, %v178_v45 }
  0xc6   :  { %v302_v48 = vmax.f32 %v286_v44, 0.0 }
  0xc7   :  { %v273_v49 = vmul.f32 %v612_v63, %v244_v47  ;;  %v160_v50 = vpop.f32.mrf.mxu0 }
  0xc8   :  { %318 = vst [vmem:[%s709_s4 + $0x20] sm:$0xff] %v302_v48  ;;  %v226_v51 = vadd.f32 %v225_v41, %v160_v50 }
  0xc9   :  { %v293_v52 = vadd.f32 %v617_v2, %v273_v49 }
  0xca   :  { %v228_v53 = vpop.f32.mrf.mxu1  ;;  %v267_v54 = vmul.f32 %v612_v63, %v226_v51 }
  0xcb   :  { %v309_v55 = vmax.f32 %v293_v52, 0.0 }
  0xcc   :  { %v287_v56 = vadd.f32 %v617_v2, %v267_v54  ;;  %v181_v57 = vpop.f32.mrf.mxu2 }
  0xcd   :  { %325 = vst [vmem:[%s709_s4 + $0x58] sm:$0xff] %v309_v55  ;;  %v247_v58 = vadd.f32 %v246_v46, %v181_v57 }
  0xce   :  { %v303_v59 = vmax.f32 %v287_v56, 0.0 }
  0xcf   :  { %v274_v61 = vmul.f32 %v612_v63, %v247_v58  ;;  %v163_v62 = vpop.f32.mrf.mxu0 }
  0xd0   :  { %319 = vst [vmem:[%s709_s4 + $0x28] sm:$0xff] %v303_v59  ;;  %v229_v0 = vadd.f32 %v228_v53, %v163_v62 }
  0xd1   :  { %v294_v1 = vadd.f32 %v617_v2, %v274_v61 }
  0xd2   :  { %v231_v3 = vpop.f32.mrf.mxu1  ;;  %v268_v4 = vmul.f32 %v612_v63, %v229_v0 }
  0xd3   :  { %v310_v5 = vmax.f32 %v294_v1, 0.0  ;;  %v232_v7 = vadd.f32 %v231_v3, %v621_v6  ;;  %v252_v6 = vpop.f32.mrf.mxu3 }
  0xd4   :  { %v288_v8 = vadd.f32 %v617_v2, %v268_v4  ;;  %v184_v9 = vpop.f32.mrf.mxu2 }
  0xd5   :  { %326 = vst [vmem:[%s709_s4 + $0x60] sm:$0xff] %v310_v5  ;;  %v269_v10 = vmul.f32 %v612_v63, %v232_v7  ;;  %v250_v11 = vadd.f32 %v249_v60, %v184_v9 }
  0xd6   :  { %v304_v12 = vmax.f32 %v288_v8, 0.0 }
  0xd7   :  { %v289_v13 = vadd.f32 %v617_v2, %v269_v10  ;;  %v275_v15 = vmul.f32 %v612_v63, %v250_v11 }
  0xd8   :  { %320 = vst [vmem:[%s709_s4 + $0x30] sm:$0xff] %v304_v12 }
  0xd9   :  { %v305_v16 = vmax.f32 %v289_v13, 0.0  ;;  %v295_v17 = vadd.f32 %v617_v2, %v275_v15 }
  0xda   :  { %v234_v18 = vpop.f32.mrf.mxu1 }
  0xdb   :  { %321 = vst [vmem:[%s709_s4 + $0x38] sm:$0xff] %v305_v16  ;;  %v311_v19 = vmax.f32 %v295_v17, 0.0  ;;  %v235_v20 = vadd.f32 %v234_v18, %v628_v14  ;;  %v255_v28 = vpop.f32.mrf.mxu3 }
  0xdc   :  { %v187_v21 = vpop.f32.mrf.mxu2 }
  0xdd   :  { %327 = vst [vmem:[%s709_s4 + $0x68] sm:$0xff] %v311_v19  ;;  %v270_v22 = vmul.f32 %v612_v63, %v235_v20  ;;  %v253_v23 = vadd.f32 %v252_v6, %v187_v21 }
  0xdf   :  { %v290_v24 = vadd.f32 %v617_v2, %v270_v22  ;;  %v276_v25 = vmul.f32 %v612_v63, %v253_v23 }
  0xe1   :  { %v306_v26 = vmax.f32 %v290_v24, 0.0  ;;  %v296_v27 = vadd.f32 %v617_v2, %v276_v25 }
  0xe3   :  { %322 = vst [vmem:[%s709_s4 + $0x40] sm:$0xff] %v306_v26  ;;  %v312_v14 = vmax.f32 %v296_v27, 0.0 }
  0xe4   :  { %v190_v29 = vpop.f32.mrf.mxu2 }
  0xe5   :  { %328 = vst [vmem:[%s709_s4 + $0x70] sm:$0xff] %v312_v14  ;;  %v256_v30 = vadd.f32 %v255_v28, %v190_v29 }
  0xe7   :  { %v277_v31 = vmul.f32 %v612_v63, %v256_v30 }
  0xe9   :  { %v297_v32 = vadd.f32 %v617_v2, %v277_v31 }
  0xeb   :  { %v313_v33 = vmax.f32 %v297_v32, 0.0 }
  0xed   :  { %329 = vst [vmem:[%s709_s4 + $0x78] sm:$0xff] %v313_v33 }

// kernel: _lambda_.12
= control target key start
LH: loop header
LB: loop body
LE: loop exit
PB: predicated region body
PF: predicated region fallthrough
CT: control target
= control target key end

     0   :  { %s668_s15 = smov 0   ;;  %s885_s0 = inlined_call_operand.vmem [shape: f32[2,10,10,60], index: 0, kind: input, shape index: {}]   ;;  %s886_s1 = inlined_call_operand.vmem [shape: f32[9,1,1,60], index: 1, kind: input, shape index: {}]   ;;  %s887_s2 = inlined_call_operand.vmem [shape: f32[1,1,1,60], index: 2, kind: input, shape index: {}]   ;;  %s888_s3 = inlined_call_operand.vmem [shape: f32[1,1,1,60], index: 3, kind: input, shape index: {}]   ;;  %s889_s4 = inlined_call_operand.vmem [shape: f32[2,8,8,60], index: 4, kind: output, shape index: {}]  }
   0x1 LB: > { %s548_s16 = sadd.s32 4294967295, %s641_s15   ;;  %p552_p0 = scmp.ge.s32.totalorder %s641_s15, 1  ;;  %s641_s15 = sphi %s668_s15, %s14_s15  }
   0x2   : > { %p162_p1 = scmp.lt.s32.totalorder %s641_s15, 3 }
   0x4   : > { %p163_p2 = pnand %p552_p0, %p162_p1 }
   0x5   : > { %p188_p3 = scmp.lt.s32.totalorder (!%p163_p2), %s548_s16, 1 }
   0x6   : > { %166 = sbr.rel (%p163_p2) target bundleno = 68 (0x44), region = 36 }
   0xb   : > { %s891_s16 = smov (!%p188_p3, %s548_s16), 1  ;;  %v681_v0 = vld [vmem:[%s886_s1] ss:$0 sm:$0xff]  ;;  %v686_v1 = vld [vmem:[%s886_s1 + $0x1] ss:$0 sm:$0xff]  ;;  %vm484_vm0 = vcmask 490496  }
   0xc   : > { %v691_v2 = vld [vmem:[%s886_s1 + $0x2] ss:$0 sm:$0xff]  ;;  %v696_v3 = vld [vmem:[%s886_s1 + $0x3] ss:$0 sm:$0xff]  ;;  %s615_s25 = smul.u32 160, %s891_s16  ;;  %s614_s17 = sshll.u32 %s891_s16, 6 }
   0xd   : > { %v702_v4 = vld [vmem:[%s886_s1 + $0x4] ss:$0 sm:$0xff]  ;;  %v707_v5 = vld [vmem:[%s886_s1 + $0x5] ss:$0 sm:$0xff]  ;;  %v712_v6 = vld [vmem:[%s886_s1 + $0x6] ss:$0 sm:$0xff]  ;;  %s811_s21 = scalar_lea.vmem %s889_s4, %s614_s17 }
   0xe   : > { %s717_s8 = scalar_lea.vmem %s885_s0, %s615_s25  ;;  %v722_v7 = vld [vmem:[%s886_s1 + $0x7] ss:$0 sm:$0xff]  ;;  %v727_v8 = vld [vmem:[%s886_s1 + $0x8] ss:$0 sm:$0xff] }
   0xf   : > { %v198_v9 = vld [vmem:[%s717_s8] sm:$0xff]  ;;  %v558_v15 = vld [vmem:[%s717_s8 + $0x10] sm:$0xff] }
  0x10   : > { %v226_v10 = vld [vmem:[%s717_s8 + $0x1] sm:$0xff]  ;;  %v210_v12 = vmul.f32 %v681_v0, %v198_v9  ;;  %v567_v16 = vld [vmem:[%s717_s8 + $0x11] sm:$0xff]  ;;  %v298_v18 = vmul.f32 %v696_v3, %v558_v15  ;;  %v211_v21 = vmul.f32 %v681_v0, %v558_v15 }
  0x11   : > { %v255_v11 = vld [vmem:[%s717_s8 + $0x2] sm:$0xff]  ;;  %v239_v13 = vmul.f32 %v686_v1, %v226_v10  ;;  %v576_v17 = vld [vmem:[%s717_s8 + $0x12] sm:$0xff]  ;;  %v327_v23 = vmul.f32 %v702_v4, %v567_v16  ;;  %v240_v29 = vmul.f32 %v686_v1, %v567_v16 }
  0x12   : > { %v268_v14 = vmul.f32 %v691_v2, %v255_v11  ;;  %v585_v19 = vld [vmem:[%s717_s8 + $0x20] sm:$0xff]  ;;  %v356_v24 = vmul.f32 %v707_v5, %v576_v17  ;;  %v269_v30 = vmul.f32 %v691_v2, %v576_v17  ;;  %v586_v35 = vld [vmem:[%s717_s8 + $0x30] sm:$0xff] }
  0x13   : > { %v594_v20 = vld [vmem:[%s717_s8 + $0x21] sm:$0xff]  ;;  %v247_v22 = vadd.f32 %v239_v13, %v210_v12  ;;  %v386_v25 = vmul.f32 %v712_v6, %v585_v19  ;;  %v299_v32 = vmul.f32 %v696_v3, %v585_v19  ;;  %v248_v36 = vadd.f32 %v240_v29, %v211_v21  ;;  %v595_v38 = vld [vmem:[%s717_s8 + $0x31] sm:$0xff] }
  0x14   : > { %v603_v26 = vld [vmem:[%s717_s8 + $0x22] sm:$0xff]  ;;  %v415_v27 = vmul.f32 %v722_v7, %v594_v20  ;;  %v328_v33 = vmul.f32 %v702_v4, %v594_v20  ;;  %v387_v37 = vmul.f32 %v712_v6, %v586_v35  ;;  %v604_v39 = vld [vmem:[%s717_s8 + $0x32] sm:$0xff]  ;;  %v212_v40 = vmul.f32 %v681_v0, %v585_v19 }
  0x15   : > { %v748_v28 = vmul.f32 %v727_v8, %v603_v26  ;;  %v276_v31 = vadd.f32 %v268_v14, %v247_v22  ;;  %v357_v34 = vmul.f32 %v707_v5, %v603_v26  ;;  %v241_v41 = vmul.f32 %v686_v1, %v594_v20  ;;  %v587_v50 = vld [vmem:[%s717_s8 + $0x40] sm:$0xff]  ;;  %v588_v14 = vld [vmem:[%s717_s8 + $0x50] sm:$0xff] }
  0x16   : > { %v416_v43 = vmul.f32 %v722_v7, %v595_v38  ;;  %v445_v44 = vmul.f32 %v727_v8, %v604_v39  ;;  %v270_v45 = vmul.f32 %v691_v2, %v603_v26  ;;  %v277_v46 = vadd.f32 %v269_v30, %v248_v36  ;;  %v596_v57 = vld [vmem:[%s717_s8 + $0x41] sm:$0xff]  ;;  %v597_v22 = vld [vmem:[%s717_s8 + $0x51] sm:$0xff]  ;;  %v787_v26 = vld [vmem:[%s887_s2] ss:$0 sm:$0xff] }
  0x17   : > { %v306_v42 = vadd.f32 %v298_v18, %v276_v31  ;;  %v249_v47 = vadd.f32 %v241_v41, %v212_v40  ;;  %v300_v48 = vmul.f32 %v696_v3, %v586_v35  ;;  %v329_v49 = vmul.f32 %v702_v4, %v595_v38  ;;  %v605_v58 = vld [vmem:[%s717_s8 + $0x42] sm:$0xff]  ;;  %v798_v36 = vld [vmem:[%s888_s3] ss:$0 sm:$0xff] }
  0x18   : > { %v358_v52 = vmul.f32 %v707_v5, %v604_v39  ;;  %v388_v53 = vmul.f32 %v712_v6, %v587_v50  ;;  %v213_v54 = vmul.f32 %v681_v0, %v586_v35  ;;  %v307_v55 = vadd.f32 %v299_v32, %v277_v46  ;;  %v589_v46 = vld [vmem:[%s717_s8 + $0x60] sm:$0xff] }
  0x19   : > { %v335_v51 = vadd.f32 %v327_v23, %v306_v42  ;;  %v278_v56 = vadd.f32 %v270_v45, %v249_v47  ;;  %v242_v59 = vmul.f32 %v686_v1, %v595_v38  ;;  %v271_v60 = vmul.f32 %v691_v2, %v604_v39 }
  0x1a   : > { %v417_v62 = vmul.f32 %v722_v7, %v596_v57  ;;  %v446_v63 = vmul.f32 %v727_v8, %v605_v58  ;;  %v301_v9 = vmul.f32 %v696_v3, %v587_v50  ;;  %v336_v10 = vadd.f32 %v328_v33, %v307_v55 }
  0x1b   : > { %v364_v61 = vadd.f32 %v356_v24, %v335_v51  ;;  %v308_v11 = vadd.f32 %v300_v48, %v278_v56  ;;  %v250_v12 = vadd.f32 %v242_v59, %v213_v54  ;;  %v330_v13 = vmul.f32 %v702_v4, %v596_v57 }
  0x1c   : > { %v359_v16 = vmul.f32 %v707_v5, %v605_v58  ;;  %v389_v17 = vmul.f32 %v712_v6, %v588_v14  ;;  %v214_v18 = vmul.f32 %v681_v0, %v587_v50  ;;  %v365_v19 = vadd.f32 %v357_v34, %v336_v10  ;;  %v606_v34 = vld [vmem:[%s717_s8 + $0x52] sm:$0xff] }
  0x1d   : > { %v394_v15 = vadd.f32 %v386_v25, %v364_v61  ;;  %v337_v20 = vadd.f32 %v329_v49, %v308_v11  ;;  %v279_v21 = vadd.f32 %v271_v60, %v250_v12  ;;  %v243_v23 = vmul.f32 %v686_v1, %v596_v57  ;;  %v598_v61 = vld [vmem:[%s717_s8 + $0x61] sm:$0xff] }
  0x1e   : > { %v418_v25 = vmul.f32 %v722_v7, %v597_v22  ;;  %v272_v29 = vmul.f32 %v691_v2, %v605_v58  ;;  %v302_v30 = vmul.f32 %v696_v3, %v588_v14  ;;  %v395_v31 = vadd.f32 %v387_v37, %v365_v19 }
  0x1f   : > { %v423_v24 = vadd.f32 %v415_v27, %v394_v15  ;;  %v366_v32 = vadd.f32 %v358_v52, %v337_v20  ;;  %v309_v33 = vadd.f32 %v301_v9, %v279_v21  ;;  %v251_v35 = vadd.f32 %v243_v23, %v214_v18  ;;  %v590_v21 = vld [vmem:[%s717_s8 + $0x70] sm:$0xff] }
  0x20   : > { %v447_v38 = vmul.f32 %v727_v8, %v606_v34  ;;  %v331_v39 = vmul.f32 %v702_v4, %v597_v22  ;;  %v360_v40 = vmul.f32 %v707_v5, %v606_v34  ;;  %v424_v41 = vadd.f32 %v416_v43, %v395_v31  ;;  %v599_v31 = vld [vmem:[%s717_s8 + $0x71] sm:$0xff] }
  0x21   : > { %v452_v27 = vadd.f32 %v748_v28, %v423_v24  ;;  %v396_v37 = vadd.f32 %v388_v53, %v366_v32  ;;  %v338_v42 = vadd.f32 %v330_v13, %v309_v33  ;;  %v280_v45 = vadd.f32 %v272_v29, %v251_v35  ;;  %v608_v32 = vld [vmem:[%s717_s8 + $0x72] sm:$0xff] }
  0x22   : > { %v390_v28 = vmul.f32 %v712_v6, %v589_v46  ;;  %v215_v48 = vmul.f32 %v681_v0, %v588_v14  ;;  %v244_v49 = vmul.f32 %v686_v1, %v597_v22  ;;  %v453_v43 = vadd.f32 %v445_v44, %v424_v41 }
  0x23   : > { %v464_v47 = vmul.f32 %v787_v26, %v452_v27  ;;  %v425_v50 = vadd.f32 %v417_v62, %v396_v37  ;;  %v367_v51 = vadd.f32 %v359_v16, %v338_v42  ;;  %v310_v52 = vadd.f32 %v302_v30, %v280_v45  ;;  %v591_v37 = vld [vmem:[%s717_s8 + $0x80] sm:$0xff] }
  0x24   : > { %v252_v54 = vadd.f32 %v244_v49, %v215_v48  ;;  %v273_v55 = vmul.f32 %v691_v2, %v606_v34  ;;  %v303_v56 = vmul.f32 %v696_v3, %v589_v46  ;;  %v465_v57 = vmul.f32 %v787_v26, %v453_v43 }
  0x25   : > { %v476_v53 = vadd.f32 %v798_v36, %v464_v47  ;;  %v454_v58 = vadd.f32 %v446_v63, %v425_v50  ;;  %v397_v59 = vadd.f32 %v389_v17, %v367_v51  ;;  %v339_v60 = vadd.f32 %v331_v39, %v310_v52  ;;  %v607_v63 = vld [vmem:[%s717_s8 + $0x62] sm:$0xff] }
  0x26   : > { %v419_v44 = vmul.f32 %v722_v7, %v598_v61  ;;  %v281_v62 = vadd.f32 %v273_v55, %v252_v54  ;;  %v332_v9 = vmul.f32 %v702_v4, %v598_v61  ;;  %v477_v10 = vadd.f32 %v798_v36, %v465_v57  ;;  %v600_v50 = vld [vmem:[%s717_s8 + $0x81] sm:$0xff] }
  0x27   : > { %485 = vst.msk [vmem:[%s811_s21] sm:$0xff] %vm484_vm0, %v476_v53  ;;  %v466_v11 = vmul.f32 %v787_v26, %v454_v58  ;;  %v426_v12 = vadd.f32 %v418_v25, %v397_v59  ;;  %v368_v13 = vadd.f32 %v360_v40, %v339_v60  ;;  %v448_v14 = vmul.f32 %v727_v8, %v607_v63  ;;  %v609_v54 = vld [vmem:[%s717_s8 + $0x82] sm:$0xff]  ;;  %v592_v60 = vld [vmem:[%s717_s8 + $0x90] sm:$0xff] }
  0x28   : > { %v311_v15 = vadd.f32 %v303_v56, %v281_v62  ;;  %v361_v16 = vmul.f32 %v707_v5, %v607_v63  ;;  %v216_v17 = vmul.f32 %v681_v0, %v589_v46  ;;  %486 = vst.msk [vmem:[%s811_s21 + $0x8] sm:$0xff] %vm484_vm0, %v477_v10  ;;  %v245_v22 = vmul.f32 %v686_v1, %v598_v61  ;;  %v601_v10 = vld [vmem:[%s717_s8 + $0x91] sm:$0xff] }
  0x29   : > { %v478_v18 = vadd.f32 %v798_v36, %v466_v11  ;;  %v455_v19 = vadd.f32 %v447_v38, %v426_v12  ;;  %v398_v20 = vadd.f32 %v390_v28, %v368_v13  ;;  %v391_v24 = vmul.f32 %v712_v6, %v590_v21 }
  0x2a   : > { %v340_v23 = vadd.f32 %v332_v9, %v311_v15  ;;  %v274_v25 = vmul.f32 %v691_v2, %v607_v63  ;;  %v253_v33 = vadd.f32 %v245_v22, %v216_v17  ;;  %v304_v34 = vmul.f32 %v696_v3, %v590_v21  ;;  %v610_v63 = vld [vmem:[%s717_s8 + $0x92] sm:$0xff] }
  0x2b   : > { %487 = vst.msk [vmem:[%s811_s21 + $0x10] sm:$0xff] %vm484_vm0, %v478_v18  ;;  %v467_v29 = vmul.f32 %v787_v26, %v455_v19  ;;  %v427_v30 = vadd.f32 %v419_v44, %v398_v20  ;;  %v420_v27 = vmul.f32 %v722_v7, %v599_v31  ;;  %v333_v38 = vmul.f32 %v702_v4, %v599_v31 }
  0x2c   : > { %v369_v35 = vadd.f32 %v361_v16, %v340_v23  ;;  %v282_v41 = vadd.f32 %v274_v25, %v253_v33  ;;  %v217_v42 = vmul.f32 %v681_v0, %v590_v21  ;;  %v449_v46 = vmul.f32 %v727_v8, %v608_v32 }
  0x2d   : > { %v479_v39 = vadd.f32 %v798_v36, %v467_v29  ;;  %v456_v40 = vadd.f32 %v448_v14, %v427_v30  ;;  %v246_v47 = vmul.f32 %v686_v1, %v599_v31  ;;  %v275_v28 = vmul.f32 %v691_v2, %v608_v32 }
  0x2e   : > { %v399_v45 = vadd.f32 %v391_v24, %v369_v35  ;;  %v312_v49 = vadd.f32 %v304_v34, %v282_v41  ;;  %v362_v43 = vmul.f32 %v707_v5, %v608_v32  ;;  %v305_v52 = vmul.f32 %v696_v3, %v591_v37 }
  0x2f   : > { %488 = vst.msk [vmem:[%s811_s21 + $0x18] sm:$0xff] %vm484_vm0, %v479_v39  ;;  %v468_v48 = vmul.f32 %v787_v26, %v456_v40  ;;  %v254_v0 = vadd.f32 %v246_v47, %v217_v42  ;;  %v392_v2 = vmul.f32 %v712_v6, %v591_v37  ;;  %v334_v57 = vmul.f32 %v702_v4, %v600_v50 }
  0x30   : > { %v428_v51 = vadd.f32 %v420_v27, %v399_v45  ;;  %v341_v1 = vadd.f32 %v333_v38, %v312_v49  ;;  %v421_v59 = vmul.f32 %v722_v7, %v600_v50  ;;  %v363_v44 = vmul.f32 %v707_v5, %v609_v54 }
  0x31   : > { %v480_v53 = vadd.f32 %v798_v36, %v468_v48  ;;  %v283_v56 = vadd.f32 %v275_v28, %v254_v0  ;;  %v450_v9 = vmul.f32 %v727_v8, %v609_v54  ;;  %v393_v12 = vmul.f32 %v712_v6, %v592_v60 }
  0x32   : > { %v457_v55 = vadd.f32 %v449_v46, %v428_v51  ;;  %v370_v58 = vadd.f32 %v362_v43, %v341_v1  ;;  %v422_v15 = vmul.f32 %v722_v7, %v601_v10  ;;  %v451_v17 = vmul.f32 %v727_v8, %v610_v63 }
  0x33   : > { %489 = vst.msk [vmem:[%s811_s21 + $0x20] sm:$0xff] %vm484_vm0, %v480_v53  ;;  %v313_v61 = vadd.f32 %v305_v52, %v283_v56 }
  0x34   : > { %v469_v3 = vmul.f32 %v787_v26, %v457_v55  ;;  %v400_v62 = vadd.f32 %v392_v2, %v370_v58 }
  0x35   : > { %v342_v4 = vadd.f32 %v334_v57, %v313_v61 }
  0x36   : > { %v481_v11 = vadd.f32 %v798_v36, %v469_v3  ;;  %v429_v13 = vadd.f32 %v421_v59, %v400_v62 }
  0x37   : > { %v371_v14 = vadd.f32 %v363_v44, %v342_v4 }
  0x38   : > { %490 = vst.msk [vmem:[%s811_s21 + $0x28] sm:$0xff] %vm484_vm0, %v481_v11  ;;  %v458_v16 = vadd.f32 %v450_v9, %v429_v13 }
  0x39   : > { %v401_v5 = vadd.f32 %v393_v12, %v371_v14 }
  0x3a   : > { %v470_v18 = vmul.f32 %v787_v26, %v458_v16 }
  0x3b   : > { %v430_v19 = vadd.f32 %v422_v15, %v401_v5 }
  0x3c   : > { %v482_v20 = vadd.f32 %v798_v36, %v470_v18 }
  0x3d   : > { %v459_v21 = vadd.f32 %v451_v17, %v430_v19 }
  0x3e   : > { %491 = vst.msk [vmem:[%s811_s21 + $0x30] sm:$0xff] %vm484_vm0, %v482_v20 }
  0x3f   : > { %v471_v6 = vmul.f32 %v787_v26, %v459_v21 }
  0x41   : > { %v483_v22 = vadd.f32 %v798_v36, %v471_v6 }
  0x43   : > { %492 = vst.msk [vmem:[%s811_s21 + $0x38] sm:$0xff] %vm484_vm0, %v483_v22 }
  0x44 PF: > { %s14_s15 = sadd.s32 1, %s641_s15  }
  0x45   : > { %p11_p4 = scmp.ge.s32.totalorder %s14_s15, 4  }
  0x47   :  { %13 = sbr.rel (!%p11_p4) target bundleno = 1 (0x1), region = 76 }

// kernel: _lambda_.13
= control target key start
LH: loop header
LB: loop body
LE: loop exit
PB: predicated region body
PF: predicated region fallthrough
CT: control target
= control target key end

     0   :  { %vm102_vm0 = vcmask 1043456   ;;  %s878_s0 = inlined_call_operand.vmem [shape: f32[128,60], index: 0, kind: input, shape index: {}]   ;;  %s879_s1 = inlined_call_operand.vmem [shape: f32[60,256], index: 1, kind: input, shape index: {}]   ;;  %s880_s2 = inlined_call_operand.vmem [shape: f32[1,256], index: 2, kind: input, shape index: {}]   ;;  %s881_s3 = inlined_call_operand.vmem [shape: f32[1,256], index: 3, kind: input, shape index: {}]   ;;  %s882_s4 = inlined_call_operand.vmem [shape: f32[128,256], index: 4, kind: input, shape index: {}]   ;;  %s883_s5 = inlined_call_operand.hbm [shape: f32[128,256], index: 5, kind: output, shape index: {}]  }
   0x1   :  { %v51_v0 = vld [vmem:[%s879_s1 + $0x70] sm:$0xf]  ;;  %v52_v1 = vld [vmem:[%s879_s1 + $0x78] sm:$0xf]  ;;  %v49_v2 = vld [vmem:[%s879_s1 + $0x60] sm:$0xff] }
   0x2   :  { %495 = vmatpush.msk.msra.mxu2 %vm102_vm0, %v51_v0  ;;  %503 = vmatpush.msk.msra.mxu3 %vm102_vm0, %v52_v1  ;;  %v50_v3 = vld [vmem:[%s879_s1 + $0x68] sm:$0xff]  ;;  %v47_v4 = vld [vmem:[%s879_s1 + $0x50] sm:$0xff]  ;;  %v48_v5 = vld [vmem:[%s879_s1 + $0x58] sm:$0xff] }
   0x3   :  { %461 = vmatpush.msk.msra.mxu0 %vm102_vm0, %v51_v0  ;;  %478 = vmatpush.msk.msra.mxu1 %vm102_vm0, %v52_v1  ;;  %v45_v6 = vld [vmem:[%s879_s1 + $0x40] sm:$0xff]  ;;  %v46_v7 = vld [vmem:[%s879_s1 + $0x48] sm:$0xff]  ;;  %v43_v8 = vld [vmem:[%s879_s1 + $0x30] sm:$0xff] }
   0x4   :  { %496 = vmatpush.msra.mxu2 %v49_v2  ;;  %504 = vmatpush.msra.mxu3 %v50_v3  ;;  %v44_v9 = vld [vmem:[%s879_s1 + $0x38] sm:$0xff] }
   0x5   :  { %118 = vmatpush.msra.mxu0 %v49_v2  ;;  %183 = vmatpush.msra.mxu1 %v50_v3 }
   0x6   :  { %497 = vmatpush.msra.mxu2 %v47_v4  ;;  %505 = vmatpush.msra.mxu3 %v48_v5 }
   0x7   :  { %119 = vmatpush.msra.mxu0 %v47_v4  ;;  %184 = vmatpush.msra.mxu1 %v48_v5 }
   0x8   :  { %498 = vmatpush.msra.mxu2 %v45_v6  ;;  %506 = vmatpush.msra.mxu3 %v46_v7 }
   0x9   :  { %10 = vsyncpa [#allocation3], 0  ;;  %v41_v10 = vld [vmem:[%s879_s1 + $0x20] sm:$0xff]  ;;  %v42_v11 = vld [vmem:[%s879_s1 + $0x28] sm:$0xff]  ;;  %120 = vmatpush.msra.mxu0 %v45_v6  ;;  %185 = vmatpush.msra.mxu1 %v46_v7  ;;  %vm53_vm1 = vcmask 490496   ;;  %s540_s12 = smov [#allocation2]  }
   0xa   :  { %499 = vmatpush.msra.mxu2 %v43_v8  ;;  %507 = vmatpush.msra.mxu3 %v44_v9  ;;  %v39_v12 = vld [vmem:[%s879_s1 + $0x10] sm:$0xff]  ;;  %v40_v13 = vld [vmem:[%s879_s1 + $0x18] sm:$0xff]  ;;  %v37_v14 = vld [vmem:[%s879_s1] sm:$0xff]  ;;  %s447_s13 = sshll.u32 %s540_s12, 4  ;;  %s449_s16 = sshll.u32 %s883_s5, 4  ;;  %s448_s13 = int_to_ptr.vmem [resolvable:$true] %s447_s13  ;;  %s450_s16 = int_to_ptr.hbm [resolvable:$true] %s449_s16 }
   0xb   :  { %121 = vmatpush.msra.mxu0 %v43_v8  ;;  %186 = vmatpush.msra.mxu1 %v44_v9  ;;  %v38_v15 = vld [vmem:[%s879_s1 + $0x8] sm:$0xff]  ;;  %v29_v16 = vld [vmem:[%s878_s0 + $0x40] sm:$0xff]  ;;  %v31_v20 = vld [vmem:[%s878_s0 + $0x50] sm:$0xff]  ;;  %s542_s17 = smov 16  }
   0xc   :  { %500 = vmatpush.msra.mxu2 %v41_v10  ;;  %508 = vmatpush.msra.mxu3 %v42_v11  ;;  %v21_v17 = vld [vmem:[%s878_s0] sm:$0xff]  ;;  %v30_v18 = vld [vmem:[%s878_s0 + $0x48] sm:$0xff]  ;;  %v23_v21 = vld [vmem:[%s878_s0 + $0x10] sm:$0xff] }
   0xd   :  { %122 = vmatpush.msra.mxu0 %v41_v10  ;;  %187 = vmatpush.msra.mxu1 %v42_v11  ;;  %v22_v19 = vld [vmem:[%s878_s0 + $0x8] sm:$0xff]  ;;  %v32_v22 = vld [vmem:[%s878_s0 + $0x58] sm:$0xff]  ;;  %v33_v24 = vld [vmem:[%s878_s0 + $0x60] sm:$0xff] }
   0xe   :  { %501 = vmatpush.msra.mxu2 %v39_v12  ;;  %509 = vmatpush.msra.mxu3 %v40_v13  ;;  %v24_v23 = vld [vmem:[%s878_s0 + $0x18] sm:$0xff]  ;;  %v25_v25 = vld [vmem:[%s878_s0 + $0x20] sm:$0xff]  ;;  %v34_v26 = vld [vmem:[%s878_s0 + $0x68] sm:$0xff] }
   0xf   :  { %123 = vmatpush.msra.mxu0 %v39_v12  ;;  %188 = vmatpush.msra.mxu1 %v40_v13  ;;  %v26_v27 = vld [vmem:[%s878_s0 + $0x28] sm:$0xff]  ;;  %v35_v28 = vld [vmem:[%s878_s0 + $0x70] sm:$0xff]  ;;  %v36_v30 = vld [vmem:[%s878_s0 + $0x78] sm:$0xff] }
  0x10   :  { %502 = vmatpush.msra.mxu2 %v37_v14  ;;  %510 = vmatpush.msra.mxu3 %v38_v15  ;;  %v27_v29 = vld [vmem:[%s878_s0 + $0x30] sm:$0xff]  ;;  %v28_v31 = vld [vmem:[%s878_s0 + $0x38] sm:$0xff]  ;;  %v239_v32 = vld [vmem:[%s880_s2] sm:$0x3] }
  0x11   :  { %470 = vmatmul.msk.f32.vlgmr.msra.gmra.mxu2 %vm53_vm1, %v29_v16  ;;  %487 = vmatmul.msk.f32.vlgmr.msra.gmra.mxu3 %vm53_vm1, %v29_v16  ;;  %v277_v33 = vld [vmem:[%s881_s3] sm:$0x3]  ;;  %v707_v34 = vperm.slane %v239_v32, 0  ;;  %v709_v35 = vperm.slane %v239_v32, 1  ;;  %v316_v43 = vld [vmem:[%s882_s4 + $0x8] sm:$0xff]  ;;  %v317_v0 = vld [vmem:[%s882_s4 + $0x10] sm:$0xff] }
  0x12   :  { %124 = vmatpush.msra.mxu0 %v37_v14  ;;  %189 = vmatpush.msra.mxu1 %v38_v15  ;;  %v711_v36 = vperm.slane %v277_v33, 0  ;;  %v713_v37 = vperm.slane %v277_v33, 1  ;;  %v315_v42 = vld [vmem:[%s882_s4] sm:$0xff]  ;;  %v332_v53 = vld [vmem:[%s882_s4 + $0x88] sm:$0xff]  ;;  %v318_v1 = vld [vmem:[%s882_s4 + $0x18] sm:$0xff] }
  0x13   :  { %462 = vmatmul.msk.f32.vlgmr.msra.gmra.mxu0 %vm53_vm1, %v21_v17  ;;  %479 = vmatmul.msk.f32.vlgmr.msra.gmra.mxu1 %vm53_vm1, %v21_v17  ;;  %v331_v52 = vld [vmem:[%s882_s4 + $0x80] sm:$0xff]  ;;  %v333_v12 = vld [vmem:[%s882_s4 + $0x90] sm:$0xff]  ;;  %v334_v13 = vld [vmem:[%s882_s4 + $0x98] sm:$0xff] }
  0x19   :  { %471 = vmatmul.msk.f32.gmra.mxu2 %vm53_vm1, %v30_v18  ;;  %488 = vmatmul.msk.f32.gmra.mxu3 %vm53_vm1, %v30_v18 }
  0x1b   :  { %463 = vmatmul.msk.f32.gmra.mxu0 %vm53_vm1, %v22_v19  ;;  %480 = vmatmul.msk.f32.gmra.mxu1 %vm53_vm1, %v22_v19 }
  0x21   :  { %472 = vmatmul.msk.f32.gmra.mxu2 %vm53_vm1, %v31_v20  ;;  %489 = vmatmul.msk.f32.gmra.mxu3 %vm53_vm1, %v31_v20 }
  0x23   :  { %464 = vmatmul.msk.f32.gmra.mxu0 %vm53_vm1, %v23_v21  ;;  %481 = vmatmul.msk.f32.gmra.mxu1 %vm53_vm1, %v23_v21 }
  0x29   :  { %473 = vmatmul.msk.f32.gmra.mxu2 %vm53_vm1, %v32_v22  ;;  %490 = vmatmul.msk.f32.gmra.mxu3 %vm53_vm1, %v32_v22 }
  0x2b   :  { %465 = vmatmul.msk.f32.gmra.mxu0 %vm53_vm1, %v24_v23  ;;  %482 = vmatmul.msk.f32.gmra.mxu1 %vm53_vm1, %v24_v23 }
  0x31   :  { %474 = vmatmul.msk.f32.gmra.mxu2 %vm53_vm1, %v33_v24  ;;  %491 = vmatmul.msk.f32.gmra.mxu3 %vm53_vm1, %v33_v24  ;;  %v319_v24 = vld [vmem:[%s882_s4 + $0x20] sm:$0xff] }
  0x33   :  { %466 = vmatmul.msk.f32.gmra.mxu0 %vm53_vm1, %v25_v25  ;;  %483 = vmatmul.msk.f32.gmra.mxu1 %vm53_vm1, %v25_v25  ;;  %v320_v25 = vld [vmem:[%s882_s4 + $0x28] sm:$0xff] }
  0x39   :  { %475 = vmatmul.msk.f32.gmra.mxu2 %vm53_vm1, %v34_v26  ;;  %492 = vmatmul.msk.f32.gmra.mxu3 %vm53_vm1, %v34_v26 }
  0x3b   :  { %467 = vmatmul.msk.f32.gmra.mxu0 %vm53_vm1, %v26_v27  ;;  %484 = vmatmul.msk.f32.gmra.mxu1 %vm53_vm1, %v26_v27 }
  0x41   :  { %476 = vmatmul.msk.f32.gmra.mxu2 %vm53_vm1, %v35_v28  ;;  %493 = vmatmul.msk.f32.gmra.mxu3 %vm53_vm1, %v35_v28 }
  0x43   :  { %468 = vmatmul.msk.f32.gmra.mxu0 %vm53_vm1, %v27_v29  ;;  %485 = vmatmul.msk.f32.gmra.mxu1 %vm53_vm1, %v27_v29 }
  0x49   :  { %477 = vmatmul.msk.f32.gmra.mxu2 %vm53_vm1, %v36_v30  ;;  %494 = vmatmul.msk.f32.gmra.mxu3 %vm53_vm1, %v36_v30 }
  0x4b   :  { %469 = vmatmul.msk.f32.gmra.mxu0 %vm53_vm1, %v28_v31  ;;  %486 = vmatmul.msk.f32.gmra.mxu1 %vm53_vm1, %v28_v31 }
  0x90   :  { %v126_v38 = vpop.f32.mrf.mxu0  ;;  %v191_v39 = vpop.f32.mrf.mxu1 }
  0x91   :  { %v245_v40 = vmul.f32 %v707_v34, %v126_v38  ;;  %v246_v41 = vmul.f32 %v709_v35, %v191_v39 }
  0x93   :  { %v283_v44 = vadd.f32 %v711_v36, %v245_v40  ;;  %v284_v45 = vadd.f32 %v713_v37, %v246_v41  ;;  %v335_v40 = vld [vmem:[%s882_s4 + $0xa0] sm:$0xff]  ;;  %v336_v41 = vld [vmem:[%s882_s4 + $0xa8] sm:$0xff] }
  0x94   :  { %v150_v46 = vpop.f32.mrf.mxu2  ;;  %v215_v47 = vpop.f32.mrf.mxu3 }
  0x95   :  { %v347_v48 = vadd.f32 %v315_v42, %v283_v44  ;;  %v261_v49 = vmul.f32 %v707_v34, %v150_v46  ;;  %v348_v50 = vadd.f32 %v316_v43, %v284_v45  ;;  %v262_v51 = vmul.f32 %v709_v35, %v215_v47 }
  0x97   :  { %v379_v54 = vmax.f32 %v347_v48, 0.0  ;;  %v299_v55 = vadd.f32 %v711_v36, %v261_v49  ;;  %v380_v56 = vmax.f32 %v348_v50, 0.0  ;;  %v300_v57 = vadd.f32 %v713_v37, %v262_v51 }
  0x98   :  { %v129_v58 = vpop.f32.mrf.mxu0  ;;  %v194_v59 = vpop.f32.mrf.mxu1 }
  0x99   :  { %411 = vst [vmem:[#allocation2] sm:$0xff] %v379_v54  ;;  %v363_v60 = vadd.f32 %v331_v52, %v299_v55  ;;  %v364_v61 = vadd.f32 %v332_v53, %v300_v57  ;;  %v247_v62 = vmul.f32 %v707_v34, %v129_v58  ;;  %v248_v63 = vmul.f32 %v709_v35, %v194_v59  ;;  %v321_v52 = vld [vmem:[%s882_s4 + $0x30] sm:$0xff]  ;;  %v322_v53 = vld [vmem:[%s882_s4 + $0x38] sm:$0xff] }
  0x9a   :  { %412 = vst [vmem:[#allocation2 + $0x8] sm:$0xff] %v380_v56 }
  0x9b   :  { %v395_v2 = vmax.f32 %v363_v60, 0.0  ;;  %v396_v3 = vmax.f32 %v364_v61, 0.0  ;;  %v285_v4 = vadd.f32 %v711_v36, %v247_v62  ;;  %v286_v5 = vadd.f32 %v713_v37, %v248_v63 }
  0x9c   :  { %v153_v6 = vpop.f32.mrf.mxu2  ;;  %v218_v7 = vpop.f32.mrf.mxu3 }
  0x9d   :  { %427 = vst [vmem:[#allocation2 + $0x80] sm:$0xff] %v395_v2  ;;  %v349_v8 = vadd.f32 %v317_v0, %v285_v4  ;;  %v263_v9 = vmul.f32 %v707_v34, %v153_v6  ;;  %v350_v10 = vadd.f32 %v318_v1, %v286_v5  ;;  %v264_v11 = vmul.f32 %v709_v35, %v218_v7  ;;  %v337_v0 = vld [vmem:[%s882_s4 + $0xb0] sm:$0xff]  ;;  %v338_v1 = vld [vmem:[%s882_s4 + $0xb8] sm:$0xff] }
  0x9e   :  { %428 = vst [vmem:[#allocation2 + $0x88] sm:$0xff] %v396_v3 }
  0x9f   :  { %v381_v14 = vmax.f32 %v349_v8, 0.0  ;;  %v301_v15 = vadd.f32 %v711_v36, %v263_v9  ;;  %v382_v16 = vmax.f32 %v350_v10, 0.0  ;;  %v302_v17 = vadd.f32 %v713_v37, %v264_v11 }
  0xa0   :  { %v132_v18 = vpop.f32.mrf.mxu0  ;;  %v197_v19 = vpop.f32.mrf.mxu1 }
  0xa1   :  { %413 = vst [vmem:[#allocation2 + $0x10] sm:$0xff] %v381_v14  ;;  %v365_v20 = vadd.f32 %v333_v12, %v301_v15  ;;  %v366_v21 = vadd.f32 %v334_v13, %v302_v17  ;;  %v249_v22 = vmul.f32 %v707_v34, %v132_v18  ;;  %v250_v23 = vmul.f32 %v709_v35, %v197_v19  ;;  %v323_v12 = vld [vmem:[%s882_s4 + $0x40] sm:$0xff]  ;;  %v324_v13 = vld [vmem:[%s882_s4 + $0x48] sm:$0xff] }
  0xa2   :  { %414 = vst [vmem:[#allocation2 + $0x18] sm:$0xff] %v382_v16 }
  0xa3   :  { %v397_v26 = vmax.f32 %v365_v20, 0.0  ;;  %v398_v27 = vmax.f32 %v366_v21, 0.0  ;;  %v287_v28 = vadd.f32 %v711_v36, %v249_v22  ;;  %v288_v29 = vadd.f32 %v713_v37, %v250_v23 }
  0xa4   :  { %v156_v30 = vpop.f32.mrf.mxu2  ;;  %v221_v31 = vpop.f32.mrf.mxu3 }
  0xa5   :  { %429 = vst [vmem:[#allocation2 + $0x90] sm:$0xff] %v397_v26  ;;  %v351_v32 = vadd.f32 %v319_v24, %v287_v28  ;;  %v265_v33 = vmul.f32 %v707_v34, %v156_v30  ;;  %v352_v38 = vadd.f32 %v320_v25, %v288_v29  ;;  %v266_v39 = vmul.f32 %v709_v35, %v221_v31  ;;  %v339_v24 = vld [vmem:[%s882_s4 + $0xc0] sm:$0xff]  ;;  %v340_v25 = vld [vmem:[%s882_s4 + $0xc8] sm:$0xff] }
  0xa6   :  { %430 = vst [vmem:[#allocation2 + $0x98] sm:$0xff] %v398_v27 }
  0xa7   :  { %v383_v42 = vmax.f32 %v351_v32, 0.0  ;;  %v303_v43 = vadd.f32 %v711_v36, %v265_v33  ;;  %v384_v44 = vmax.f32 %v352_v38, 0.0  ;;  %v304_v45 = vadd.f32 %v713_v37, %v266_v39 }
  0xa8   :  { %v135_v46 = vpop.f32.mrf.mxu0  ;;  %v200_v47 = vpop.f32.mrf.mxu1 }
  0xa9   :  { %415 = vst [vmem:[#allocation2 + $0x20] sm:$0xff] %v383_v42  ;;  %v367_v48 = vadd.f32 %v335_v40, %v303_v43  ;;  %v368_v49 = vadd.f32 %v336_v41, %v304_v45  ;;  %v251_v50 = vmul.f32 %v707_v34, %v135_v46  ;;  %v252_v51 = vmul.f32 %v709_v35, %v200_v47  ;;  %v325_v40 = vld [vmem:[%s882_s4 + $0x50] sm:$0xff]  ;;  %v326_v41 = vld [vmem:[%s882_s4 + $0x58] sm:$0xff] }
  0xaa   :  { %416 = vst [vmem:[#allocation2 + $0x28] sm:$0xff] %v384_v44 }
  0xab   :  { %v399_v54 = vmax.f32 %v367_v48, 0.0  ;;  %v400_v55 = vmax.f32 %v368_v49, 0.0  ;;  %v289_v56 = vadd.f32 %v711_v36, %v251_v50  ;;  %v290_v57 = vadd.f32 %v713_v37, %v252_v51 }
  0xac   :  { %v159_v58 = vpop.f32.mrf.mxu2  ;;  %v224_v59 = vpop.f32.mrf.mxu3 }
  0xad   :  { %431 = vst [vmem:[#allocation2 + $0xa0] sm:$0xff] %v399_v54  ;;  %v353_v60 = vadd.f32 %v321_v52, %v289_v56  ;;  %v267_v61 = vmul.f32 %v707_v34, %v159_v58  ;;  %v354_v62 = vadd.f32 %v322_v53, %v290_v57  ;;  %v268_v63 = vmul.f32 %v709_v35, %v224_v59  ;;  %v341_v52 = vld [vmem:[%s882_s4 + $0xd0] sm:$0xff]  ;;  %v342_v53 = vld [vmem:[%s882_s4 + $0xd8] sm:$0xff] }
  0xae   :  { %432 = vst [vmem:[#allocation2 + $0xa8] sm:$0xff] %v400_v55 }
  0xaf   :  { %v385_v2 = vmax.f32 %v353_v60, 0.0  ;;  %v305_v3 = vadd.f32 %v711_v36, %v267_v61  ;;  %v386_v4 = vmax.f32 %v354_v62, 0.0  ;;  %v306_v5 = vadd.f32 %v713_v37, %v268_v63 }
  0xb0   :  { %v138_v6 = vpop.f32.mrf.mxu0  ;;  %v203_v7 = vpop.f32.mrf.mxu1 }
  0xb1   :  { %417 = vst [vmem:[#allocation2 + $0x30] sm:$0xff] %v385_v2  ;;  %v369_v8 = vadd.f32 %v337_v0, %v305_v3  ;;  %v370_v9 = vadd.f32 %v338_v1, %v306_v5  ;;  %v253_v10 = vmul.f32 %v707_v34, %v138_v6  ;;  %v254_v11 = vmul.f32 %v709_v35, %v203_v7  ;;  %v327_v0 = vld [vmem:[%s882_s4 + $0x60] sm:$0xff]  ;;  %v328_v1 = vld [vmem:[%s882_s4 + $0x68] sm:$0xff] }
  0xb2   :  { %418 = vst [vmem:[#allocation2 + $0x38] sm:$0xff] %v386_v4 }
  0xb3   :  { %v401_v14 = vmax.f32 %v369_v8, 0.0  ;;  %v402_v15 = vmax.f32 %v370_v9, 0.0  ;;  %v291_v16 = vadd.f32 %v711_v36, %v253_v10  ;;  %v292_v17 = vadd.f32 %v713_v37, %v254_v11 }
  0xb4   :  { %v162_v18 = vpop.f32.mrf.mxu2  ;;  %v227_v19 = vpop.f32.mrf.mxu3 }
  0xb5   :  { %433 = vst [vmem:[#allocation2 + $0xb0] sm:$0xff] %v401_v14  ;;  %v355_v20 = vadd.f32 %v323_v12, %v291_v16  ;;  %v269_v21 = vmul.f32 %v707_v34, %v162_v18  ;;  %v356_v22 = vadd.f32 %v324_v13, %v292_v17  ;;  %v270_v23 = vmul.f32 %v709_v35, %v227_v19  ;;  %v343_v12 = vld [vmem:[%s882_s4 + $0xe0] sm:$0xff]  ;;  %v344_v13 = vld [vmem:[%s882_s4 + $0xe8] sm:$0xff] }
  0xb6   :  { %434 = vst [vmem:[#allocation2 + $0xb8] sm:$0xff] %v402_v15 }
  0xb7   :  { %v387_v26 = vmax.f32 %v355_v20, 0.0  ;;  %v307_v27 = vadd.f32 %v711_v36, %v269_v21  ;;  %v388_v28 = vmax.f32 %v356_v22, 0.0  ;;  %v308_v29 = vadd.f32 %v713_v37, %v270_v23 }
  0xb8   :  { %v141_v30 = vpop.f32.mrf.mxu0  ;;  %v206_v31 = vpop.f32.mrf.mxu1 }
  0xb9   :  { %419 = vst [vmem:[#allocation2 + $0x40] sm:$0xff] %v387_v26  ;;  %v371_v32 = vadd.f32 %v339_v24, %v307_v27  ;;  %v372_v33 = vadd.f32 %v340_v25, %v308_v29  ;;  %v255_v38 = vmul.f32 %v707_v34, %v141_v30  ;;  %v256_v39 = vmul.f32 %v709_v35, %v206_v31  ;;  %v329_v24 = vld [vmem:[%s882_s4 + $0x70] sm:$0xff]  ;;  %v330_v25 = vld [vmem:[%s882_s4 + $0x78] sm:$0xff] }
  0xba   :  { %420 = vst [vmem:[#allocation2 + $0x48] sm:$0xff] %v388_v28 }
  0xbb   :  { %v403_v42 = vmax.f32 %v371_v32, 0.0  ;;  %v404_v43 = vmax.f32 %v372_v33, 0.0  ;;  %v293_v44 = vadd.f32 %v711_v36, %v255_v38  ;;  %v294_v45 = vadd.f32 %v713_v37, %v256_v39 }
  0xbc   :  { %v165_v46 = vpop.f32.mrf.mxu2  ;;  %v230_v47 = vpop.f32.mrf.mxu3 }
  0xbd   :  { %435 = vst [vmem:[#allocation2 + $0xc0] sm:$0xff] %v403_v42  ;;  %v357_v48 = vadd.f32 %v325_v40, %v293_v44  ;;  %v271_v49 = vmul.f32 %v707_v34, %v165_v46  ;;  %v358_v50 = vadd.f32 %v326_v41, %v294_v45  ;;  %v272_v51 = vmul.f32 %v709_v35, %v230_v47  ;;  %v345_v40 = vld [vmem:[%s882_s4 + $0xf0] sm:$0xff]  ;;  %v346_v41 = vld [vmem:[%s882_s4 + $0xf8] sm:$0xff]  ;;  %s541_s4 = smov 256  }
  0xbe   :  { %436 = vst [vmem:[#allocation2 + $0xc8] sm:$0xff] %v404_v43 }
  0xbf   :  { %v389_v54 = vmax.f32 %v357_v48, 0.0  ;;  %v309_v55 = vadd.f32 %v711_v36, %v271_v49  ;;  %v390_v56 = vmax.f32 %v358_v50, 0.0  ;;  %v310_v57 = vadd.f32 %v713_v37, %v272_v51 }
  0xc0   :  { %v144_v58 = vpop.f32.mrf.mxu0  ;;  %v209_v59 = vpop.f32.mrf.mxu1 }
  0xc1   :  { %421 = vst [vmem:[#allocation2 + $0x50] sm:$0xff] %v389_v54  ;;  %v373_v60 = vadd.f32 %v341_v52, %v309_v55  ;;  %v374_v61 = vadd.f32 %v342_v53, %v310_v57  ;;  %v257_v62 = vmul.f32 %v707_v34, %v144_v58  ;;  %v258_v63 = vmul.f32 %v709_v35, %v209_v59 }
  0xc2   :  { %422 = vst [vmem:[#allocation2 + $0x58] sm:$0xff] %v390_v56 }
  0xc3   :  { %v405_v2 = vmax.f32 %v373_v60, 0.0  ;;  %v406_v3 = vmax.f32 %v374_v61, 0.0  ;;  %v295_v4 = vadd.f32 %v711_v36, %v257_v62  ;;  %v296_v5 = vadd.f32 %v713_v37, %v258_v63 }
  0xc4   :  { %v168_v6 = vpop.f32.mrf.mxu2  ;;  %v233_v7 = vpop.f32.mrf.mxu3 }
  0xc5   :  { %437 = vst [vmem:[#allocation2 + $0xd0] sm:$0xff] %v405_v2  ;;  %v359_v8 = vadd.f32 %v327_v0, %v295_v4  ;;  %v273_v9 = vmul.f32 %v707_v34, %v168_v6  ;;  %v360_v10 = vadd.f32 %v328_v1, %v296_v5  ;;  %v274_v11 = vmul.f32 %v709_v35, %v233_v7 }
  0xc6   :  { %438 = vst [vmem:[#allocation2 + $0xd8] sm:$0xff] %v406_v3 }
  0xc7   :  { %v391_v14 = vmax.f32 %v359_v8, 0.0  ;;  %v311_v15 = vadd.f32 %v711_v36, %v273_v9  ;;  %v392_v16 = vmax.f32 %v360_v10, 0.0  ;;  %v312_v17 = vadd.f32 %v713_v37, %v274_v11 }
  0xc8   :  { %v147_v18 = vpop.f32.mrf.mxu0  ;;  %v212_v19 = vpop.f32.mrf.mxu1 }
  0xc9   :  { %423 = vst [vmem:[#allocation2 + $0x60] sm:$0xff] %v391_v14  ;;  %v375_v20 = vadd.f32 %v343_v12, %v311_v15  ;;  %v376_v21 = vadd.f32 %v344_v13, %v312_v17  ;;  %v259_v22 = vmul.f32 %v707_v34, %v147_v18  ;;  %v260_v23 = vmul.f32 %v709_v35, %v212_v19 }
  0xca   :  { %424 = vst [vmem:[#allocation2 + $0x68] sm:$0xff] %v392_v16 }
  0xcb   :  { %v407_v26 = vmax.f32 %v375_v20, 0.0  ;;  %v408_v27 = vmax.f32 %v376_v21, 0.0  ;;  %v297_v28 = vadd.f32 %v711_v36, %v259_v22  ;;  %v298_v29 = vadd.f32 %v713_v37, %v260_v23 }
  0xcc   :  { %v171_v30 = vpop.f32.mrf.mxu2  ;;  %v236_v31 = vpop.f32.mrf.mxu3 }
  0xcd   :  { %439 = vst [vmem:[#allocation2 + $0xe0] sm:$0xff] %v407_v26  ;;  %v361_v32 = vadd.f32 %v329_v24, %v297_v28  ;;  %v275_v33 = vmul.f32 %v707_v34, %v171_v30  ;;  %v362_v38 = vadd.f32 %v330_v25, %v298_v29  ;;  %v276_v39 = vmul.f32 %v709_v35, %v236_v31 }
  0xce   :  { %440 = vst [vmem:[#allocation2 + $0xe8] sm:$0xff] %v408_v27 }
  0xcf   :  { %v393_v42 = vmax.f32 %v361_v32, 0.0  ;;  %v313_v43 = vadd.f32 %v711_v36, %v275_v33  ;;  %v394_v44 = vmax.f32 %v362_v38, 0.0  ;;  %v314_v45 = vadd.f32 %v713_v37, %v276_v39 }
  0xd1   :  { %425 = vst [vmem:[#allocation2 + $0x70] sm:$0xff] %v393_v42  ;;  %v377_v34 = vadd.f32 %v345_v40, %v313_v43  ;;  %v378_v35 = vadd.f32 %v346_v41, %v314_v45 }
  0xd2   :  { %426 = vst [vmem:[#allocation2 + $0x78] sm:$0xff] %v394_v44 }
  0xd3   :  { %v409_v46 = vmax.f32 %v377_v34, 0.0  ;;  %v410_v47 = vmax.f32 %v378_v35, 0.0 }
  0xd5   :  { %441 = vst [vmem:[#allocation2 + $0xf0] sm:$0xff] %v409_v46 }
  0xd6   :  { %442 = vst [vmem:[#allocation2 + $0xf8] sm:$0xff] %v410_v47 }
  0xd7   :  { %455 = dma.vmem_to_hbm [thread:$0]  %s448_s13, 4096, %s450_s16, [#allocation3], %s541_s4, %s541_s4, %s542_s17  }
  0xd8   :  { %538 = dma.done.wait [#allocation3], 4096  }
  0xd9   :  { %539 = vsyncadd [#allocation3], 4294963200 }
  0xda   :  { %460 = vsyncpa [#allocation3], 1 }

</bundles_post_ra>
